<compile_context>
chip_gen: v5e
topology: v5e:2x2
jax: 0.10.0
libtpu: 0.0.40
codegen_flags: <defaults>
</compile_context>

<pallas_src>
from functools import partial

import jax
import jax.numpy as jnp
from jax import lax
from jax.experimental import pallas as pl
from jax.experimental.pallas import tpu as pltpu

KSIZE = 5          # Conv1d kernel size
HIDDEN = 64        # conv channels
FC_HIDDEN = 128
SEQ_LEN = 40       # 40 - 3*(5-1) = 28 ; 28 * 64 = 1792 (matches the hard-coded view)
L3 = SEQ_LEN - 3 * (KSIZE - 1)   # 28
FLAT = HIDDEN * L3               # 1792


def _round_up(n, m):
    return ((n + m - 1) // m) * m


def _const_index_map(ndim):
    return lambda i: (0,) * ndim


# --------------------------------------------------------------------------
# Fused kernel: conv1..3 (im2col matmuls) + flatten + fc1 + relu + fc2
# One grid step processes TB samples.
# Activations live as (L, TB, C): L major, batch on sublanes, channels on lanes.
# --------------------------------------------------------------------------
def har_fused_kernel(x_ref, w1_ref, b1_ref, w2_ref, b2_ref, w3_ref, b3_ref,
                     wf1_ref, bf1_ref, wf2_ref, bf2_ref, o_ref):
    cd = w1_ref.dtype                # compute dtype for MXU operands (bf16 or f32)
    tb = o_ref.shape[0]              # samples per tile (multiple of 8)

    def conv_layer(h, w_ref, b_ref):
        # h: (L_in, tb, C_in); w_ref: (K*C_in, C_out) folded; b_ref: (1, C_out) f32
        l_in, _, c_in = h.shape
        l_out = l_in - (KSIZE - 1)
        # im2col: K shifted major-axis slices concatenated on the lane (feature) axis.
        patches = jnp.concatenate([h[k:k + l_out] for k in range(KSIZE)],
                                  axis=-1)                       # (l_out, tb, K*C_in)
        p2 = patches.reshape(l_out * tb, KSIZE * c_in)            # layout-preserving
        acc = jnp.dot(p2, w_ref[...], preferred_element_type=jnp.float32)
        act = jnp.maximum(acc + b_ref[...], 0.0).astype(cd)       # bias+ReLU in f32
        return act.reshape(l_out, tb, act.shape[-1])              # layout-preserving

    x = x_ref[...].astype(cd)                      # (SEQ_LEN, tb, C_in)
    h1 = conv_layer(x, w1_ref, b1_ref)             # (36, tb, 64)
    h2 = conv_layer(h1, w2_ref, b2_ref)            # (32, tb, 64)
    h3 = conv_layer(h2, w3_ref, b3_ref)            # (28, tb, 64)

    # Flatten per sample in (l, c) order; fc1 weight was pre-permuted to match,
    # so this reproduces PyTorch's x.view(B, 1792) (c-major) semantics exactly.
    flat = jnp.concatenate([h3[l] for l in range(h3.shape[0])], axis=-1)  # (tb, 1792)

    hfc = jnp.dot(flat, wf1_ref[...], preferred_element_type=jnp.float32)
    hfc = jnp.maximum(hfc + bf1_ref[...], 0.0).astype(cd)
    logits = jnp.dot(hfc, wf2_ref[...], preferred_element_type=jnp.float32) + bf2_ref[...]
    o_ref[...] = logits                                           # (tb, 128) lane-dense


# --------------------------------------------------------------------------
# One-time weight preparation (hoisted out of the forward pass).
# --------------------------------------------------------------------------
def prepare_params(params, compute_dtype=jnp.bfloat16):
    cd = compute_dtype

    def fold_conv(w):   # (C_out, C_in, K) -> (K*C_in, C_out), row index k*C_in + c
        return jnp.transpose(w, (2, 1, 0)).reshape(-1, w.shape[0]).astype(cd)

    def row_bias(b):
        return b.reshape(1, -1).astype(jnp.float32)

    # fc1: W1[j, c*28 + l]  ->  wf1[l*64 + c, j]  (matches the kernel's flatten order)
    wf1 = jnp.transpose(params["fc1_w"].reshape(FC_HIDDEN, HIDDEN, L3),
                        (2, 1, 0)).reshape(L3 * HIDDEN, FC_HIDDEN).astype(cd)

    nc = params["fc2_w"].shape[0]
    nc_pad = _round_up(max(nc, 1), 128)        # lane-dense, zero-padded classes
    wf2 = jnp.zeros((FC_HIDDEN, nc_pad), cd).at[:, :nc].set(params["fc2_w"].T.astype(cd))
    bf2 = jnp.zeros((1, nc_pad), jnp.float32).at[:, :nc].set(
        params["fc2_b"].astype(jnp.float32))

    return {
        "w1": fold_conv(params["conv1_w"]), "b1": row_bias(params["conv1_b"]),
        "w2": fold_conv(params["conv2_w"]), "b2": row_bias(params["conv2_b"]),
        "w3": fold_conv(params["conv3_w"]), "b3": row_bias(params["conv3_b"]),
        "wf1": wf1, "bf1": row_bias(params["fc1_b"]),
        "wf2": wf2, "bf2": bf2,
    }


# --------------------------------------------------------------------------
# Forward pass wrapper (single fused pallas_call).
# --------------------------------------------------------------------------
@partial(jax.jit, static_argnames=("num_classes",))
def har_forward(x, prepped, num_classes):
    """x: (B, C_in, SEQ_LEN) float32. Returns (B, num_classes) float32."""
    B, c_in, L = x.shape
    if L != SEQ_LEN:
        raise ValueError(f"sequence length must be {SEQ_LEN} (got {L})")
    cd = prepped["w1"].dtype
    nc_pad = prepped["wf2"].shape[1]

    TB = min(32, _round_up(B, 8))            # samples per grid step (multiple of 8)
    B_pad = _round_up(B, TB)

    # (B, C, L) -> (L, B_pad, C): seq major, batch on sublanes, channels on lanes.
    xt = jnp.transpose(x, (2, 0, 1)).astype(cd)
    xt = jnp.pad(xt, ((0, 0), (0, B_pad - B), (0, 0)))

    w_names = ("w1", "b1", "w2", "b2", "w3", "b3", "wf1", "bf1", "wf2", "bf2")
    w_args = [prepped[k] for k in w_names]

    in_specs = [pl.BlockSpec((SEQ_LEN, TB, c_in), lambda i: (0, i, 0))]
    in_specs += [pl.BlockSpec(a.shape, _const_index_map(a.ndim)) for a in w_args]

    out = pl.pallas_call(
        har_fused_kernel,
        out_shape=jax.ShapeDtypeStruct((B_pad, nc_pad), jnp.float32),
        grid=(B_pad // TB,),
        in_specs=in_specs,
        out_specs=pl.BlockSpec((TB, nc_pad), lambda i: (i, 0)),
        compiler_params=pltpu.CompilerParams(
            dimension_semantics=("parallel",)),   # lets v7x split batch tiles across TCs
    )(xt, *w_args)

    return out[:B, :num_classes]


# --------------------------------------------------------------------------
# Pure-JAX reference (f32, HIGHEST precision) for correctness checking.
# --------------------------------------------------------------------------
def har_reference(x, params):
    hp = lax.Precision.HIGHEST

    def conv1d(h, w, b):
        y = lax.conv_general_dilated(h, w, (1,), "VALID",
                                     dimension_numbers=("NCH", "OIH", "NCH"),
                                     precision=hp)
        return jnp.maximum(y + b[None, :, None], 0.0)

    h = conv1d(x, params["conv1_w"], params["conv1_b"])
    h = conv1d(h, params["conv2_w"], params["conv2_b"])
    h = conv1d(h, params["conv3_w"], params["conv3_b"])
    h = h.reshape(x.shape[0], FLAT)
    h = jnp.maximum(jnp.dot(h, params["fc1_w"].T, precision=hp) + params["fc1_b"], 0.0)
    return jnp.dot(h, params["fc2_w"].T, precision=hp) + params["fc2_b"]


def init_params(key, input_size, num_classes):
    ks = jax.random.split(key, 10)

    def u(k, shape, fan_in):
        bound = 1.0 / jnp.sqrt(fan_in)
        return jax.random.uniform(k, shape, jnp.float32, -bound, bound)

    return {
        "conv1_w": u(ks[0], (HIDDEN, input_size, KSIZE), input_size * KSIZE),
        "conv1_b": u(ks[1], (HIDDEN,), input_size * KSIZE),
        "conv2_w": u(ks[2], (HIDDEN, HIDDEN, KSIZE), HIDDEN * KSIZE),
        "conv2_b": u(ks[3], (HIDDEN,), HIDDEN * KSIZE),
        "conv3_w": u(ks[4], (HIDDEN, HIDDEN, KSIZE), HIDDEN * KSIZE),
        "conv3_b": u(ks[5], (HIDDEN,), HIDDEN * KSIZE),
        "fc1_w": u(ks[6], (FC_HIDDEN, FLAT), FLAT),
        "fc1_b": u(ks[7], (FC_HIDDEN,), FLAT),
        "fc2_w": u(ks[8], (num_classes, FC_HIDDEN), FC_HIDDEN),
        "fc2_b": u(ks[9], (num_classes,), FC_HIDDEN),
    }


if __name__ == "__main__":
    key = jax.random.PRNGKey(0)
    B, input_size, num_classes = 2, 4, 6
    k_x, k_p = jax.random.split(key)
    x = jax.random.normal(k_x, (B, input_size, SEQ_LEN), jnp.float32)
    params = init_params(k_p, input_size, num_classes)

    ref = jax.block_until_ready(har_reference(x, params))

    # Exact structural check with f32 matmul operands.
    prepped_f32 = prepare_params(params, jnp.float32)
    out_f32 = jax.block_until_ready(har_forward(x, prepped_f32, num_classes))
    assert out_f32.shape == (B, num_classes)
    assert jnp.allclose(out_f32, ref, atol=5e-3, rtol=5e-3), (
        "f32 kernel mismatch vs reference: "
        f"max abs diff {float(jnp.max(jnp.abs(out_f32 - ref)))}")

    # Fast bf16 path (production configuration) -- looser tolerance vs f32 reference.
    prepped_bf16 = prepare_params(params, jnp.bfloat16)
    out_bf16 = jax.block_until_ready(har_forward(x, prepped_bf16, num_classes))
    assert out_bf16.shape == (B, num_classes)
    assert jnp.allclose(out_bf16, ref, atol=1e-1, rtol=1e-1), (
        "bf16 kernel mismatch vs reference: "
        f"max abs diff {float(jnp.max(jnp.abs(out_bf16 - ref)))}")

    print("KERNEL_OK")
</pallas_src>

<mosaic_0001>
module attributes {stable_mosaic.version = 11 : i64} {
  func.func @har_fused_kernel(%arg0: i32, %arg1: memref<40x8x4xf32, #tpu.memory_space<vmem>>, %arg2: memref<20x64xf32, #tpu.memory_space<vmem>>, %arg3: memref<1x64xf32, #tpu.memory_space<vmem>>, %arg4: memref<320x64xf32, #tpu.memory_space<vmem>>, %arg5: memref<1x64xf32, #tpu.memory_space<vmem>>, %arg6: memref<320x64xf32, #tpu.memory_space<vmem>>, %arg7: memref<1x64xf32, #tpu.memory_space<vmem>>, %arg8: memref<1792x128xf32, #tpu.memory_space<vmem>>, %arg9: memref<1x128xf32, #tpu.memory_space<vmem>>, %arg10: memref<128x128xf32, #tpu.memory_space<vmem>>, %arg11: memref<1x128xf32, #tpu.memory_space<vmem>>, %arg12: memref<8x128xf32, #tpu.memory_space<vmem>>) attributes {dimension_semantics = [#tpu.dimension_semantics<parallel>], iteration_bounds = array<i64: 1>, scalar_prefetch = 0 : i64, scratch_operands = 0 : i64, tpu.core_type = #tpu.core_type<tc>, window_params = [{transform_indices = @transform_0, window_bounds = array<i64: 40, 8, 4>}, {pipeline_mode = #tpu.pipeline_mode<synchronous>, transform_indices = @transform_1, window_bounds = array<i64: 20, 64>}, {pipeline_mode = #tpu.pipeline_mode<synchronous>, transform_indices = @transform_2, window_bounds = array<i64: 1, 64>}, {pipeline_mode = #tpu.pipeline_mode<synchronous>, transform_indices = @transform_3, window_bounds = array<i64: 320, 64>}, {pipeline_mode = #tpu.pipeline_mode<synchronous>, transform_indices = @transform_4, window_bounds = array<i64: 1, 64>}, {pipeline_mode = #tpu.pipeline_mode<synchronous>, transform_indices = @transform_5, window_bounds = array<i64: 320, 64>}, {pipeline_mode = #tpu.pipeline_mode<synchronous>, transform_indices = @transform_6, window_bounds = array<i64: 1, 64>}, {pipeline_mode = #tpu.pipeline_mode<synchronous>, transform_indices = @transform_7, window_bounds = array<i64: 1792, 128>}, {pipeline_mode = #tpu.pipeline_mode<synchronous>, transform_indices = @transform_8, window_bounds = array<i64: 1, 128>}, {pipeline_mode = #tpu.pipeline_mode<synchronous>, transform_indices = @transform_9, window_bounds = array<i64: 128, 128>}, {pipeline_mode = #tpu.pipeline_mode<synchronous>, transform_indices = @transform_10, window_bounds = array<i64: 1, 128>}, {transform_indices = @transform_11, window_bounds = array<i64: 8, 128>}]} {
    %c0 = arith.constant 0 : index
    %c0_0 = arith.constant 0 : index
    %c0_1 = arith.constant 0 : index
    %0 = vector.load %arg1[%c0, %c0_0, %c0_1] : memref<40x8x4xf32, #tpu.memory_space<vmem>>, vector<40x8x4xf32>
    %1 = vector.extract_strided_slice %0 {offsets = [0, 0, 0], sizes = [36, 8, 4], strides = [1, 1, 1]} : vector<40x8x4xf32> to vector<36x8x4xf32>
    %2 = vector.extract_strided_slice %0 {offsets = [1, 0, 0], sizes = [36, 8, 4], strides = [1, 1, 1]} : vector<40x8x4xf32> to vector<36x8x4xf32>
    %3 = vector.extract_strided_slice %0 {offsets = [2, 0, 0], sizes = [36, 8, 4], strides = [1, 1, 1]} : vector<40x8x4xf32> to vector<36x8x4xf32>
    %4 = vector.extract_strided_slice %0 {offsets = [3, 0, 0], sizes = [36, 8, 4], strides = [1, 1, 1]} : vector<40x8x4xf32> to vector<36x8x4xf32>
    %5 = vector.extract_strided_slice %0 {offsets = [4, 0, 0], sizes = [36, 8, 4], strides = [1, 1, 1]} : vector<40x8x4xf32> to vector<36x8x4xf32>
    %6 = tpu.concatenate %1, %2, %3, %4, %5 in 2 : vector<36x8x4xf32>, vector<36x8x4xf32>, vector<36x8x4xf32>, vector<36x8x4xf32>, vector<36x8x4xf32> -> vector<36x8x20xf32>
    %7 = vector.shape_cast %6 : vector<36x8x20xf32> to vector<288x20xf32>
    %c0_2 = arith.constant 0 : index
    %c0_3 = arith.constant 0 : index
    %8 = vector.load %arg2[%c0_2, %c0_3] : memref<20x64xf32, #tpu.memory_space<vmem>>, vector<20x64xf32>
    %cst = arith.constant dense<0.000000e+00> : vector<288x64xf32>
    %9 = tpu.matmul %7, %8, %cst {dimension_numbers = #tpu.dot_dimension_numbers<[1], [0], [0], [1], [0, 0, 1, 1], [], []>} : vector<288x20xf32>, vector<20x64xf32>, vector<288x64xf32> -> vector<288x64xf32>
    %c0_4 = arith.constant 0 : index
    %c0_5 = arith.constant 0 : index
    %10 = vector.load %arg3[%c0_4, %c0_5] : memref<1x64xf32, #tpu.memory_space<vmem>>, vector<1x64xf32>
    %11 = vector.broadcast %10 : vector<1x64xf32> to vector<288x64xf32>
    %12 = arith.addf %9, %11 : vector<288x64xf32>
    %cst_6 = arith.constant 0.000000e+00 : f32
    %13 = vector.broadcast %cst_6 : f32 to vector<288x64xf32>
    %14 = arith.maximumf %12, %13 : vector<288x64xf32>
    %15 = vector.shape_cast %14 : vector<288x64xf32> to vector<36x8x64xf32>
    %16 = vector.extract_strided_slice %15 {offsets = [0, 0, 0], sizes = [32, 8, 64], strides = [1, 1, 1]} : vector<36x8x64xf32> to vector<32x8x64xf32>
    %17 = vector.extract_strided_slice %15 {offsets = [1, 0, 0], sizes = [32, 8, 64], strides = [1, 1, 1]} : vector<36x8x64xf32> to vector<32x8x64xf32>
    %18 = vector.extract_strided_slice %15 {offsets = [2, 0, 0], sizes = [32, 8, 64], strides = [1, 1, 1]} : vector<36x8x64xf32> to vector<32x8x64xf32>
    %19 = vector.extract_strided_slice %15 {offsets = [3, 0, 0], sizes = [32, 8, 64], strides = [1, 1, 1]} : vector<36x8x64xf32> to vector<32x8x64xf32>
    %20 = vector.extract_strided_slice %15 {offsets = [4, 0, 0], sizes = [32, 8, 64], strides = [1, 1, 1]} : vector<36x8x64xf32> to vector<32x8x64xf32>
    %21 = tpu.concatenate %16, %17, %18, %19, %20 in 2 : vector<32x8x64xf32>, vector<32x8x64xf32>, vector<32x8x64xf32>, vector<32x8x64xf32>, vector<32x8x64xf32> -> vector<32x8x320xf32>
    %22 = vector.shape_cast %21 : vector<32x8x320xf32> to vector<256x320xf32>
    %c0_7 = arith.constant 0 : index
    %c0_8 = arith.constant 0 : index
    %23 = vector.load %arg4[%c0_7, %c0_8] : memref<320x64xf32, #tpu.memory_space<vmem>>, vector<320x64xf32>
    %cst_9 = arith.constant dense<0.000000e+00> : vector<256x64xf32>
    %24 = tpu.matmul %22, %23, %cst_9 {dimension_numbers = #tpu.dot_dimension_numbers<[1], [0], [0], [1], [0, 0, 1, 1], [], []>} : vector<256x320xf32>, vector<320x64xf32>, vector<256x64xf32> -> vector<256x64xf32>
    %c0_10 = arith.constant 0 : index
    %c0_11 = arith.constant 0 : index
    %25 = vector.load %arg5[%c0_10, %c0_11] : memref<1x64xf32, #tpu.memory_space<vmem>>, vector<1x64xf32>
    %26 = vector.broadcast %25 : vector<1x64xf32> to vector<256x64xf32>
    %27 = arith.addf %24, %26 : vector<256x64xf32>
    %cst_12 = arith.constant 0.000000e+00 : f32
    %28 = vector.broadcast %cst_12 : f32 to vector<256x64xf32>
    %29 = arith.maximumf %27, %28 : vector<256x64xf32>
    %30 = vector.shape_cast %29 : vector<256x64xf32> to vector<32x8x64xf32>
    %31 = vector.extract_strided_slice %30 {offsets = [0, 0, 0], sizes = [28, 8, 64], strides = [1, 1, 1]} : vector<32x8x64xf32> to vector<28x8x64xf32>
    %32 = vector.extract_strided_slice %30 {offsets = [1, 0, 0], sizes = [28, 8, 64], strides = [1, 1, 1]} : vector<32x8x64xf32> to vector<28x8x64xf32>
    %33 = vector.extract_strided_slice %30 {offsets = [2, 0, 0], sizes = [28, 8, 64], strides = [1, 1, 1]} : vector<32x8x64xf32> to vector<28x8x64xf32>
    %34 = vector.extract_strided_slice %30 {offsets = [3, 0, 0], sizes = [28, 8, 64], strides = [1, 1, 1]} : vector<32x8x64xf32> to vector<28x8x64xf32>
    %35 = vector.extract_strided_slice %30 {offsets = [4, 0, 0], sizes = [28, 8, 64], strides = [1, 1, 1]} : vector<32x8x64xf32> to vector<28x8x64xf32>
    %36 = tpu.concatenate %31, %32, %33, %34, %35 in 2 : vector<28x8x64xf32>, vector<28x8x64xf32>, vector<28x8x64xf32>, vector<28x8x64xf32>, vector<28x8x64xf32> -> vector<28x8x320xf32>
    %37 = vector.shape_cast %36 : vector<28x8x320xf32> to vector<224x320xf32>
    %c0_13 = arith.constant 0 : index
    %c0_14 = arith.constant 0 : index
    %38 = vector.load %arg6[%c0_13, %c0_14] : memref<320x64xf32, #tpu.memory_space<vmem>>, vector<320x64xf32>
    %cst_15 = arith.constant dense<0.000000e+00> : vector<224x64xf32>
    %39 = tpu.matmul %37, %38, %cst_15 {dimension_numbers = #tpu.dot_dimension_numbers<[1], [0], [0], [1], [0, 0, 1, 1], [], []>} : vector<224x320xf32>, vector<320x64xf32>, vector<224x64xf32> -> vector<224x64xf32>
    %c0_16 = arith.constant 0 : index
    %c0_17 = arith.constant 0 : index
    %40 = vector.load %arg7[%c0_16, %c0_17] : memref<1x64xf32, #tpu.memory_space<vmem>>, vector<1x64xf32>
    %41 = vector.broadcast %40 : vector<1x64xf32> to vector<224x64xf32>
    %42 = arith.addf %39, %41 : vector<224x64xf32>
    %cst_18 = arith.constant 0.000000e+00 : f32
    %43 = vector.broadcast %cst_18 : f32 to vector<224x64xf32>
    %44 = arith.maximumf %42, %43 : vector<224x64xf32>
    %45 = vector.shape_cast %44 : vector<224x64xf32> to vector<28x8x64xf32>
    %46 = vector.extract_strided_slice %45 {offsets = [0, 0, 0], sizes = [1, 8, 64], strides = [1, 1, 1]} : vector<28x8x64xf32> to vector<1x8x64xf32>
    %47 = vector.shape_cast %46 : vector<1x8x64xf32> to vector<8x64xf32>
    %48 = vector.extract_strided_slice %45 {offsets = [1, 0, 0], sizes = [1, 8, 64], strides = [1, 1, 1]} : vector<28x8x64xf32> to vector<1x8x64xf32>
    %49 = vector.shape_cast %48 : vector<1x8x64xf32> to vector<8x64xf32>
    %50 = vector.extract_strided_slice %45 {offsets = [2, 0, 0], sizes = [1, 8, 64], strides = [1, 1, 1]} : vector<28x8x64xf32> to vector<1x8x64xf32>
    %51 = vector.shape_cast %50 : vector<1x8x64xf32> to vector<8x64xf32>
    %52 = vector.extract_strided_slice %45 {offsets = [3, 0, 0], sizes = [1, 8, 64], strides = [1, 1, 1]} : vector<28x8x64xf32> to vector<1x8x64xf32>
    %53 = vector.shape_cast %52 : vector<1x8x64xf32> to vector<8x64xf32>
    %54 = vector.extract_strided_slice %45 {offsets = [4, 0, 0], sizes = [1, 8, 64], strides = [1, 1, 1]} : vector<28x8x64xf32> to vector<1x8x64xf32>
    %55 = vector.shape_cast %54 : vector<1x8x64xf32> to vector<8x64xf32>
    %56 = vector.extract_strided_slice %45 {offsets = [5, 0, 0], sizes = [1, 8, 64], strides = [1, 1, 1]} : vector<28x8x64xf32> to vector<1x8x64xf32>
    %57 = vector.shape_cast %56 : vector<1x8x64xf32> to vector<8x64xf32>
    %58 = vector.extract_strided_slice %45 {offsets = [6, 0, 0], sizes = [1, 8, 64], strides = [1, 1, 1]} : vector<28x8x64xf32> to vector<1x8x64xf32>
    %59 = vector.shape_cast %58 : vector<1x8x64xf32> to vector<8x64xf32>
    %60 = vector.extract_strided_slice %45 {offsets = [7, 0, 0], sizes = [1, 8, 64], strides = [1, 1, 1]} : vector<28x8x64xf32> to vector<1x8x64xf32>
    %61 = vector.shape_cast %60 : vector<1x8x64xf32> to vector<8x64xf32>
    %62 = vector.extract_strided_slice %45 {offsets = [8, 0, 0], sizes = [1, 8, 64], strides = [1, 1, 1]} : vector<28x8x64xf32> to vector<1x8x64xf32>
    %63 = vector.shape_cast %62 : vector<1x8x64xf32> to vector<8x64xf32>
    %64 = vector.extract_strided_slice %45 {offsets = [9, 0, 0], sizes = [1, 8, 64], strides = [1, 1, 1]} : vector<28x8x64xf32> to vector<1x8x64xf32>
    %65 = vector.shape_cast %64 : vector<1x8x64xf32> to vector<8x64xf32>
    %66 = vector.extract_strided_slice %45 {offsets = [10, 0, 0], sizes = [1, 8, 64], strides = [1, 1, 1]} : vector<28x8x64xf32> to vector<1x8x64xf32>
    %67 = vector.shape_cast %66 : vector<1x8x64xf32> to vector<8x64xf32>
    %68 = vector.extract_strided_slice %45 {offsets = [11, 0, 0], sizes = [1, 8, 64], strides = [1, 1, 1]} : vector<28x8x64xf32> to vector<1x8x64xf32>
    %69 = vector.shape_cast %68 : vector<1x8x64xf32> to vector<8x64xf32>
    %70 = vector.extract_strided_slice %45 {offsets = [12, 0, 0], sizes = [1, 8, 64], strides = [1, 1, 1]} : vector<28x8x64xf32> to vector<1x8x64xf32>
    %71 = vector.shape_cast %70 : vector<1x8x64xf32> to vector<8x64xf32>
    %72 = vector.extract_strided_slice %45 {offsets = [13, 0, 0], sizes = [1, 8, 64], strides = [1, 1, 1]} : vector<28x8x64xf32> to vector<1x8x64xf32>
    %73 = vector.shape_cast %72 : vector<1x8x64xf32> to vector<8x64xf32>
    %74 = vector.extract_strided_slice %45 {offsets = [14, 0, 0], sizes = [1, 8, 64], strides = [1, 1, 1]} : vector<28x8x64xf32> to vector<1x8x64xf32>
    %75 = vector.shape_cast %74 : vector<1x8x64xf32> to vector<8x64xf32>
    %76 = vector.extract_strided_slice %45 {offsets = [15, 0, 0], sizes = [1, 8, 64], strides = [1, 1, 1]} : vector<28x8x64xf32> to vector<1x8x64xf32>
    %77 = vector.shape_cast %76 : vector<1x8x64xf32> to vector<8x64xf32>
    %78 = vector.extract_strided_slice %45 {offsets = [16, 0, 0], sizes = [1, 8, 64], strides = [1, 1, 1]} : vector<28x8x64xf32> to vector<1x8x64xf32>
    %79 = vector.shape_cast %78 : vector<1x8x64xf32> to vector<8x64xf32>
    %80 = vector.extract_strided_slice %45 {offsets = [17, 0, 0], sizes = [1, 8, 64], strides = [1, 1, 1]} : vector<28x8x64xf32> to vector<1x8x64xf32>
    %81 = vector.shape_cast %80 : vector<1x8x64xf32> to vector<8x64xf32>
    %82 = vector.extract_strided_slice %45 {offsets = [18, 0, 0], sizes = [1, 8, 64], strides = [1, 1, 1]} : vector<28x8x64xf32> to vector<1x8x64xf32>
    %83 = vector.shape_cast %82 : vector<1x8x64xf32> to vector<8x64xf32>
    %84 = vector.extract_strided_slice %45 {offsets = [19, 0, 0], sizes = [1, 8, 64], strides = [1, 1, 1]} : vector<28x8x64xf32> to vector<1x8x64xf32>
    %85 = vector.shape_cast %84 : vector<1x8x64xf32> to vector<8x64xf32>
    %86 = vector.extract_strided_slice %45 {offsets = [20, 0, 0], sizes = [1, 8, 64], strides = [1, 1, 1]} : vector<28x8x64xf32> to vector<1x8x64xf32>
    %87 = vector.shape_cast %86 : vector<1x8x64xf32> to vector<8x64xf32>
    %88 = vector.extract_strided_slice %45 {offsets = [21, 0, 0], sizes = [1, 8, 64], strides = [1, 1, 1]} : vector<28x8x64xf32> to vector<1x8x64xf32>
    %89 = vector.shape_cast %88 : vector<1x8x64xf32> to vector<8x64xf32>
    %90 = vector.extract_strided_slice %45 {offsets = [22, 0, 0], sizes = [1, 8, 64], strides = [1, 1, 1]} : vector<28x8x64xf32> to vector<1x8x64xf32>
    %91 = vector.shape_cast %90 : vector<1x8x64xf32> to vector<8x64xf32>
    %92 = vector.extract_strided_slice %45 {offsets = [23, 0, 0], sizes = [1, 8, 64], strides = [1, 1, 1]} : vector<28x8x64xf32> to vector<1x8x64xf32>
    %93 = vector.shape_cast %92 : vector<1x8x64xf32> to vector<8x64xf32>
    %94 = vector.extract_strided_slice %45 {offsets = [24, 0, 0], sizes = [1, 8, 64], strides = [1, 1, 1]} : vector<28x8x64xf32> to vector<1x8x64xf32>
    %95 = vector.shape_cast %94 : vector<1x8x64xf32> to vector<8x64xf32>
    %96 = vector.extract_strided_slice %45 {offsets = [25, 0, 0], sizes = [1, 8, 64], strides = [1, 1, 1]} : vector<28x8x64xf32> to vector<1x8x64xf32>
    %97 = vector.shape_cast %96 : vector<1x8x64xf32> to vector<8x64xf32>
    %98 = vector.extract_strided_slice %45 {offsets = [26, 0, 0], sizes = [1, 8, 64], strides = [1, 1, 1]} : vector<28x8x64xf32> to vector<1x8x64xf32>
    %99 = vector.shape_cast %98 : vector<1x8x64xf32> to vector<8x64xf32>
    %100 = vector.extract_strided_slice %45 {offsets = [27, 0, 0], sizes = [1, 8, 64], strides = [1, 1, 1]} : vector<28x8x64xf32> to vector<1x8x64xf32>
    %101 = vector.shape_cast %100 : vector<1x8x64xf32> to vector<8x64xf32>
    %102 = tpu.concatenate %47, %49, %51, %53, %55, %57, %59, %61, %63, %65, %67, %69, %71, %73, %75, %77 in 1 : vector<8x64xf32>, vector<8x64xf32>, vector<8x64xf32>, vector<8x64xf32>, vector<8x64xf32>, vector<8x64xf32>, vector<8x64xf32>, vector<8x64xf32>, vector<8x64xf32>, vector<8x64xf32>, vector<8x64xf32>, vector<8x64xf32>, vector<8x64xf32>, vector<8x64xf32>, vector<8x64xf32>, vector<8x64xf32> -> vector<8x1024xf32>
    %103 = tpu.concatenate %79, %81, %83, %85, %87, %89, %91, %93, %95, %97, %99, %101 in 1 : vector<8x64xf32>, vector<8x64xf32>, vector<8x64xf32>, vector<8x64xf32>, vector<8x64xf32>, vector<8x64xf32>, vector<8x64xf32>, vector<8x64xf32>, vector<8x64xf32>, vector<8x64xf32>, vector<8x64xf32>, vector<8x64xf32> -> vector<8x768xf32>
    %104 = tpu.concatenate %102, %103 in 1 : vector<8x1024xf32>, vector<8x768xf32> -> vector<8x1792xf32>
    %c0_19 = arith.constant 0 : index
    %c0_20 = arith.constant 0 : index
    %105 = vector.load %arg8[%c0_19, %c0_20] : memref<1792x128xf32, #tpu.memory_space<vmem>>, vector<1792x128xf32>
    %cst_21 = arith.constant dense<0.000000e+00> : vector<8x128xf32>
    %106 = tpu.matmul %104, %105, %cst_21 {dimension_numbers = #tpu.dot_dimension_numbers<[1], [0], [0], [1], [0, 0, 1, 1], [], []>} : vector<8x1792xf32>, vector<1792x128xf32>, vector<8x128xf32> -> vector<8x128xf32>
    %c0_22 = arith.constant 0 : index
    %c0_23 = arith.constant 0 : index
    %107 = vector.load %arg9[%c0_22, %c0_23] : memref<1x128xf32, #tpu.memory_space<vmem>>, vector<1x128xf32>
    %108 = vector.broadcast %107 : vector<1x128xf32> to vector<8x128xf32>
    %109 = arith.addf %106, %108 : vector<8x128xf32>
    %cst_24 = arith.constant 0.000000e+00 : f32
    %110 = vector.broadcast %cst_24 : f32 to vector<8x128xf32>
    %111 = arith.maximumf %109, %110 : vector<8x128xf32>
    %c0_25 = arith.constant 0 : index
    %c0_26 = arith.constant 0 : index
    %112 = vector.load %arg10[%c0_25, %c0_26] : memref<128x128xf32, #tpu.memory_space<vmem>>, vector<128x128xf32>
    %cst_27 = arith.constant dense<0.000000e+00> : vector<8x128xf32>
    %113 = tpu.matmul %111, %112, %cst_27 {dimension_numbers = #tpu.dot_dimension_numbers<[1], [0], [0], [1], [0, 0, 1, 1], [], []>} : vector<8x128xf32>, vector<128x128xf32>, vector<8x128xf32> -> vector<8x128xf32>
    %c0_28 = arith.constant 0 : index
    %c0_29 = arith.constant 0 : index
    %114 = vector.load %arg11[%c0_28, %c0_29] : memref<1x128xf32, #tpu.memory_space<vmem>>, vector<1x128xf32>
    %115 = vector.broadcast %114 : vector<1x128xf32> to vector<8x128xf32>
    %116 = arith.addf %113, %115 : vector<8x128xf32>
    %c0_30 = arith.constant 0 : index
    %c0_31 = arith.constant 0 : index
    %117 = vector.load %arg12[%c0_30, %c0_31] : memref<8x128xf32, #tpu.memory_space<vmem>>, vector<8x128xf32>
    tpu.vector_store %arg12[%c0_30, %c0_31], %116 {strides = array<i32>} : memref<8x128xf32, #tpu.memory_space<vmem>>, vector<8x128xf32>,
    return
  }
  func.func @transform_0(%arg0: i32) -> (i32, i32, i32) {
    %c0_i32 = arith.constant 0 : i32
    %c0_i32_0 = arith.constant 0 : i32
    %c0_i32_1 = arith.constant 0 : i32
    return %c0_i32, %arg0, %c0_i32_0 : i32, i32, i32
  }
  func.func @transform_1(%arg0: i32) -> (i32, i32) {
    %c0_i32 = arith.constant 0 : i32
    %c0_i32_0 = arith.constant 0 : i32
    %c0_i32_1 = arith.constant 0 : i32
    return %c0_i32, %c0_i32_0 : i32, i32
  }
  func.func @transform_2(%arg0: i32) -> (i32, i32) {
    %c0_i32 = arith.constant 0 : i32
    %c0_i32_0 = arith.constant 0 : i32
    %c0_i32_1 = arith.constant 0 : i32
    return %c0_i32, %c0_i32_0 : i32, i32
  }
  func.func @transform_3(%arg0: i32) -> (i32, i32) {
    %c0_i32 = arith.constant 0 : i32
    %c0_i32_0 = arith.constant 0 : i32
    %c0_i32_1 = arith.constant 0 : i32
    return %c0_i32, %c0_i32_0 : i32, i32
  }
  func.func @transform_4(%arg0: i32) -> (i32, i32) {
    %c0_i32 = arith.constant 0 : i32
    %c0_i32_0 = arith.constant 0 : i32
    %c0_i32_1 = arith.constant 0 : i32
    return %c0_i32, %c0_i32_0 : i32, i32
  }
  func.func @transform_5(%arg0: i32) -> (i32, i32) {
    %c0_i32 = arith.constant 0 : i32
    %c0_i32_0 = arith.constant 0 : i32
    %c0_i32_1 = arith.constant 0 : i32
    return %c0_i32, %c0_i32_0 : i32, i32
  }
  func.func @transform_6(%arg0: i32) -> (i32, i32) {
    %c0_i32 = arith.constant 0 : i32
    %c0_i32_0 = arith.constant 0 : i32
    %c0_i32_1 = arith.constant 0 : i32
    return %c0_i32, %c0_i32_0 : i32, i32
  }
  func.func @transform_7(%arg0: i32) -> (i32, i32) {
    %c0_i32 = arith.constant 0 : i32
    %c0_i32_0 = arith.constant 0 : i32
    %c0_i32_1 = arith.constant 0 : i32
    return %c0_i32, %c0_i32_0 : i32, i32
  }
  func.func @transform_8(%arg0: i32) -> (i32, i32) {
    %c0_i32 = arith.constant 0 : i32
    %c0_i32_0 = arith.constant 0 : i32
    %c0_i32_1 = arith.constant 0 : i32
    return %c0_i32, %c0_i32_0 : i32, i32
  }
  func.func @transform_9(%arg0: i32) -> (i32, i32) {
    %c0_i32 = arith.constant 0 : i32
    %c0_i32_0 = arith.constant 0 : i32
    %c0_i32_1 = arith.constant 0 : i32
    return %c0_i32, %c0_i32_0 : i32, i32
  }
  func.func @transform_10(%arg0: i32) -> (i32, i32) {
    %c0_i32 = arith.constant 0 : i32
    %c0_i32_0 = arith.constant 0 : i32
    %c0_i32_1 = arith.constant 0 : i32
    return %c0_i32, %c0_i32_0 : i32, i32
  }
  func.func @transform_11(%arg0: i32) -> (i32, i32) {
    %c0_i32 = arith.constant 0 : i32
    %c0_i32_0 = arith.constant 0 : i32
    return %arg0, %c0_i32 : i32, i32
  }
}

</mosaic_0001>

<bundles_post_ra>
// kernel: har_forward.1
= control target key start
LH: loop header
LB: loop body
LE: loop exit
PB: predicated region body
PF: predicated region fallthrough
CT: control target
= control target key end

     0   :  { %16 = vsyncpa [#allocation3], 0  ;;  %s3038_s20 = smov [#allocation2]   ;;  %s3039_s22 = smov 128   ;;  %s4921_s0 = inlined_call_operand.vmem [shape: f32[40,8,4], index: 0, kind: input, shape index: {}]   ;;  %s4922_s1 = inlined_call_operand.vmem [shape: f32[20,64], index: 1, kind: input, shape index: {}]   ;;  %s4923_s2 = inlined_call_operand.vmem [shape: f32[1,64], index: 2, kind: input, shape index: {}]   ;;  %s4924_s3 = inlined_call_operand.vmem [shape: f32[320,64], index: 3, kind: input, shape index: {}]   ;;  %s4925_s4 = inlined_call_operand.vmem [shape: f32[1,64], index: 4, kind: input, shape index: {}]   ;;  %s4926_s5 = inlined_call_operand.vmem [shape: f32[320,64], index: 5, kind: input, shape index: {}]   ;;  %s4927_s6 = inlined_call_operand.vmem [shape: f32[1,64], index: 6, kind: input, shape index: {}]   ;;  %s4928_s7 = inlined_call_operand.hbm [shape: f32[1792,128], index: 7, kind: input, shape index: {}]   ;;  %s4929_s8 = inlined_call_operand.vmem [shape: f32[1,128], index: 8, kind: input, shape index: {}]   ;;  %s4930_s9 = inlined_call_operand.vmem [shape: f32[128,128], index: 9, kind: input, shape index: {}]   ;;  %s4931_s10 = inlined_call_operand.vmem [shape: f32[1,128], index: 10, kind: input, shape index: {}]   ;;  %s4932_s11 = inlined_call_operand.vmem [shape: f32[8,128], index: 11, kind: output, shape index: {}]  }
   0x1   :  { %s35_s19 = sshll.u32 %s4928_s7, 4  ;;  %s37_s21 = sshll.u32 %s3038_s20, 4  ;;  %s36_s19 = int_to_ptr.hbm [resolvable:$true] %s35_s19  ;;  %s38_s21 = int_to_ptr.vmem [resolvable:$true] %s37_s21 }
   0x2   :  { %s3040_s23 = smov 8  }
   0x3   :  { %43 = dma.hbm_to_vmem [thread:$0]  %s36_s19, 28672, %s38_s21, [#allocation3], %s3039_s22, %s3039_s22, %s3040_s23  }
   0x4   :  { %3036 = dma.done.wait [#allocation3], 28672  }
   0x5   :  { %3037 = vsyncadd [#allocation3], 4294938624  ;;  %v3112_v0 = vld [vmem:[%s4921_s0 + $0x8] sm:$0xff]  ;;  %v3117_v1 = vld [vmem:[%s4921_s0 + $0x18] sm:$0xff]  ;;  %s3041_s7 = smov 4   ;;  %s3042_s28 = smov 12  }
   0x6   :  { %130 = vrot.lane.b32.xlu0 %v3112_v0, %s3041_s7  ;;  %348 = vrot.lane.b32.xlu1 %v3117_v1, %s3042_s28  ;;  %v3126_v2 = vld [vmem:[%s4921_s0 + $0x10] sm:$0xff]  ;;  %v3133_v3 = vld [vmem:[%s4921_s0 + $0x20] sm:$0xff]  ;;  %s3043_s14 = smov 16   ;;  %vm829_vm0 = vcmask 1043456   ;;  %vm565_vm1 = vcmask 31744   ;;  %vm602_vm2 = vcmask 64512  }
   0x7   :  { %132 = vrot.lane.b32.xlu2 %v3126_v2, %s3041_s7  ;;  %v3144_v4 = vld [vmem:[%s4921_s0 + $0x28] sm:$0xff]  ;;  %v3155_v5 = vld [vmem:[%s4921_s0 + $0x30] sm:$0xff]  ;;  %v3172_v6 = vld [vmem:[%s4921_s0 + $0x38] sm:$0xff]  ;;  %vm639_vm3 = vcmask 97280   ;;  %vm676_vm4 = vcmask 130048   ;;  %vm720_vm5 = vcmask 162816  }
   0x8   :  { %v3183_v7 = vld [vmem:[%s4921_s0 + $0x40] sm:$0xff]  ;;  %v3194_v8 = vld [vmem:[%s4921_s0 + $0x48] sm:$0xff]  ;;  %v3211_v9 = vld [vmem:[%s4921_s0 + $0x50] sm:$0xff]  ;;  %s3044_s24 = smov 64   ;;  %vm1130_vm6 = vcmask 523264  }
   0x9   :  { %v3222_v10 = vld [vmem:[%s4921_s0 + $0x58] sm:$0xff]  ;;  %v3233_v11 = vld [vmem:[%s4921_s0 + $0x60] sm:$0xff]  ;;  %v715_v12 = vld [vmem:[%s4922_s1 + $0x10] sm:$0xf] }
   0xa   :  { %2852 = vmatpush.msk.msra.mxu0 %vm829_vm0, %v715_v12  ;;  %v714_v13 = vld [vmem:[%s4922_s1 + $0x8] sm:$0xff]  ;;  %v713_v15 = vld [vmem:[%s4922_s1] sm:$0xff]  ;;  %v3270_v19 = vld [vmem:[%s4921_s0 + $0x70] sm:$0xff] }
   0xb   :  { %v3259_v17 = vld [vmem:[%s4921_s0 + $0x68] sm:$0xff]  ;;  %v3281_v23 = vld [vmem:[%s4921_s0 + $0x78] sm:$0xff]  ;;  %v54_v24 = vld [vmem:[%s4921_s0] sm:$0xff] }
   0xc   :  { %847 = vmatpush.msra.mxu0 %v714_v13  ;;  %v3311_v39 = vld [vmem:[%s4921_s0 + $0x80] sm:$0xff]  ;;  %v3328_v47 = vld [vmem:[%s4921_s0 + $0x88] sm:$0xff]  ;;  %v3342_v52 = vld [vmem:[%s4921_s0 + $0x90] sm:$0xff] }
   0xe   :  { %239 = vrot.lane.b32.xlu0 %v3126_v2, %s3040_s23  ;;  %457 = vrot.lane.b32.xlu1 %v3133_v3, %s3043_s14 }
   0xf   :  { %241 = vrot.lane.b32.xlu2 %v3117_v1, %s3040_s23  ;;  %848 = vmatpush.msra.mxu0 %v713_v15 }
  0x16   :  { %350 = vrot.lane.b32.xlu0 %v3133_v3, %s3042_s28  ;;  %459 = vrot.lane.b32.xlu1 %v3144_v4, %s3043_s14 }
  0x17   :  { %134 = vrot.lane.b32.xlu2 %v3117_v1, %s3041_s7 }
  0x1e   :  { %243 = vrot.lane.b32.xlu0 %v3133_v3, %s3040_s23  ;;  %352 = vrot.lane.b32.xlu1 %v3144_v4, %s3042_s28 }
  0x1f   :  { %461 = vrot.lane.b32.xlu2 %v3155_v5, %s3043_s14 }
  0x26   :  { %136 = vrot.lane.b32.xlu0 %v3133_v3, %s3041_s7  ;;  %245 = vrot.lane.b32.xlu1 %v3144_v4, %s3040_s23 }
  0x27   :  { %354 = vrot.lane.b32.xlu2 %v3155_v5, %s3042_s28 }
  0x2e   :  { %463 = vrot.lane.b32.xlu0 %v3172_v6, %s3043_s14  ;;  %138 = vrot.lane.b32.xlu1 %v3144_v4, %s3041_s7 }
  0x2f   :  { %247 = vrot.lane.b32.xlu2 %v3155_v5, %s3040_s23 }
  0x36   :  { %356 = vrot.lane.b32.xlu0 %v3172_v6, %s3042_s28  ;;  %465 = vrot.lane.b32.xlu1 %v3183_v7, %s3043_s14 }
  0x37   :  { %140 = vrot.lane.b32.xlu2 %v3155_v5, %s3041_s7 }
  0x3e   :  { %249 = vrot.lane.b32.xlu0 %v3172_v6, %s3040_s23  ;;  %358 = vrot.lane.b32.xlu1 %v3183_v7, %s3042_s28 }
  0x3f   :  { %467 = vrot.lane.b32.xlu2 %v3194_v8, %s3043_s14 }
  0x46   :  { %142 = vrot.lane.b32.xlu0 %v3172_v6, %s3041_s7  ;;  %251 = vrot.lane.b32.xlu1 %v3183_v7, %s3040_s23 }
  0x47   :  { %360 = vrot.lane.b32.xlu2 %v3194_v8, %s3042_s28 }
  0x4e   :  { %469 = vrot.lane.b32.xlu0 %v3211_v9, %s3043_s14  ;;  %144 = vrot.lane.b32.xlu1 %v3183_v7, %s3041_s7 }
  0x4f   :  { %253 = vrot.lane.b32.xlu2 %v3194_v8, %s3040_s23 }
  0x56   :  { %362 = vrot.lane.b32.xlu0 %v3211_v9, %s3042_s28  ;;  %471 = vrot.lane.b32.xlu1 %v3222_v10, %s3043_s14 }
  0x57   :  { %146 = vrot.lane.b32.xlu2 %v3194_v8, %s3041_s7 }
  0x5e   :  { %255 = vrot.lane.b32.xlu0 %v3211_v9, %s3040_s23  ;;  %364 = vrot.lane.b32.xlu1 %v3222_v10, %s3042_s28 }
  0x5f   :  { %473 = vrot.lane.b32.xlu2 %v3233_v11, %s3043_s14 }
  0x61   :  { %v133_v14 = vpop.permute.xlu2 %132 }
  0x62   :  { %v567_v32 = vsel %vm565_vm1, %v3112_v0, %v133_v14 }
  0x66   :  { %148 = vrot.lane.b32.xlu0 %v3211_v9, %s3041_s7  ;;  %257 = vrot.lane.b32.xlu1 %v3222_v10, %s3040_s23 }
  0x67   :  { %366 = vrot.lane.b32.xlu2 %v3233_v11, %s3042_s28 }
  0x69   :  { %v242_v16 = vpop.permute.xlu2 %241 }
  0x6a   :  { %v604_v33 = vsel %vm602_vm2, %v567_v32, %v242_v16 }
  0x6e   :  { %475 = vrot.lane.b32.xlu0 %v3259_v17, %s3043_s14  ;;  %150 = vrot.lane.b32.xlu1 %v3222_v10, %s3041_s7 }
  0x6f   :  { %259 = vrot.lane.b32.xlu2 %v3233_v11, %s3040_s23 }
  0x71   :  { %v135_v18 = vpop.permute.xlu2 %134 }
  0x72   :  { %v568_v40 = vsel %vm565_vm1, %v3126_v2, %v135_v18  ;;  %v3369_v2 = vld [vmem:[%s4921_s0 + $0x98] sm:$0xff] }
  0x76   :  { %368 = vrot.lane.b32.xlu0 %v3259_v17, %s3042_s28  ;;  %477 = vrot.lane.b32.xlu1 %v3270_v19, %s3043_s14 }
  0x77   :  { %152 = vrot.lane.b32.xlu2 %v3233_v11, %s3041_s7 }
  0x78   :  { %v131_v20 = vpop.permute.xlu0 %130  ;;  %v349_v21 = vpop.permute.xlu1 %348 }
  0x79   :  { %v462_v22 = vpop.permute.xlu2 %461  ;;  %v566_v25 = vsel %vm565_vm1, %v54_v24, %v131_v20 }
  0x7e   :  { %261 = vrot.lane.b32.xlu0 %v3259_v17, %s3040_s23  ;;  %370 = vrot.lane.b32.xlu1 %v3270_v19, %s3042_s28 }
  0x7f   :  { %479 = vrot.lane.b32.xlu2 %v3281_v23, %s3043_s14 }
  0x80   :  { %v240_v26 = vpop.permute.xlu0 %239  ;;  %v458_v27 = vpop.permute.xlu1 %457 }
  0x81   :  { %v603_v28 = vsel %vm602_vm2, %v566_v25, %v240_v26  ;;  %v355_v29 = vpop.permute.xlu2 %354  ;;  %v3400_v26 = vld [vmem:[%s4921_s0 + $0xa8] sm:$0xff] }
  0x82   :  { %v640_v30 = vsel %vm639_vm3, %v603_v28, %v349_v21 }
  0x83   :  { %v677_v31 = vsel %vm676_vm4, %v640_v30, %v458_v27 }
  0x84   :  { %2853 = vmatmul.msk.f32.vlgmr.msra.gmra.mxu0 %vm720_vm5, %v677_v31 }
  0x86   :  { %154 = vrot.lane.b32.xlu0 %v3259_v17, %s3041_s7  ;;  %263 = vrot.lane.b32.xlu1 %v3270_v19, %s3040_s23 }
  0x87   :  { %372 = vrot.lane.b32.xlu2 %v3281_v23, %s3042_s28 }
  0x88   :  { %v351_v34 = vpop.permute.xlu0 %350  ;;  %v460_v35 = vpop.permute.xlu1 %459 }
  0x89   :  { %v641_v36 = vsel %vm639_vm3, %v604_v33, %v351_v34  ;;  %v248_v37 = vpop.permute.xlu2 %247 }
  0x8a   :  { %v678_v38 = vsel %vm676_vm4, %v641_v36, %v460_v35 }
  0x8c   :  { %2854 = vmatmul.msk.f32.gmra.mxu0 %vm720_vm5, %v678_v38 }
  0x8e   :  { %481 = vrot.lane.b32.xlu0 %v3311_v39, %s3043_s14  ;;  %156 = vrot.lane.b32.xlu1 %v3270_v19, %s3041_s7 }
  0x8f   :  { %265 = vrot.lane.b32.xlu2 %v3281_v23, %s3040_s23 }
  0x90   :  { %v244_v41 = vpop.permute.xlu0 %243  ;;  %v353_v42 = vpop.permute.xlu1 %352 }
  0x91   :  { %v605_v43 = vsel %vm602_vm2, %v568_v40, %v244_v41  ;;  %v141_v44 = vpop.permute.xlu2 %140 }
  0x92   :  { %v642_v45 = vsel %vm639_vm3, %v605_v43, %v353_v42 }
  0x93   :  { %v679_v46 = vsel %vm676_vm4, %v642_v45, %v462_v22 }
  0x94   :  { %2855 = vmatmul.msk.f32.gmra.mxu0 %vm720_vm5, %v679_v46 }
  0x96   :  { %374 = vrot.lane.b32.xlu0 %v3311_v39, %s3042_s28  ;;  %483 = vrot.lane.b32.xlu1 %v3328_v47, %s3043_s14 }
  0x97   :  { %158 = vrot.lane.b32.xlu2 %v3281_v23, %s3041_s7 }
  0x98   :  { %v137_v48 = vpop.permute.xlu0 %136  ;;  %v246_v49 = vpop.permute.xlu1 %245 }
  0x99   :  { %v468_v50 = vpop.permute.xlu2 %467  ;;  %v569_v51 = vsel %vm565_vm1, %v3117_v1, %v137_v48 }
  0x9a   :  { %v606_v53 = vsel %vm602_vm2, %v569_v51, %v246_v49 }
  0x9b   :  { %v643_v56 = vsel %vm639_vm3, %v606_v53, %v355_v29  ;;  %v3457_v53 = vld [vmem:[%s4921_s0 + $0xc0] sm:$0xff] }
  0x9e   :  { %267 = vrot.lane.b32.xlu0 %v3311_v39, %s3040_s23  ;;  %376 = vrot.lane.b32.xlu1 %v3328_v47, %s3042_s28 }
  0x9f   :  { %485 = vrot.lane.b32.xlu2 %v3342_v52, %s3043_s14 }
  0xa0   :  { %v464_v54 = vpop.permute.xlu0 %463  ;;  %v139_v55 = vpop.permute.xlu1 %138 }
  0xa1   :  { %v680_v57 = vsel %vm676_vm4, %v643_v56, %v464_v54  ;;  %v361_v58 = vpop.permute.xlu2 %360  ;;  %v570_v59 = vsel %vm565_vm1, %v3133_v3, %v139_v55  ;;  %v571_v3 = vsel %vm565_vm1, %v3144_v4, %v141_v44  ;;  %v3384_v4 = vld [vmem:[%s4921_s0 + $0xa0] sm:$0xff] }
  0xa2   :  { %2856 = vmatmul.msk.f32.gmra.mxu0 %vm720_vm5, %v680_v57  ;;  %v607_v60 = vsel %vm602_vm2, %v570_v59, %v248_v37 }
  0xa6   :  { %160 = vrot.lane.b32.xlu0 %v3311_v39, %s3041_s7  ;;  %269 = vrot.lane.b32.xlu1 %v3328_v47, %s3040_s23 }
  0xa7   :  { %378 = vrot.lane.b32.xlu2 %v3342_v52, %s3042_s28 }
  0xa8   :  { %v357_v61 = vpop.permute.xlu0 %356  ;;  %v466_v62 = vpop.permute.xlu1 %465 }
  0xa9   :  { %v644_v63 = vsel %vm639_vm3, %v607_v60, %v357_v61  ;;  %v254_v0 = vpop.permute.xlu2 %253 }
  0xaa   :  { %v681_v1 = vsel %vm676_vm4, %v644_v63, %v466_v62 }
  0xab   :  { %2857 = vmatmul.msk.f32.gmra.mxu0 %vm720_vm5, %v681_v1 }
  0xae   :  { %487 = vrot.lane.b32.xlu0 %v3369_v2, %s3043_s14  ;;  %162 = vrot.lane.b32.xlu1 %v3328_v47, %s3041_s7 }
  0xaf   :  { %271 = vrot.lane.b32.xlu2 %v3342_v52, %s3040_s23 }
  0xb0   :  { %v250_v12 = vpop.permute.xlu0 %249  ;;  %v359_v13 = vpop.permute.xlu1 %358 }
  0xb1   :  { %v608_v14 = vsel %vm602_vm2, %v571_v3, %v250_v12  ;;  %v147_v15 = vpop.permute.xlu2 %146 }
  0xb2   :  { %v645_v16 = vsel %vm639_vm3, %v608_v14, %v359_v13  ;;  %v574_v38 = vsel %vm565_vm1, %v3183_v7, %v147_v15  ;;  %v3442_v7 = vld [vmem:[%s4921_s0 + $0xb8] sm:$0xff] }
  0xb3   :  { %v682_v18 = vsel %vm676_vm4, %v645_v16, %v468_v50 }
  0xb4   :  { %2858 = vmatmul.msk.f32.gmra.mxu0 %vm720_vm5, %v682_v18 }
  0xb6   :  { %380 = vrot.lane.b32.xlu0 %v3369_v2, %s3042_s28  ;;  %489 = vrot.lane.b32.xlu1 %v3384_v4, %s3043_s14 }
  0xb7   :  { %164 = vrot.lane.b32.xlu2 %v3342_v52, %s3041_s7 }
  0xb8   :  { %v143_v20 = vpop.permute.xlu0 %142  ;;  %v252_v21 = vpop.permute.xlu1 %251 }
  0xb9   :  { %v572_v22 = vsel %vm565_vm1, %v3155_v5, %v143_v20  ;;  %v474_v24 = vpop.permute.xlu2 %473 }
  0xba   :  { %v609_v25 = vsel %vm602_vm2, %v572_v22, %v252_v21 }
  0xbb   :  { %v646_v27 = vsel %vm639_vm3, %v609_v25, %v361_v58 }
  0xbe   :  { %273 = vrot.lane.b32.xlu0 %v3369_v2, %s3040_s23  ;;  %382 = vrot.lane.b32.xlu1 %v3384_v4, %s3042_s28 }
  0xbf   :  { %491 = vrot.lane.b32.xlu2 %v3400_v26, %s3043_s14 }
  0xc0   :  { %v470_v5 = vpop.permute.xlu0 %469  ;;  %v145_v28 = vpop.permute.xlu1 %144 }
  0xc1   :  { %v683_v29 = vsel %vm676_vm4, %v646_v27, %v470_v5  ;;  %v367_v30 = vpop.permute.xlu2 %366  ;;  %v573_v31 = vsel %vm565_vm1, %v3172_v6, %v145_v28  ;;  %v3426_v6 = vld [vmem:[%s4921_s0 + $0xb0] sm:$0xff]  ;;  %v3517_v27 = vld [vmem:[%s4921_s0 + $0xd8] sm:$0xff] }
  0xc2   :  { %2859 = vmatmul.msk.f32.gmra.mxu0 %vm720_vm5, %v683_v29  ;;  %v610_v32 = vsel %vm602_vm2, %v573_v31, %v254_v0  ;;  %v1203_v5 = vld [vmem:[%s4924_s3 + $0x130] sm:$0xff] }
  0xc6   :  { %166 = vrot.lane.b32.xlu0 %v3369_v2, %s3041_s7  ;;  %275 = vrot.lane.b32.xlu1 %v3384_v4, %s3040_s23 }
  0xc7   :  { %384 = vrot.lane.b32.xlu2 %v3400_v26, %s3042_s28 }
  0xc8   :  { %v363_v33 = vpop.permute.xlu0 %362  ;;  %v472_v34 = vpop.permute.xlu1 %471 }
  0xc9   :  { %v647_v35 = vsel %vm639_vm3, %v610_v32, %v363_v33  ;;  %v260_v36 = vpop.permute.xlu2 %259  ;;  %v1202_v32 = vld [vmem:[%s4924_s3 + $0x128] sm:$0xff]  ;;  %v1201_v33 = vld [vmem:[%s4924_s3 + $0x120] sm:$0xff] }
  0xca   :  { %v684_v37 = vsel %vm676_vm4, %v647_v35, %v472_v34 }
  0xcb   :  { %2860 = vmatmul.msk.f32.gmra.mxu0 %vm720_vm5, %v684_v37 }
  0xce   :  { %493 = vrot.lane.b32.xlu0 %v3426_v6, %s3043_s14  ;;  %168 = vrot.lane.b32.xlu1 %v3384_v4, %s3041_s7 }
  0xcf   :  { %277 = vrot.lane.b32.xlu2 %v3400_v26, %s3040_s23 }
  0xd0   :  { %v256_v40 = vpop.permute.xlu0 %255  ;;  %v365_v41 = vpop.permute.xlu1 %364 }
  0xd1   :  { %v611_v42 = vsel %vm602_vm2, %v574_v38, %v256_v40  ;;  %v153_v43 = vpop.permute.xlu2 %152  ;;  %v1199_v38 = vld [vmem:[%s4924_s3 + $0x110] sm:$0xff] }
  0xd2   :  { %v648_v44 = vsel %vm639_vm3, %v611_v42, %v365_v41  ;;  %v577_v1 = vsel %vm565_vm1, %v3222_v10, %v153_v43  ;;  %v3498_v10 = vld [vmem:[%s4921_s0 + $0xd0] sm:$0xff]  ;;  %v1198_v43 = vld [vmem:[%s4924_s3 + $0x108] sm:$0xff] }
  0xd3   :  { %v685_v45 = vsel %vm676_vm4, %v648_v44, %v474_v24  ;;  %v1204_v24 = vld [vmem:[%s4924_s3 + $0x138] sm:$0xff] }
  0xd4   :  { %2861 = vmatmul.msk.f32.gmra.mxu0 %vm720_vm5, %v685_v45  ;;  %1508 = vmatpush.msra.mxu3 %v1204_v24  ;;  %v3563_v45 = vld [vmem:[%s4921_s0 + $0xe0] sm:$0xff]  ;;  %v3625_v24 = vld [vmem:[%s4921_s0 + $0xf0] sm:$0xff] }
  0xd6   :  { %386 = vrot.lane.b32.xlu0 %v3426_v6, %s3042_s28  ;;  %495 = vrot.lane.b32.xlu1 %v3442_v7, %s3043_s14 }
  0xd7   :  { %170 = vrot.lane.b32.xlu2 %v3400_v26, %s3041_s7  ;;  %1509 = vmatpush.msra.mxu3 %v1203_v5 }
  0xd8   :  { %v149_v46 = vpop.permute.xlu0 %148  ;;  %v258_v48 = vpop.permute.xlu1 %257 }
  0xd9   :  { %v575_v49 = vsel %vm565_vm1, %v3194_v8, %v149_v46  ;;  %v480_v50 = vpop.permute.xlu2 %479  ;;  %1510 = vmatpush.msra.mxu3 %v1202_v32  ;;  %v1197_v46 = vld [vmem:[%s4924_s3 + $0x100] sm:$0xff] }
  0xda   :  { %v612_v51 = vsel %vm602_vm2, %v575_v49, %v258_v48 }
  0xdb   :  { %v649_v54 = vsel %vm639_vm3, %v612_v51, %v367_v30  ;;  %1511 = vmatpush.msra.mxu3 %v1201_v33 }
  0xde   :  { %279 = vrot.lane.b32.xlu0 %v3426_v6, %s3040_s23  ;;  %388 = vrot.lane.b32.xlu1 %v3442_v7, %s3042_s28 }
  0xdf   :  { %497 = vrot.lane.b32.xlu2 %v3457_v53, %s3043_s14 }
  0xe0   :  { %v476_v8 = vpop.permute.xlu0 %475  ;;  %v151_v55 = vpop.permute.xlu1 %150 }
  0xe1   :  { %v686_v56 = vsel %vm676_vm4, %v649_v54, %v476_v8  ;;  %v373_v57 = vpop.permute.xlu2 %372  ;;  %v576_v58 = vsel %vm565_vm1, %v3211_v9, %v151_v55  ;;  %v3483_v9 = vld [vmem:[%s4921_s0 + $0xc8] sm:$0xff] }
  0xe2   :  { %2862 = vmatmul.msk.f32.gmra.mxu0 %vm720_vm5, %v686_v56  ;;  %v613_v59 = vsel %vm602_vm2, %v576_v58, %v260_v36  ;;  %v1200_v36 = vld [vmem:[%s4924_s3 + $0x118] sm:$0xff] }
  0xe3   :  { %1512 = vmatpush.msra.mxu3 %v1200_v36 }
  0xe5   :  { %1513 = vmatpush.msra.mxu3 %v1199_v38 }
  0xe6   :  { %172 = vrot.lane.b32.xlu0 %v3426_v6, %s3041_s7  ;;  %281 = vrot.lane.b32.xlu1 %v3442_v7, %s3040_s23 }
  0xe7   :  { %390 = vrot.lane.b32.xlu2 %v3457_v53, %s3042_s28  ;;  %1514 = vmatpush.msra.mxu3 %v1198_v43 }
  0xe8   :  { %v369_v60 = vpop.permute.xlu0 %368  ;;  %v478_v61 = vpop.permute.xlu1 %477 }
  0xe9   :  { %v650_v62 = vsel %vm639_vm3, %v613_v59, %v369_v60  ;;  %v266_v63 = vpop.permute.xlu2 %265  ;;  %1515 = vmatpush.msra.mxu3 %v1197_v46 }
  0xea   :  { %v687_v0 = vsel %vm676_vm4, %v650_v62, %v478_v61 }
  0xeb   :  { %2863 = vmatmul.msk.f32.gmra.mxu0 %vm720_vm5, %v687_v0 }
  0xee   :  { %499 = vrot.lane.b32.xlu0 %v3483_v9, %s3043_s14  ;;  %174 = vrot.lane.b32.xlu1 %v3442_v7, %s3041_s7 }
  0xef   :  { %283 = vrot.lane.b32.xlu2 %v3457_v53, %s3040_s23 }
  0xf0   :  { %v262_v3 = vpop.permute.xlu0 %261  ;;  %v371_v12 = vpop.permute.xlu1 %370 }
  0xf1   :  { %v614_v13 = vsel %vm602_vm2, %v577_v1, %v262_v3  ;;  %v159_v14 = vpop.permute.xlu2 %158 }
  0xf2   :  { %v651_v15 = vsel %vm639_vm3, %v614_v13, %v371_v12  ;;  %v580_v49 = vsel %vm565_vm1, %v3270_v19, %v159_v14  ;;  %v3587_v19 = vld [vmem:[%s4921_s0 + $0xe8] sm:$0xff] }
  0xf3   :  { %v688_v16 = vsel %vm676_vm4, %v651_v15, %v480_v50 }
  0xf4   :  { %2864 = vmatmul.msk.f32.gmra.mxu0 %vm720_vm5, %v688_v16 }
  0xf6   :  { %392 = vrot.lane.b32.xlu0 %v3483_v9, %s3042_s28  ;;  %501 = vrot.lane.b32.xlu1 %v3498_v10, %s3043_s14 }
  0xf7   :  { %176 = vrot.lane.b32.xlu2 %v3457_v53, %s3041_s7 }
  0xf8   :  { %v155_v18 = vpop.permute.xlu0 %154  ;;  %v264_v20 = vpop.permute.xlu1 %263 }
  0xf9   :  { %v578_v21 = vsel %vm565_vm1, %v3233_v11, %v155_v18  ;;  %v486_v22 = vpop.permute.xlu2 %485 }
  0xfa   :  { %v615_v25 = vsel %vm602_vm2, %v578_v21, %v264_v20 }
  0xfb   :  { %v652_v11 = vsel %vm639_vm3, %v615_v25, %v373_v57 }
  0xfe   :  { %285 = vrot.lane.b32.xlu0 %v3483_v9, %s3040_s23  ;;  %394 = vrot.lane.b32.xlu1 %v3498_v10, %s3042_s28 }
  0xff   :  { %503 = vrot.lane.b32.xlu2 %v3517_v27, %s3043_s14 }
 0x100   :  { %v482_v28 = vpop.permute.xlu0 %481  ;;  %v157_v29 = vpop.permute.xlu1 %156 }
 0x101   :  { %v689_v30 = vsel %vm676_vm4, %v652_v11, %v482_v28  ;;  %v379_v31 = vpop.permute.xlu2 %378  ;;  %v579_v34 = vsel %vm565_vm1, %v3259_v17, %v157_v29  ;;  %v3539_v35 = vpop.f32.mrf.mxu0 }
 0x102   :  { %2865 = vmatmul.msk.f32.gmra.mxu0 %vm720_vm5, %v689_v30  ;;  %v616_v37 = vsel %vm602_vm2, %v579_v34, %v266_v63  ;;  %v3597_v63 = vld [vmem:[%s4923_s2] ss:$0 sm:$0xff] }
 0x106   :  { %178 = vrot.lane.b32.xlu0 %v3483_v9, %s3041_s7  ;;  %287 = vrot.lane.b32.xlu1 %v3498_v10, %s3040_s23 }
 0x107   :  { %396 = vrot.lane.b32.xlu2 %v3517_v27, %s3042_s28 }
 0x108   :  { %v375_v17 = vpop.permute.xlu0 %374  ;;  %v484_v40 = vpop.permute.xlu1 %483 }
 0x109   :  { %v653_v41 = vsel %vm639_vm3, %v616_v37, %v375_v17  ;;  %v272_v42 = vpop.permute.xlu2 %271  ;;  %v853_v48 = vpop.f32.mrf.mxu0 }
 0x10a   :  { %v690_v44 = vsel %vm676_vm4, %v653_v41, %v484_v40  ;;  %v3600_v0 = vadd.f32 %v3597_v63, %v853_v48 }
 0x10b   :  { %2866 = vmatmul.msk.f32.gmra.mxu0 %vm720_vm5, %v690_v44 }
 0x10c   :  { %v959_v16 = vmax.f32 %v3600_v0, 0.0 }
 0x10e   :  { %505 = vrot.lane.b32.xlu0 %v3563_v45, %s3043_s14  ;;  %398 = vrot.lane.b32.xlu1 %v3563_v45, %s3042_s28 }
 0x10f   :  { %180 = vrot.lane.b32.xlu2 %v3498_v10, %s3041_s7 }
 0x110   :  { %v268_v50 = vpop.permute.xlu0 %267  ;;  %v377_v51 = vpop.permute.xlu1 %376 }
 0x111   :  { %v617_v54 = vsel %vm602_vm2, %v580_v49, %v268_v50  ;;  %v165_v8 = vpop.permute.xlu2 %164  ;;  %v856_v57 = vpop.f32.mrf.mxu0 }
 0x112   :  { %v654_v55 = vsel %vm639_vm3, %v617_v54, %v377_v51  ;;  %v3628_v25 = vadd.f32 %v3597_v63, %v856_v57  ;;  %v583_v36 = vsel %vm565_vm1, %v3328_v47, %v165_v8  ;;  %v3670_v54 = vld [vmem:[%s4921_s0 + $0xf8] sm:$0xff] }
 0x113   :  { %v691_v56 = vsel %vm676_vm4, %v654_v55, %v486_v22 }
 0x114   :  { %2867 = vmatmul.msk.f32.gmra.mxu0 %vm720_vm5, %v691_v56  ;;  %v960_v32 = vmax.f32 %v3628_v25, 0.0 }
 0x116   :  { %289 = vrot.lane.b32.xlu0 %v3517_v27, %s3040_s23  ;;  %182 = vrot.lane.b32.xlu1 %v3517_v27, %s3041_s7 }
 0x117   :  { %507 = vrot.lane.b32.xlu2 %v3587_v19, %s3043_s14 }
 0x118   :  { %v161_v58 = vpop.permute.xlu0 %160  ;;  %v270_v59 = vpop.permute.xlu1 %269 }
 0x119   :  { %v581_v60 = vsel %vm565_vm1, %v3281_v23, %v161_v58  ;;  %v492_v61 = vpop.permute.xlu2 %491 }
 0x11a   :  { %v618_v62 = vsel %vm602_vm2, %v581_v60, %v270_v59 }
 0x11b   :  { %v655_v1 = vsel %vm639_vm3, %v618_v62, %v379_v31  ;;  %v3687_v62 = vld [vmem:[%s4921_s0 + $0x100] sm:$0xff] }
 0x11e   :  { %400 = vrot.lane.b32.xlu0 %v3587_v19, %s3042_s28 }
 0x11f   :  { %v859_v3 = vpop.f32.mrf.mxu0  ;;  %291 = vrot.lane.b32.xlu2 %v3563_v45, %s3040_s23 }
 0x120   :  { %v3608_v23 = vadd.f32 %v3597_v63, %v859_v3  ;;  %v488_v12 = vpop.permute.xlu0 %487  ;;  %v163_v13 = vpop.permute.xlu1 %162 }
 0x121   :  { %v692_v14 = vsel %vm676_vm4, %v655_v1, %v488_v12  ;;  %v385_v15 = vpop.permute.xlu2 %384  ;;  %v582_v20 = vsel %vm565_vm1, %v3311_v39, %v163_v13 }
 0x122   :  { %v961_v18 = vmax.f32 %v3608_v23, 0.0  ;;  %2868 = vmatmul.msk.f32.gmra.mxu0 %vm720_vm5, %v692_v14  ;;  %v619_v22 = vsel %vm602_vm2, %v582_v20, %v272_v42 }
 0x124   :  { %v2956_v21 = vpack.i.bf16 %v959_v16, %v961_v18 }
 0x126   :  { %2957 = vrot.lane.b32.xlu1 %v2956_v21, %s3044_s24 }
 0x127   :  { %402 = vrot.lane.b32.xlu2 %v3625_v24, %s3042_s28 }
 0x128   :  { %v381_v39 = vpop.permute.xlu0 %380  ;;  %v862_v11 = vpop.f32.mrf.mxu0 }
 0x129   :  { %v656_v5 = vsel %vm639_vm3, %v619_v22, %v381_v39  ;;  %v863_v28 = vadd.f32 %v3597_v63, %v862_v11  ;;  %v490_v29 = vpop.permute.xlu1 %489  ;;  %v278_v30 = vpop.permute.xlu2 %277 }
 0x12a   :  { %v693_v31 = vsel %vm676_vm4, %v656_v5, %v490_v29 }
 0x12b   :  { %v3636_v33 = vmax.f32 %v863_v28, 0.0  ;;  %2869 = vmatmul.msk.f32.gmra.mxu0 %vm720_vm5, %v693_v31 }
 0x12d   :  { %2889 = vmatmul.msk.f32.vlgmr.msra.gmra.mxu3 %vm1130_vm6, %v3636_v33  ;;  %v2961_v34 = vpack.i.bf16 %v960_v32, %v3636_v33 }
 0x12e   :  { %509 = vrot.lane.b32.xlu1 %v3625_v24, %s3043_s14 }
 0x12f   :  { %2962 = vrot.lane.b32.xlu0 %v2961_v34, %s3044_s24  ;;  %295 = vrot.lane.b32.xlu2 %v3625_v24, %s3040_s23 }
 0x130   :  { %v274_v37 = vpop.permute.xlu0 %273 }
 0x131   :  { %v620_v38 = vsel %vm602_vm2, %v583_v36, %v274_v37  ;;  %v383_v17 = vpop.permute.xlu1 %382  ;;  %v865_v40 = vpop.f32.mrf.mxu0  ;;  %v3729_v37 = vld [vmem:[%s4921_s0 + $0x108] sm:$0xff] }
 0x132   :  { %v657_v41 = vsel %vm639_vm3, %v620_v38, %v383_v17  ;;  %v866_v42 = vadd.f32 %v3597_v63, %v865_v40  ;;  %v171_v43 = vpop.permute.xlu2 %170 }
 0x133   :  { %v694_v47 = vsel %vm676_vm4, %v657_v41, %v492_v61  ;;  %v586_v39 = vsel %vm565_vm1, %v3384_v4, %v171_v43  ;;  %v1196_v43 = vld [vmem:[%s4924_s3 + $0xf8] sm:$0xff] }
 0x134   :  { %2870 = vmatmul.msk.f32.gmra.mxu0 %vm720_vm5, %v694_v47  ;;  %v3656_v44 = vmax.f32 %v866_v42, 0.0  ;;  %v1180_v42 = vld [vmem:[%s4924_s3 + $0x78] sm:$0xff]  ;;  %1387 = vmatpush.msra.mxu2 %v1196_v43  ;;  %v1171_v43 = vld [vmem:[%s4924_s3 + $0x30] sm:$0xff] }
 0x135   :  { %1274 = vmatpush.msra.mxu1 %v1180_v42 }
 0x136   :  { %293 = vrot.lane.b32.xlu1 %v3587_v19, %s3040_s23  ;;  %2890 = vmatmul.msk.f32.gmra.mxu3 %vm1130_vm6, %v3656_v44 }
 0x137   :  { %184 = vrot.lane.b32.xlu0 %v3563_v45, %s3041_s7 }
 0x138   :  { %v167_v46 = vpop.permute.xlu0 %166 }
 0x139   :  { %v584_v48 = vsel %vm565_vm1, %v3342_v52, %v167_v46  ;;  %v276_v49 = vpop.permute.xlu1 %275  ;;  %v3752_v46 = vld [vmem:[%s4921_s0 + $0x110] sm:$0xff] }
 0x13a   :  { %v498_v50 = vpop.permute.xlu2 %497  ;;  %v621_v51 = vsel %vm602_vm2, %v584_v48, %v276_v49  ;;  %v1179_v49 = vld [vmem:[%s4924_s3 + $0x70] sm:$0xff] }
 0x13b   :  { %v658_v8 = vsel %vm639_vm3, %v621_v51, %v385_v15  ;;  %1275 = vmatpush.msra.mxu1 %v1179_v49  ;;  %v1170_v49 = vld [vmem:[%s4924_s3 + $0x28] sm:$0xff] }
 0x13e   :  { %186 = vrot.lane.b32.xlu1 %v3587_v19, %s3041_s7 }
 0x13f   :  { %v868_v55 = vpop.f32.mrf.mxu0  ;;  %511 = vrot.lane.b32.xlu0 %v3670_v54, %s3043_s14 }
 0x140   :  { %v869_v52 = vadd.f32 %v3597_v63, %v868_v55  ;;  %v494_v56 = vpop.permute.xlu0 %493 }
 0x141   :  { %v169_v57 = vpop.permute.xlu1 %168  ;;  %v695_v58 = vsel %vm676_vm4, %v658_v8, %v494_v56  ;;  %v1194_v56 = vld [vmem:[%s4924_s3 + $0xe8] sm:$0xff] }
 0x142   :  { %v3679_v59 = vmax.f32 %v869_v52, 0.0  ;;  %2871 = vmatmul.msk.f32.gmra.mxu0 %vm720_vm5, %v695_v58  ;;  %v391_v60 = vpop.permute.xlu2 %390  ;;  %v585_v61 = vsel %vm565_vm1, %v3369_v2, %v169_v57  ;;  %v1178_v52 = vld [vmem:[%s4924_s3 + $0x68] sm:$0xff] }
 0x143   :  { %v622_v3 = vsel %vm602_vm2, %v585_v61, %v278_v30  ;;  %1276 = vmatpush.msra.mxu1 %v1178_v52  ;;  %v1177_v61 = vld [vmem:[%s4924_s3 + $0x60] sm:$0xff] }
 0x144   :  { %v2966_v1 = vpack.i.bf16 %v3679_v59, %v3656_v44  ;;  %2891 = vmatmul.msk.f32.gmra.mxu3 %vm1130_vm6, %v3679_v59 }
 0x145   :  { %1277 = vmatpush.msra.mxu1 %v1177_v61 }
 0x146   :  { %2967 = vrot.lane.b32.xlu2 %v2966_v1, %s3044_s24  ;;  %513 = vrot.lane.b32.xlu1 %v3687_v62, %s3043_s14  ;;  %v1193_v1 = vld [vmem:[%s4924_s3 + $0xe0] sm:$0xff] }
 0x147   :  { %404 = vrot.lane.b32.xlu0 %v3670_v54, %s3042_s28 }
 0x148   :  { %v387_v2 = vpop.permute.xlu0 %386  ;;  %v871_v12 = vpop.f32.mrf.mxu0 }
 0x149   :  { %v659_v13 = vsel %vm639_vm3, %v622_v3, %v387_v2  ;;  %v496_v14 = vpop.permute.xlu1 %495  ;;  %v872_v15 = vadd.f32 %v3597_v63, %v871_v12  ;;  %v1176_v3 = vld [vmem:[%s4924_s3 + $0x58] sm:$0xff] }
 0x14a   :  { %v696_v20 = vsel %vm676_vm4, %v659_v13, %v496_v14  ;;  %v3702_v21 = vpop.permute.xlu2 %283  ;;  %v1192_v12 = vld [vmem:[%s4924_s3 + $0xd8] sm:$0xff]  ;;  %v1175_v13 = vld [vmem:[%s4924_s3 + $0x50] sm:$0xff]  ;;  %1278 = vmatpush.msra.mxu1 %v1176_v3 }
 0x14b   :  { %v3704_v22 = vmax.f32 %v872_v15, 0.0  ;;  %2872 = vmatmul.msk.f32.gmra.mxu0 %vm720_vm5, %v696_v20  ;;  %v1191_v14 = vld [vmem:[%s4924_s3 + $0xd0] sm:$0xff] }
 0x14c   :  { %1279 = vmatpush.msra.mxu1 %v1175_v13  ;;  %v1183_v13 = vld [vmem:[%s4924_s3 + $0x90] sm:$0xff] }
 0x14d   :  { %2892 = vmatmul.msk.f32.gmra.mxu3 %vm1130_vm6, %v3704_v22 }
 0x14e   :  { %406 = vrot.lane.b32.xlu2 %v3687_v62, %s3042_s28  ;;  %297 = vrot.lane.b32.xlu1 %v3670_v54, %s3040_s23 }
 0x14f   :  { %188 = vrot.lane.b32.xlu0 %v3625_v24, %s3041_s7 }
 0x150   :  { %v280_v11 = vpop.permute.xlu0 %279 }
 0x151   :  { %v623_v5 = vsel %vm602_vm2, %v586_v39, %v280_v11  ;;  %v389_v28 = vpop.permute.xlu1 %388  ;;  %v874_v29 = vpop.f32.mrf.mxu0  ;;  %v1174_v11 = vld [vmem:[%s4924_s3 + $0x48] sm:$0xff] }
 0x152   :  { %v660_v30 = vsel %vm639_vm3, %v623_v5, %v389_v28  ;;  %v875_v31 = vadd.f32 %v3597_v63, %v874_v29  ;;  %v3721_v34 = vpop.permute.xlu2 %176  ;;  %1280 = vmatpush.msra.mxu1 %v1174_v11  ;;  %v1182_v11 = vld [vmem:[%s4924_s3 + $0x88] sm:$0xff] }
 0x153   :  { %v697_v4 = vsel %vm676_vm4, %v660_v30, %v498_v50  ;;  %v1195_v50 = vld [vmem:[%s4924_s3 + $0xf0] sm:$0xff] }
 0x154   :  { %v3723_v36 = vmax.f32 %v875_v31, 0.0  ;;  %2873 = vmatmul.msk.f32.gmra.mxu0 %vm720_vm5, %v697_v4  ;;  %1388 = vmatpush.msra.mxu2 %v1195_v50  ;;  %v1173_v31 = vld [vmem:[%s4924_s3 + $0x40] sm:$0xff] }
 0x155   :  { %v1189_v4 = vld [vmem:[%s4924_s3 + $0xc0] sm:$0xff]  ;;  %1281 = vmatpush.msra.mxu1 %v1173_v31 }
 0x156   :  { %v2971_v38 = vpack.i.bf16 %v3723_v36, %v3704_v22  ;;  %190 = vrot.lane.b32.xlu1 %v3670_v54, %s3041_s7  ;;  %2893 = vmatmul.msk.f32.gmra.mxu3 %vm1130_vm6, %v3723_v36 }
 0x157   :  { %515 = vrot.lane.b32.xlu0 %v3729_v37, %s3043_s14  ;;  %1389 = vmatpush.msra.mxu2 %v1194_v56 }
 0x158   :  { %v173_v17 = vpop.permute.xlu0 %172  ;;  %2972 = vrot.lane.b32.xlu2 %v2971_v38, %s3044_s24 }
 0x159   :  { %v587_v40 = vsel %vm565_vm1, %v3400_v26, %v173_v17  ;;  %v282_v41 = vpop.permute.xlu1 %281  ;;  %1390 = vmatpush.msra.mxu2 %v1193_v1  ;;  %v3831_v17 = vld [vmem:[%s4921_s0 + $0x118] sm:$0xff]  ;;  %v3877_v1 = vld [vmem:[%s4921_s0 + $0x120] sm:$0xff] }
 0x15a   :  { %v624_v47 = vsel %vm602_vm2, %v587_v40, %v282_v41  ;;  %v3754_v48 = vpop.permute.xlu2 %503  ;;  %v1172_v40 = vld [vmem:[%s4924_s3 + $0x38] sm:$0xff] }
 0x15b   :  { %v661_v26 = vsel %vm639_vm3, %v624_v47, %v391_v60  ;;  %1391 = vmatpush.msra.mxu2 %v1192_v12  ;;  %v1188_v41 = vld [vmem:[%s4924_s3 + $0xb8] sm:$0xff]  ;;  %1282 = vmatpush.msra.mxu1 %v1172_v40  ;;  %v1187_v47 = vld [vmem:[%s4924_s3 + $0xb0] sm:$0xff] }
 0x15c   :  { %v1184_v12 = vld [vmem:[%s4924_s3 + $0x98] sm:$0xff] }
 0x15d   :  { %1392 = vmatpush.msra.mxu2 %v1191_v14  ;;  %1283 = vmatpush.msra.mxu1 %v1171_v43 }
 0x15e   :  { %517 = vrot.lane.b32.xlu1 %v3752_v46, %s3043_s14 }
 0x15f   :  { %408 = vrot.lane.b32.xlu0 %v3729_v37, %s3042_s28  ;;  %v877_v51 = vpop.f32.mrf.mxu0  ;;  %1284 = vmatpush.msra.mxu1 %v1170_v49 }
 0x160   :  { %v500_v8 = vpop.permute.xlu0 %499  ;;  %v878_v55 = vadd.f32 %v3597_v63, %v877_v51  ;;  %299 = vrot.lane.b32.xlu2 %v3687_v62, %s3040_s23 }
 0x161   :  { %v175_v57 = vpop.permute.xlu1 %174  ;;  %v698_v58 = vsel %vm676_vm4, %v661_v26, %v500_v8  ;;  %v589_v26 = vsel %vm565_vm1, %v3442_v7, %v3721_v34  ;;  %v1186_v7 = vld [vmem:[%s4924_s3 + $0xa8] sm:$0xff] }
 0x162   :  { %v3777_v60 = vmax.f32 %v878_v55, 0.0  ;;  %2874 = vmatmul.msk.f32.gmra.mxu0 %vm720_vm5, %v698_v58  ;;  %v588_v2 = vsel %vm565_vm1, %v3426_v6, %v175_v57  ;;  %v3808_v15 = vpop.permute.xlu2 %396  ;;  %v1169_v57 = vld [vmem:[%s4924_s3 + $0x20] sm:$0xff] }
 0x163   :  { %v625_v6 = vsel %vm602_vm2, %v588_v2, %v3702_v21  ;;  %v1190_v21 = vld [vmem:[%s4924_s3 + $0xc8] sm:$0xff]  ;;  %v1185_v58 = vld [vmem:[%s4924_s3 + $0xa0] sm:$0xff]  ;;  %1285 = vmatpush.msra.mxu1 %v1169_v57  ;;  %v1168_v2 = vld [vmem:[%s4924_s3 + $0x18] sm:$0xff] }
 0x164   :  { %2894 = vmatmul.msk.f32.gmra.mxu3 %vm1130_vm6, %v3777_v60  ;;  %1393 = vmatpush.msra.mxu2 %v1190_v21 }
 0x165   :  { %1286 = vmatpush.msra.mxu1 %v1168_v2  ;;  %v851_v2 = vadd.f32 %v3597_v63, %v3539_v35 }
 0x166   :  { %301 = vrot.lane.b32.xlu1 %v3729_v37, %s3040_s23  ;;  %1394 = vmatpush.msra.mxu2 %v1189_v4 }
 0x167   :  { %192 = vrot.lane.b32.xlu0 %v3687_v62, %s3041_s7 }
 0x168   :  { %v393_v20 = vpop.permute.xlu0 %392  ;;  %v880_v39 = vpop.f32.mrf.mxu0  ;;  %1395 = vmatpush.msra.mxu2 %v1188_v41 }
 0x169   :  { %v662_v5 = vsel %vm639_vm3, %v625_v6, %v393_v20  ;;  %v881_v28 = vadd.f32 %v3597_v63, %v880_v39  ;;  %v502_v29 = vpop.permute.xlu1 %501  ;;  %v1166_v39 = vld [vmem:[%s4924_s3 + $0x8] sm:$0xff] }
 0x16a   :  { %v699_v30 = vsel %vm676_vm4, %v662_v5, %v502_v29  ;;  %1396 = vmatpush.msra.mxu2 %v1187_v47  ;;  %v181_v56 = vpop.permute.xlu2 %180  ;;  %v1165_v5 = vld [vmem:[%s4924_s3] sm:$0xff] }
 0x16b   :  { %v3825_v38 = vmax.f32 %v881_v28, 0.0  ;;  %2875 = vmatmul.msk.f32.gmra.mxu0 %vm720_vm5, %v699_v30  ;;  %v591_v47 = vsel %vm565_vm1, %v3483_v9, %v181_v56 }
 0x16c   :  { %1397 = vmatpush.msra.mxu2 %v1186_v7 }
 0x16d   :  { %v2976_v42 = vpack.i.bf16 %v3825_v38, %v3777_v60  ;;  %2895 = vmatmul.msk.f32.gmra.mxu3 %vm1130_vm6, %v3825_v38 }
 0x16e   :  { %194 = vrot.lane.b32.xlu1 %v3729_v37, %s3041_s7  ;;  %1398 = vmatpush.msra.mxu2 %v1185_v58 }
 0x16f   :  { %2977 = vrot.lane.b32.xlu2 %v2976_v42, %s3044_s24  ;;  %519 = vrot.lane.b32.xlu0 %v3831_v17, %s3043_s14  ;;  %v3935_v42 = vld [vmem:[%s4921_s0 + $0x128] sm:$0xff] }
 0x170   :  { %v286_v50 = vpop.permute.xlu0 %285  ;;  %1399 = vmatpush.msra.mxu2 %v1184_v12 }
 0x171   :  { %v626_v34 = vsel %vm602_vm2, %v589_v26, %v286_v50  ;;  %v395_v51 = vpop.permute.xlu1 %394  ;;  %v883_v8 = vpop.f32.mrf.mxu0 }
 0x172   :  { %v663_v55 = vsel %vm639_vm3, %v626_v34, %v395_v51  ;;  %v884_v52 = vadd.f32 %v3597_v63, %v883_v8  ;;  %1400 = vmatpush.msra.mxu2 %v1183_v13  ;;  %v508_v28 = vpop.permute.xlu2 %507 }
 0x173   :  { %v700_v61 = vsel %vm676_vm4, %v663_v55, %v3754_v48  ;;  %v1167_v48 = vld [vmem:[%s4924_s3 + $0x10] sm:$0xff] }
 0x174   :  { %2876 = vmatmul.msk.f32.gmra.mxu0 %vm720_vm5, %v700_v61  ;;  %v3880_v3 = vmax.f32 %v884_v52, 0.0  ;;  %1287 = vmatpush.msra.mxu1 %v1167_v48  ;;  %v92_v55 = vld [vmem:[%s4921_s0 + $0x130] sm:$0xff]  ;;  %v958_v48 = vmax.f32 %v851_v2, 0.0 }
 0x175   :  { %1401 = vmatpush.msra.mxu2 %v1182_v11 }
 0x176   :  { %521 = vrot.lane.b32.xlu1 %v3877_v1, %s3043_s14  ;;  %2896 = vmatmul.msk.f32.gmra.mxu3 %vm1130_vm6, %v3880_v3 }
 0x177   :  { %410 = vrot.lane.b32.xlu2 %v3752_v46, %s3042_s28  ;;  %412 = vrot.lane.b32.xlu0 %v3831_v17, %s3042_s28 }
 0x178   :  { %v179_v14 = vpop.permute.xlu0 %178  ;;  %1288 = vmatpush.msra.mxu1 %v1166_v39 }
 0x179   :  { %v590_v6 = vsel %vm565_vm1, %v3457_v53, %v179_v14  ;;  %v288_v20 = vpop.permute.xlu1 %287  ;;  %v1181_v53 = vld [vmem:[%s4924_s3 + $0x80] sm:$0xff] }
 0x17a   :  { %v627_v21 = vsel %vm602_vm2, %v590_v6, %v288_v20  ;;  %1289 = vmatpush.msra.mxu1 %v1165_v5  ;;  %1402 = vmatpush.msra.mxu2 %v1181_v53  ;;  %v292_v26 = vpop.permute.xlu2 %291 }
 0x17b   :  { %v664_v29 = vsel %vm639_vm3, %v627_v21, %v3808_v15 }
 0x17e   :  { %305 = vrot.lane.b32.xlu1 %v3831_v17, %s3040_s23 }
 0x17f   :  { %v886_v30 = vpop.f32.mrf.mxu0  ;;  %303 = vrot.lane.b32.xlu2 %v3752_v46, %s3040_s23  ;;  %196 = vrot.lane.b32.xlu0 %v3752_v46, %s3041_s7 }
 0x180   :  { %v887_v31 = vadd.f32 %v3597_v63, %v886_v30  ;;  %v506_v4 = vpop.permute.xlu0 %505 }
 0x181   :  { %v701_v40 = vsel %vm676_vm4, %v664_v29, %v506_v4  ;;  %v399_v43 = vpop.permute.xlu1 %398 }
 0x182   :  { %v3927_v41 = vmax.f32 %v887_v31, 0.0  ;;  %2877 = vmatmul.msk.f32.gmra.mxu0 %vm720_vm5, %v701_v40  ;;  %v403_v56 = vpop.permute.xlu2 %402 }
 0x184   :  { %v2981_v15 = vpack.i.bf16 %v3927_v41, %v3880_v3  ;;  %2897 = vmatmul.msk.f32.gmra.mxu3 %vm1130_vm6, %v3927_v41 }
 0x186   :  { %198 = vrot.lane.b32.xlu1 %v3831_v17, %s3041_s7 }
 0x187   :  { %2982 = vrot.lane.b32.xlu2 %v2981_v15, %s3044_s24  ;;  %523 = vrot.lane.b32.xlu0 %v3935_v42, %s3043_s14 }
 0x188   :  { %v290_v49 = vpop.permute.xlu0 %289  ;;  %v889_v50 = vpop.f32.mrf.mxu0 }
 0x189   :  { %v628_v7 = vsel %vm602_vm2, %v591_v47, %v290_v49  ;;  %v890_v34 = vadd.f32 %v3597_v63, %v889_v50  ;;  %v183_v52 = vpop.permute.xlu1 %182 }
 0x18a   :  { %v665_v51 = vsel %vm639_vm3, %v628_v7, %v399_v43  ;;  %v592_v20 = vsel %vm565_vm1, %v3498_v10, %v183_v52  ;;  %v3976_v39 = vpop.permute.xlu2 %295 }
 0x18b   :  { %v3949_v8 = vmax.f32 %v890_v34, 0.0  ;;  %v702_v9 = vsel %vm676_vm4, %v665_v51, %v508_v28  ;;  %v629_v21 = vsel %vm602_vm2, %v592_v20, %v292_v26 }
 0x18c   :  { %2878 = vmatmul.msk.f32.gmra.mxu0 %vm720_vm5, %v702_v9 }
 0x18d   :  { %2898 = vmatmul.msk.f32.gmra.mxu3 %vm1130_vm6, %v3949_v8 }
 0x18e   :  { %525 = vrot.lane.b32.xlu1 %v92_v55, %s3043_s14 }
 0x18f   :  { %414 = vrot.lane.b32.xlu2 %v3877_v1, %s3042_s28  ;;  %416 = vrot.lane.b32.xlu0 %v3935_v42, %s3042_s28 }
 0x190   :  { %v401_v13 = vpop.permute.xlu0 %400 }
 0x191   :  { %v892_v57 = vpop.f32.mrf.mxu0  ;;  %v666_v10 = vsel %vm639_vm3, %v629_v21, %v401_v13 }
 0x192   :  { %v893_v58 = vadd.f32 %v3597_v63, %v892_v57 }
 0x194   :  { %v3964_v61 = vmax.f32 %v893_v58, 0.0 }
 0x196   :  { %2899 = vmatmul.msk.f32.gmra.mxu3 %vm1130_vm6, %v3964_v61 }
 0x197   :  { %307 = vrot.lane.b32.xlu2 %v3877_v1, %s3040_s23  ;;  %1052 = vrot.lane.b32.xlu0 %v3964_v61, %s3044_s24 }
 0x198   :  { %v2958_v12 = vpop.permute.xlu1 %2957 }
 0x199   :  { %v2960_v14 = vunpack.i.h.bf16 %v2958_v12  ;;  %v2959_v6 = vunpack.i.l.bf16 %v2958_v12 }
 0x19b   :  { %v1131_v35 = vsel %vm1130_vm6, %v958_v48, %v2960_v14  ;;  %v1133_v11 = vsel %vm1130_vm6, %v960_v32, %v2959_v6 }
 0x19c   :  { %1290 = vmatmul.f32.vlgmr.msra.gmra.mxu1 %v1131_v35  ;;  %1403 = vmatmul.f32.vlgmr.msra.gmra.mxu2 %v1133_v11 }
 0x19f   :  { %v895_v5 = vpop.f32.mrf.mxu0  ;;  %1050 = vrot.lane.b32.xlu2 %v3949_v8, %s3044_s24  ;;  %200 = vrot.lane.b32.xlu0 %v3877_v1, %s3041_s7 }
 0x1a0   :  { %v896_v28 = vadd.f32 %v3597_v63, %v895_v5  ;;  %v510_v53 = vpop.permute.xlu1 %509  ;;  %v2968_v4 = vpop.permute.xlu2 %2967 }
 0x1a1   :  { %v703_v25 = vsel %vm676_vm4, %v666_v10, %v510_v53  ;;  %v2963_v29 = vpop.permute.xlu0 %2962  ;;  %v2969_v47 = vunpack.i.l.bf16 %v2968_v4  ;;  %v2970_v34 = vunpack.i.h.bf16 %v2968_v4 }
 0x1a2   :  { %v3990_v32 = vmax.f32 %v896_v28, 0.0  ;;  %v2965_v30 = vunpack.i.h.bf16 %v2963_v29  ;;  %v2964_v31 = vunpack.i.l.bf16 %v2963_v29  ;;  %2879 = vmatmul.msk.f32.gmra.mxu0 %vm720_vm5, %v703_v25 }
 0x1a3   :  { %v1136_v57 = vsel %vm1130_vm6, %v3656_v44, %v2970_v34 }
 0x1a4   :  { %1054 = vrot.lane.b32.xlu1 %v3990_v32, %s3044_s24  ;;  %v1132_v1 = vsel %vm1130_vm6, %v959_v16, %v2965_v30  ;;  %v1134_v40 = vsel %vm1130_vm6, %v961_v18, %v2964_v31  ;;  %2900 = vmatmul.msk.f32.gmra.mxu3 %vm1130_vm6, %v3990_v32  ;;  %v1135_v18 = vsel %vm1130_vm6, %v3636_v33, %v2969_v47 }
 0x1a5   :  { %1293 = vmatmul.f32.gmra.mxu1 %v1132_v1  ;;  %1406 = vmatmul.f32.gmra.mxu2 %v1134_v40 }
 0x1a7   :  { %418 = vrot.lane.b32.xlu0 %v92_v55, %s3042_s28 }
 0x1a8   :  { %v898_v15 = vpop.f32.mrf.mxu0  ;;  %v294_v43 = vpop.permute.xlu1 %293 }
 0x1a9   :  { %v899_v26 = vadd.f32 %v3597_v63, %v898_v15  ;;  %v185_v49 = vpop.permute.xlu0 %184  ;;  %v407_v16 = vpop.permute.xlu2 %406 }
 0x1aa   :  { %v593_v23 = vsel %vm565_vm1, %v3517_v27, %v185_v49 }
 0x1ab   :  { %v4005_v0 = vmax.f32 %v899_v26, 0.0  ;;  %v630_v50 = vsel %vm602_vm2, %v593_v23, %v294_v43 }
 0x1ac   :  { %309 = vrot.lane.b32.xlu1 %v3935_v42, %s3040_s23  ;;  %v667_v9 = vsel %vm639_vm3, %v630_v50, %v403_v56  ;;  %v93_v42 = vld [vmem:[%s4921_s0 + $0x138] sm:$0xff] }
 0x1ad   :  { %1056 = vrot.lane.b32.xlu2 %v4005_v0, %s3044_s24  ;;  %1296 = vmatmul.f32.gmra.mxu1 %v1133_v11 }
 0x1ae   :  { %1409 = vmatmul.f32.gmra.mxu2 %v1135_v18  ;;  %2901 = vmatmul.msk.f32.gmra.mxu3 %vm1130_vm6, %v4005_v0 }
 0x1b0   :  { %v187_v7 = vpop.permute.xlu1 %186 }
 0x1b1   :  { %v901_v27 = vpop.f32.mrf.mxu0  ;;  %v512_v51 = vpop.permute.xlu0 %511  ;;  %v594_v56 = vsel %vm565_vm1, %v3563_v45, %v187_v7 }
 0x1b2   :  { %v902_v55 = vadd.f32 %v3597_v63, %v901_v27  ;;  %v704_v33 = vsel %vm676_vm4, %v667_v9, %v512_v51  ;;  %v2973_v58 = vpop.permute.xlu2 %2972  ;;  %v631_v13 = vsel %vm602_vm2, %v594_v56, %v3976_v39 }
 0x1b3   :  { %2880 = vmatmul.msk.f32.gmra.mxu0 %vm720_vm5, %v704_v33  ;;  %v2974_v12 = vunpack.i.l.bf16 %v2973_v58  ;;  %v2975_v21 = vunpack.i.h.bf16 %v2973_v58 }
 0x1b4   :  { %v4025_v52 = vmax.f32 %v902_v55, 0.0  ;;  %527 = vrot.lane.b32.xlu1 %v93_v42, %s3043_s14 }
 0x1b5   :  { %1299 = vmatmul.f32.gmra.mxu1 %v1134_v40  ;;  %v1137_v45 = vsel %vm1130_vm6, %v3679_v59, %v2974_v12  ;;  %v1138_v59 = vsel %vm1130_vm6, %v3704_v22, %v2975_v21 }
 0x1b6   :  { %1412 = vmatmul.f32.gmra.mxu2 %v1136_v57  ;;  %1058 = vrot.lane.b32.xlu2 %v4025_v52, %s3044_s24 }
 0x1b7   :  { %2902 = vmatmul.msk.f32.gmra.mxu3 %vm1130_vm6, %v4025_v52 }
 0x1b8   :  { %v514_v2 = vpop.permute.xlu1 %513 }
 0x1b9   :  { %v405_v48 = vpop.permute.xlu0 %404 }
 0x1ba   :  { %v668_v14 = vsel %vm639_vm3, %v631_v13, %v405_v48  ;;  %v300_v20 = vpop.permute.xlu2 %299 }
 0x1bb   :  { %v705_v44 = vsel %vm676_vm4, %v668_v14, %v514_v2  ;;  %v1810_v14 = vld [vmem:[%s4926_s5 + $0x78] sm:$0xff] }
 0x1bc   :  { %2881 = vmatmul.msk.f32.gmra.mxu0 %vm720_vm5, %v705_v44  ;;  %1896 = vmatpush.msrb.mxu3 %v1810_v14 }
 0x1bd   :  { %1302 = vmatmul.f32.gmra.mxu1 %v1135_v18 }
 0x1be   :  { %1415 = vmatmul.f32.gmra.mxu2 %v1137_v45 }
 0x1bf   :  { %v904_v6 = vpop.f32.mrf.mxu0 }
 0x1c0   :  { %v905_v35 = vadd.f32 %v3597_v63, %v904_v6  ;;  %v298_v11 = vpop.permute.xlu1 %297 }
 0x1c1   :  { %v189_v5 = vpop.permute.xlu0 %188 }
 0x1c2   :  { %v4044_v10 = vmax.f32 %v905_v35, 0.0  ;;  %v595_v39 = vsel %vm565_vm1, %v3587_v19, %v189_v5 }
 0x1c3   :  { %v632_v28 = vsel %vm602_vm2, %v595_v39, %v298_v11  ;;  %v1834_v39 = vld [vmem:[%s4926_s5 + $0x138] sm:$0xff] }
 0x1c4   :  { %1060 = vrot.lane.b32.xlu2 %v4044_v10, %s3044_s24  ;;  %2903 = vmatmul.msk.f32.gmra.mxu3 %vm1130_vm6, %v4044_v10  ;;  %v669_v19 = vsel %vm639_vm3, %v632_v28, %v407_v16  ;;  %v1826_v28 = vld [vmem:[%s4926_s5 + $0xf8] sm:$0xff] }
 0x1c5   :  { %1305 = vmatmul.f32.gmra.mxu1 %v1136_v57  ;;  %2106 = vmatpush.msrb.mxu2 %v1834_v39 }
 0x1c6   :  { %1418 = vmatmul.f32.gmra.mxu2 %v1138_v59  ;;  %1997 = vmatpush.msrb.mxu1 %v1826_v28  ;;  %v1806_v28 = vld [vmem:[%s4926_s5 + $0x58] sm:$0xff] }
 0x1c8   :  { %v907_v53 = vpop.f32.mrf.mxu0  ;;  %v191_v25 = vpop.permute.xlu1 %190 }
 0x1c9   :  { %v908_v29 = vadd.f32 %v3597_v63, %v907_v53  ;;  %v2978_v30 = vpop.permute.xlu2 %2977  ;;  %v516_v31 = vpop.permute.xlu0 %515  ;;  %v596_v15 = vsel %vm565_vm1, %v3625_v24, %v191_v25 }
 0x1ca   :  { %v2979_v4 = vunpack.i.l.bf16 %v2978_v30  ;;  %v706_v1 = vsel %vm676_vm4, %v669_v19, %v516_v31  ;;  %v2980_v47 = vunpack.i.h.bf16 %v2978_v30 }
 0x1cb   :  { %v4058_v40 = vmax.f32 %v908_v29, 0.0  ;;  %2882 = vmatmul.msk.f32.gmra.mxu0 %vm720_vm5, %v706_v1 }
 0x1cc   :  { %v1139_v22 = vsel %vm1130_vm6, %v3723_v36, %v2979_v4  ;;  %v633_v36 = vsel %vm602_vm2, %v596_v15, %v300_v20  ;;  %v1140_v24 = vsel %vm1130_vm6, %v3777_v60, %v2980_v47  ;;  %v1809_v15 = vld [vmem:[%s4926_s5 + $0x70] sm:$0xff] }
 0x1cd   :  { %1062 = vrot.lane.b32.xlu0 %v4058_v40, %s3044_s24  ;;  %1308 = vmatmul.f32.gmra.mxu1 %v1137_v45 }
 0x1ce   :  { %1421 = vmatmul.f32.gmra.mxu2 %v1139_v22  ;;  %2904 = vmatmul.msk.f32.gmra.mxu3 %vm1130_vm6, %v4058_v40 }
 0x1cf   :  { %1897 = vmatpush.msrb.mxu3 %v1809_v15 }
 0x1d0   :  { %v518_v43 = vpop.permute.xlu1 %517 }
 0x1d1   :  { %v910_v26 = vpop.f32.mrf.mxu0  ;;  %v411_v49 = vpop.permute.xlu2 %410 }
 0x1d2   :  { %v911_v23 = vadd.f32 %v3597_v63, %v910_v26  ;;  %v409_v16 = vpop.permute.xlu0 %408 }
 0x1d3   :  { %v670_v18 = vsel %vm639_vm3, %v633_v36, %v409_v16 }
 0x1d4   :  { %v4072_v50 = vmax.f32 %v911_v23, 0.0  ;;  %v707_v7 = vsel %vm676_vm4, %v670_v18, %v518_v43 }
 0x1d5   :  { %2883 = vmatmul.msk.f32.gmra.mxu0 %vm720_vm5, %v707_v7  ;;  %1311 = vmatmul.f32.gmra.mxu1 %v1138_v59 }
 0x1d6   :  { %1424 = vmatmul.f32.gmra.mxu2 %v1140_v24  ;;  %1064 = vrot.lane.b32.xlu1 %v4072_v50, %s3044_s24 }
 0x1d7   :  { %2905 = vmatmul.msk.f32.gmra.mxu3 %vm1130_vm6, %v4072_v50 }
 0x1d8   :  { %v302_v34 = vpop.permute.xlu1 %301 }
 0x1d9   :  { %v304_v27 = vpop.permute.xlu2 %303 }
 0x1da   :  { %v193_v51 = vpop.permute.xlu0 %192 }
 0x1db   :  { %v597_v9 = vsel %vm565_vm1, %v3670_v54, %v193_v51 }
 0x1dc   :  { %v634_v42 = vsel %vm602_vm2, %v597_v9, %v302_v34 }
 0x1dd   :  { %1314 = vmatmul.f32.gmra.mxu1 %v1139_v22  ;;  %v671_v12 = vsel %vm639_vm3, %v634_v42, %v411_v49 }
 0x1df   :  { %v913_v55 = vpop.f32.mrf.mxu0 }
 0x1e0   :  { %v914_v33 = vadd.f32 %v3597_v63, %v913_v55  ;;  %v195_v60 = vpop.permute.xlu1 %194 }
 0x1e1   :  { %v2983_v57 = vpop.permute.xlu2 %2982  ;;  %v598_v13 = vsel %vm565_vm1, %v3687_v62, %v195_v60  ;;  %v1833_v60 = vld [vmem:[%s4926_s5 + $0x130] sm:$0xff] }
 0x1e2   :  { %v4086_v56 = vmax.f32 %v914_v33, 0.0  ;;  %v2984_v58 = vunpack.i.l.bf16 %v2983_v57  ;;  %v520_v2 = vpop.permute.xlu0 %519  ;;  %v2985_v6 = vunpack.i.h.bf16 %v2983_v57  ;;  %v635_v11 = vsel %vm602_vm2, %v598_v13, %v304_v27  ;;  %v1808_v33 = vld [vmem:[%s4926_s5 + $0x68] sm:$0xff]  ;;  %2107 = vmatpush.msrb.mxu2 %v1833_v60  ;;  %v1831_v60 = vld [vmem:[%s4926_s5 + $0x120] sm:$0xff] }
 0x1e3   :  { %v708_v48 = vsel %vm676_vm4, %v671_v12, %v520_v2  ;;  %1898 = vmatpush.msrb.mxu3 %v1808_v33  ;;  %v1824_v57 = vld [vmem:[%s4926_s5 + $0xe8] sm:$0xff] }
 0x1e4   :  { %2884 = vmatmul.msk.f32.gmra.mxu0 %vm720_vm5, %v708_v48  ;;  %1066 = vrot.lane.b32.xlu2 %v4086_v56, %s3044_s24  ;;  %v1141_v54 = vsel %vm1130_vm6, %v3825_v38, %v2984_v58  ;;  %v1142_v59 = vsel %vm1130_vm6, %v3880_v3, %v2985_v6  ;;  %v1807_v58 = vld [vmem:[%s4926_s5 + $0x60] sm:$0xff] }
 0x1e5   :  { %1317 = vmatmul.f32.gmra.mxu1 %v1140_v24  ;;  %1427 = vmatmul.f32.gmra.mxu2 %v1141_v54 }
 0x1e6   :  { %2906 = vmatmul.msk.f32.gmra.mxu3 %vm1130_vm6, %v4086_v56 }
 0x1e7   :  { %1899 = vmatpush.msrb.mxu3 %v1807_v58 }
 0x1e8   :  { %v916_v44 = vpop.f32.mrf.mxu0  ;;  %v522_v45 = vpop.permute.xlu1 %521 }
 0x1e9   :  { %v917_v20 = vadd.f32 %v3597_v63, %v916_v44  ;;  %v415_v35 = vpop.permute.xlu2 %414  ;;  %1900 = vmatpush.msrb.mxu3 %v1806_v28 }
 0x1ea   :  { %v413_v38 = vpop.permute.xlu0 %412 }
 0x1eb   :  { %v4104_v21 = vmax.f32 %v917_v20, 0.0  ;;  %v672_v5 = vsel %vm639_vm3, %v635_v11, %v413_v38 }
 0x1ec   :  { %v709_v62 = vsel %vm676_vm4, %v672_v5, %v522_v45 }
 0x1ed   :  { %2885 = vmatmul.msk.f32.gmra.mxu0 %vm720_vm5, %v709_v62  ;;  %1068 = vrot.lane.b32.xlu0 %v4104_v21, %s3044_s24 }
 0x1ee   :  { %1320 = vmatmul.f32.gmra.mxu1 %v1141_v54  ;;  %1430 = vmatmul.f32.gmra.mxu2 %v1142_v59 }
 0x1ef   :  { %2907 = vmatmul.msk.f32.gmra.mxu3 %vm1130_vm6, %v4104_v21 }
 0x1f0   :  { %v306_v53 = vpop.permute.xlu1 %305 }
 0x1f1   :  { %v919_v25 = vpop.f32.mrf.mxu0  ;;  %v308_v29 = vpop.permute.xlu2 %307 }
 0x1f2   :  { %v920_v30 = vadd.f32 %v3597_v63, %v919_v25  ;;  %v197_v31 = vpop.permute.xlu0 %196  ;;  %v1832_v25 = vld [vmem:[%s4926_s5 + $0x128] sm:$0xff] }
 0x1f3   :  { %v599_v3 = vsel %vm565_vm1, %v3729_v37, %v197_v31  ;;  %2108 = vmatpush.msrb.mxu2 %v1832_v25 }
 0x1f4   :  { %v4124_v19 = vmax.f32 %v920_v30, 0.0  ;;  %v636_v4 = vsel %vm602_vm2, %v599_v3, %v306_v53 }
 0x1f5   :  { %v673_v1 = vsel %vm639_vm3, %v636_v4, %v415_v35  ;;  %v4223_v4 = vld [vmem:[%s4923_s2] ss:$0 sm:$0xff]  ;;  %2109 = vmatpush.msrb.mxu2 %v1831_v60 }
 0x1f6   :  { %1323 = vmatmul.f32.gmra.mxu1 %v1142_v59  ;;  %1070 = vrot.lane.b32.xlu1 %v4124_v19, %s3044_s24  ;;  %v4203_v59 = vpop.f32.mrf.mxu3 }
 0x1f7   :  { %2908 = vmatmul.msk.f32.gmra.mxu3 %vm1130_vm6, %v4124_v19 }
 0x1f8   :  { %v199_v22 = vpop.permute.xlu1 %198 }
 0x1f9   :  { %v1051_v43 = vpop.permute.xlu2 %1050  ;;  %v600_v49 = vsel %vm565_vm1, %v3752_v46, %v199_v22  ;;  %v1825_v46 = vld [vmem:[%s4926_s5 + $0xf0] sm:$0xff] }
 0x1fa   :  { %v524_v37 = vpop.permute.xlu0 %523  ;;  %v1143_v47 = vsel %vm1130_vm6, %v3927_v41, %v1051_v43  ;;  %v637_v36 = vsel %vm602_vm2, %v600_v49, %v308_v29  ;;  %1998 = vmatpush.msrb.mxu1 %v1825_v46  ;;  %v1804_v46 = vld [vmem:[%s4926_s5 + $0x48] sm:$0xff] }
 0x1fb   :  { %v710_v26 = vsel %vm676_vm4, %v673_v1, %v524_v37  ;;  %1433 = vmatmul.f32.gmra.mxu2 %v1143_v47 }
 0x1fc   :  { %2886 = vmatmul.msk.f32.gmra.mxu0 %vm720_vm5, %v710_v26  ;;  %1999 = vmatpush.msrb.mxu1 %v1824_v57 }
 0x1fe   :  { %1326 = vmatmul.f32.gmra.mxu1 %v1143_v47  ;;  %v4214_v29 = vpop.f32.mrf.mxu3 }
 0x1ff   :  { %v922_v23 = vpop.f32.mrf.mxu0 }
 0x200   :  { %v923_v16 = vadd.f32 %v3597_v63, %v922_v23  ;;  %v526_v18 = vpop.permute.xlu1 %525  ;;  %v1805_v23 = vld [vmem:[%s4926_s5 + $0x50] sm:$0xff] }
 0x201   :  { %1901 = vmatpush.msrb.mxu3 %v1805_v23 }
 0x202   :  { %v4143_v7 = vmax.f32 %v923_v16, 0.0  ;;  %v417_v24 = vpop.permute.xlu0 %416 }
 0x203   :  { %v674_v41 = vsel %vm639_vm3, %v637_v36, %v417_v24  ;;  %v1821_v24 = vld [vmem:[%s4926_s5 + $0xd0] sm:$0xff]  ;;  %1902 = vmatpush.msrb.mxu3 %v1804_v46 }
 0x204   :  { %v711_v34 = vsel %vm676_vm4, %v674_v41, %v526_v18  ;;  %1072 = vrot.lane.b32.xlu2 %v4143_v7, %s3044_s24  ;;  %2909 = vmatmul.msk.f32.gmra.mxu3 %vm1130_vm6, %v4143_v7 }
 0x205   :  { %2887 = vmatmul.msk.f32.gmra.mxu0 %vm720_vm5, %v711_v34 }
 0x206   :  { %v4235_v43 = vpop.f32.mrf.mxu3 }
 0x207   :  { %v1057_v48 = vpop.permute.xlu2 %1056 }
 0x208   :  { %v1146_v45 = vsel %vm1130_vm6, %v3990_v32, %v1057_v48 }
 0x209   :  { %v925_v27 = vpop.f32.mrf.mxu0 }
 0x20a   :  { %v926_v51 = vadd.f32 %v3597_v63, %v925_v27  ;;  %v1053_v9 = vpop.permute.xlu0 %1052 }
 0x20b   :  { %v1144_v42 = vsel %vm1130_vm6, %v3949_v8, %v1053_v9 }
 0x20c   :  { %v4158_v55 = vmax.f32 %v926_v51, 0.0  ;;  %1329 = vmatmul.f32.gmra.mxu1 %v1144_v42  ;;  %1436 = vmatmul.f32.gmra.mxu2 %v1144_v42 }
 0x20e   :  { %1074 = vrot.lane.b32.xlu0 %v4158_v55, %s3044_s24  ;;  %2910 = vmatmul.msk.f32.gmra.mxu3 %vm1130_vm6, %v4158_v55  ;;  %v4253_v18 = vpop.f32.mrf.mxu3 }
 0x212   :  { %v201_v12 = vpop.permute.xlu0 %200 }
 0x213   :  { %v601_v13 = vsel %vm565_vm1, %v3831_v17, %v201_v12  ;;  %v1059_v17 = vpop.permute.xlu2 %1058 }
 0x214   :  { %v1147_v62 = vsel %vm1130_vm6, %v4005_v0, %v1059_v17 }
 0x216   :  { %v1055_v8 = vpop.permute.xlu1 %1054  ;;  %v4270_v33 = vpop.f32.mrf.mxu3 }
 0x217   :  { %v1145_v2 = vsel %vm1130_vm6, %v3964_v61, %v1055_v8  ;;  %v1823_v61 = vld [vmem:[%s4926_s5 + $0xe0] sm:$0xff] }
 0x218   :  { %1332 = vmatmul.f32.gmra.mxu1 %v1145_v2  ;;  %1439 = vmatmul.f32.gmra.mxu2 %v1145_v2 }
 0x219   :  { %v4178_v54 = vpop.f32.mrf.mxu1  ;;  %2000 = vmatpush.msrb.mxu1 %v1823_v61 }
 0x21a   :  { %v419_v38 = vpop.permute.xlu0 %418 }
 0x21e   :  { %v310_v14 = vpop.permute.xlu1 %309  ;;  %v1061_v53 = vpop.permute.xlu2 %1060 }
 0x21f   :  { %v928_v44 = vpop.f32.mrf.mxu0  ;;  %v638_v20 = vsel %vm602_vm2, %v601_v13, %v310_v14  ;;  %v4196_v11 = vpop.f32.mrf.mxu2  ;;  %v1148_v0 = vsel %vm1130_vm6, %v4025_v52, %v1061_v53  ;;  %v1822_v52 = vld [vmem:[%s4926_s5 + $0xd8] sm:$0xff]  ;;  %v1820_v13 = vld [vmem:[%s4926_s5 + $0xc8] sm:$0xff]  ;;  %v4321_v53 = vld [vmem:[%s4925_s4] ss:$0 sm:$0xff] }
 0x220   :  { %v929_v6 = vadd.f32 %v3597_v63, %v928_v44  ;;  %1335 = vmatmul.f32.gmra.mxu1 %v1146_v45  ;;  %1442 = vmatmul.f32.gmra.mxu2 %v1146_v45  ;;  %v675_v63 = vsel %vm639_vm3, %v638_v20, %v419_v38  ;;  %v1532_v14 = vpop.f32.mrf.mxu3  ;;  %v1803_v45 = vld [vmem:[%s4926_s5 + $0x40] sm:$0xff] }
 0x221   :  { %2001 = vmatpush.msrb.mxu1 %v1822_v52  ;;  %1903 = vmatpush.msrb.mxu3 %v1803_v45 }
 0x222   :  { %v4189_v35 = vmax.f32 %v929_v6, 0.0  ;;  %v4198_v5 = vpop.f32.mrf.mxu1 }
 0x223   :  { %2002 = vmatpush.msrb.mxu1 %v1821_v24  ;;  %v1295_v52 = vadd.f32 %v4321_v53, %v4198_v5 }
 0x224   :  { %1076 = vrot.lane.b32.xlu1 %v4189_v35, %s3044_s24  ;;  %2911 = vmatmul.msk.f32.gmra.mxu3 %vm1130_vm6, %v4189_v35 }
 0x225   :  { %2003 = vmatpush.msrb.mxu1 %v1820_v13 }
 0x226   :  { %v528_v32 = vpop.permute.xlu1 %527 }
 0x227   :  { %v712_v39 = vsel %vm676_vm4, %v675_v63, %v528_v32 }
 0x228   :  { %1338 = vmatmul.f32.gmra.mxu1 %v1147_v62  ;;  %1445 = vmatmul.f32.gmra.mxu2 %v1147_v62  ;;  %v4216_v31 = vpop.f32.mrf.mxu2  ;;  %v4300_v20 = vpop.f32.mrf.mxu3  ;;  %v1819_v62 = vld [vmem:[%s4926_s5 + $0xc0] sm:$0xff] }
 0x229   :  { %2888 = vmatmul.msk.f32.gmra.mxu0 %vm720_vm5, %v712_v39  ;;  %2004 = vmatpush.msrb.mxu1 %v1819_v62 }
 0x22a   :  { %v4218_v3 = vpop.f32.mrf.mxu1 }
 0x230   :  { %v931_v30 = vpop.f32.mrf.mxu0  ;;  %1341 = vmatmul.f32.gmra.mxu1 %v1148_v0  ;;  %1448 = vmatmul.f32.gmra.mxu2 %v1148_v0  ;;  %v4316_v28 = vpop.f32.mrf.mxu3 }
 0x231   :  { %v932_v1 = vadd.f32 %v4223_v4, %v931_v30  ;;  %v4238_v47 = vpop.f32.mrf.mxu2  ;;  %v1802_v30 = vld [vmem:[%s4926_s5 + $0x38] sm:$0xff] }
 0x232   :  { %v4240_v26 = vpop.f32.mrf.mxu1  ;;  %1904 = vmatpush.msrb.mxu3 %v1802_v30 }
 0x233   :  { %v4226_v22 = vmax.f32 %v932_v1, 0.0  ;;  %v1830_v1 = vld [vmem:[%s4926_s5 + $0x118] sm:$0xff] }
 0x234   :  { %2110 = vmatpush.msrb.mxu2 %v1830_v1 }
 0x235   :  { %1078 = vrot.lane.b32.xlu2 %v4226_v22, %s3044_s24  ;;  %2912 = vmatmul.msk.f32.gmra.mxu3 %vm1130_vm6, %v4226_v22 }
 0x239   :  { %v934_v15 = vpop.f32.mrf.mxu0  ;;  %v4258_v41 = vpop.f32.mrf.mxu2 }
 0x23a   :  { %v935_v37 = vadd.f32 %v4223_v4, %v934_v15  ;;  %v4260_v34 = vpop.f32.mrf.mxu1 }
 0x23b   :  { %v1304_v30 = vadd.f32 %v4321_v53, %v4260_v34 }
 0x23c   :  { %v4242_v49 = vmax.f32 %v935_v37, 0.0 }
 0x23e   :  { %1080 = vrot.lane.b32.xlu0 %v4242_v49, %s3044_s24  ;;  %2913 = vmatmul.msk.f32.gmra.mxu3 %vm1130_vm6, %v4242_v49  ;;  %v1067_v8 = vpop.permute.xlu2 %1066 }
 0x23f   :  { %v1063_v16 = vpop.permute.xlu0 %1062  ;;  %v1151_v58 = vsel %vm1130_vm6, %v4072_v50, %v1067_v8 }
 0x240   :  { %v1149_v36 = vsel %vm1130_vm6, %v4044_v10, %v1063_v16 }
 0x241   :  { %1344 = vmatmul.f32.gmra.mxu1 %v1149_v36  ;;  %1451 = vmatmul.f32.gmra.mxu2 %v1149_v36  ;;  %v4279_v57 = vpop.f32.mrf.mxu2 }
 0x248   :  { %v937_v27 = vpop.f32.mrf.mxu0  ;;  %v1065_v10 = vpop.permute.xlu1 %1064 }
 0x249   :  { %v938_v51 = vadd.f32 %v4223_v4, %v937_v27  ;;  %v1150_v9 = vsel %vm1130_vm6, %v4058_v40, %v1065_v10  ;;  %v1306_v40 = vpop.f32.mrf.mxu1  ;;  %v1419_v50 = vpop.f32.mrf.mxu2  ;;  %v1818_v27 = vld [vmem:[%s4926_s5 + $0xb8] sm:$0xff] }
 0x24a   :  { %1347 = vmatmul.f32.gmra.mxu1 %v1150_v9  ;;  %1454 = vmatmul.f32.gmra.mxu2 %v1150_v9  ;;  %v1307_v46 = vadd.f32 %v4321_v53, %v1306_v40  ;;  %v1801_v40 = vld [vmem:[%s4926_s5 + $0x30] sm:$0xff] }
 0x24b   :  { %v4268_v42 = vmax.f32 %v938_v51, 0.0  ;;  %2005 = vmatpush.msrb.mxu1 %v1818_v27  ;;  %1905 = vmatpush.msrb.mxu3 %v1801_v40 }
 0x24c   :  { %v1420_v51 = vadd.f32 %v1419_v50, %v1307_v46 }
 0x24d   :  { %1082 = vrot.lane.b32.xlu1 %v4268_v42, %s3044_s24  ;;  %2914 = vmatmul.msk.f32.gmra.mxu3 %vm1130_vm6, %v4268_v42 }
 0x251   :  { %v4293_v44 = vpop.f32.mrf.mxu1  ;;  %v4303_v63 = vpop.f32.mrf.mxu2 }
 0x252   :  { %v940_v2 = vpop.f32.mrf.mxu0  ;;  %1350 = vmatmul.f32.gmra.mxu1 %v1151_v58  ;;  %1457 = vmatmul.f32.gmra.mxu2 %v1151_v58  ;;  %v1533_v58 = vadd.f32 %v1532_v14, %v1420_v51 }
 0x253   :  { %v941_v12 = vadd.f32 %v4223_v4, %v940_v2 }
 0x255   :  { %v4284_v48 = vmax.f32 %v941_v12, 0.0 }
 0x257   :  { %1084 = vrot.lane.b32.xlu2 %v4284_v48, %s3044_s24  ;;  %2915 = vmatmul.msk.f32.gmra.mxu3 %vm1130_vm6, %v4284_v48 }
 0x259   :  { %v4305_v32 = vpop.f32.mrf.mxu1  ;;  %v4335_v37 = vpop.f32.mrf.mxu2 }
 0x25e   :  { %v1073_v36 = vpop.permute.xlu2 %1072 }
 0x25f   :  { %v1069_v6 = vpop.permute.xlu0 %1068  ;;  %v1154_v24 = vsel %vm1130_vm6, %v4124_v19, %v1073_v36  ;;  %v1298_v19 = vadd.f32 %v4321_v53, %v4218_v3 }
 0x260   :  { %v1152_v61 = vsel %vm1130_vm6, %v4086_v56, %v1069_v6 }
 0x261   :  { %v943_v38 = vpop.f32.mrf.mxu0  ;;  %1353 = vmatmul.f32.gmra.mxu1 %v1152_v61  ;;  %1460 = vmatmul.f32.gmra.mxu2 %v1152_v61  ;;  %v1315_v23 = vpop.f32.mrf.mxu1  ;;  %v1411_v12 = vadd.f32 %v4238_v47, %v1298_v19 }
 0x262   :  { %v944_v17 = vadd.f32 %v4223_v4, %v943_v38  ;;  %v1316_v13 = vadd.f32 %v4321_v53, %v1315_v23  ;;  %v1817_v38 = vld [vmem:[%s4926_s5 + $0xb0] sm:$0xff] }
 0x263   :  { %v4375_v61 = vadd.f32 %v4235_v43, %v1411_v12  ;;  %2006 = vmatpush.msrb.mxu1 %v1817_v38 }
 0x264   :  { %v4310_v39 = vmax.f32 %v944_v17, 0.0 }
 0x266   :  { %1086 = vrot.lane.b32.xlu0 %v4310_v39, %s3044_s24  ;;  %2916 = vmatmul.msk.f32.gmra.mxu3 %vm1130_vm6, %v4310_v39 }
 0x268   :  { %v1071_v56 = vpop.permute.xlu1 %1070  ;;  %v1428_v9 = vpop.f32.mrf.mxu2 }
 0x269   :  { %v1153_v25 = vsel %vm1130_vm6, %v4104_v21, %v1071_v56  ;;  %v1408_v21 = vadd.f32 %v4216_v31, %v1295_v52  ;;  %v1541_v31 = vpop.f32.mrf.mxu3  ;;  %v1318_v60 = vpop.f32.mrf.mxu1  ;;  %v1429_v6 = vadd.f32 %v1428_v9, %v1316_v13  ;;  %v1615_v56 = vmax.f32 %v4375_v61, 0.0 }
 0x26a   :  { %v946_v0 = vpop.f32.mrf.mxu0  ;;  %1356 = vmatmul.f32.gmra.mxu1 %v1153_v25  ;;  %1463 = vmatmul.f32.gmra.mxu2 %v1153_v25  ;;  %v1310_v25 = vadd.f32 %v4321_v53, %v4293_v44 }
 0x26b   :  { %v947_v15 = vadd.f32 %v4223_v4, %v946_v0  ;;  %v4344_v5 = vadd.f32 %v4214_v29, %v1408_v21  ;;  %v1301_v29 = vadd.f32 %v4321_v53, %v4240_v26  ;;  %v1542_v17 = vadd.f32 %v1541_v31, %v1429_v6 }
 0x26c   :  { %v1417_v21 = vadd.f32 %v4279_v57, %v1304_v30  ;;  %v1313_v31 = vadd.f32 %v4321_v53, %v4305_v32 }
 0x26d   :  { %v4337_v16 = vmax.f32 %v947_v15, 0.0  ;;  %v1614_v10 = vmax.f32 %v4344_v5, 0.0  ;;  %v1414_v8 = vadd.f32 %v4258_v41, %v1301_v29  ;;  %v4372_v41 = vmax.f32 %v1533_v58, 0.0 }
 0x26e   :  { %v4401_v23 = vmax.f32 %v1542_v17, 0.0  ;;  %v1530_v57 = vadd.f32 %v4270_v33, %v1417_v21 }
 0x26f   :  { %1088 = vrot.lane.b32.xlu1 %v4337_v16, %s3044_s24  ;;  %2917 = vmatmul.msk.f32.gmra.mxu3 %vm1130_vm6, %v4337_v16  ;;  %v4368_v50 = vadd.f32 %v4253_v18, %v1414_v8  ;;  %v1829_v8 = vld [vmem:[%s4926_s5 + $0x110] sm:$0xff] }
 0x270   :  { %v4418_v9 = vmax.f32 %v1530_v57, 0.0  ;;  %2111 = vmatpush.msrb.mxu2 %v1829_v8 }
 0x271   :  { %v1544_v3 = vpop.f32.mrf.mxu3  ;;  %v1431_v47 = vpop.f32.mrf.mxu2  ;;  %v1616_v18 = vmax.f32 %v4368_v50, 0.0 }
 0x272   :  { %1359 = vmatmul.f32.gmra.mxu1 %v1154_v24  ;;  %1466 = vmatmul.f32.gmra.mxu2 %v1154_v24  ;;  %v1321_v43 = vpop.f32.mrf.mxu1  ;;  %v1319_v24 = vadd.f32 %v4321_v53, %v1318_v60 }
 0x273   :  { %v2986_v52 = vpack.i.bf16 %v1616_v18, %v1615_v56 }
 0x274   :  { %v1432_v51 = vadd.f32 %v1431_v47, %v1319_v24  ;;  %v1798_v24 = vld [vmem:[%s4926_s5 + $0x18] sm:$0xff] }
 0x276   :  { %v1545_v60 = vadd.f32 %v1544_v3, %v1432_v51 }
 0x277   :  { %1673 = vrot.lane.b32.xlu1 %v1614_v10, %s3044_s24 }
 0x278   :  { %v4434_v12 = vmax.f32 %v1545_v60, 0.0 }
 0x279   :  { %v949_v2 = vpop.f32.mrf.mxu0  ;;  %v1547_v15 = vpop.f32.mrf.mxu3 }
 0x27a   :  { %v950_v26 = vadd.f32 %v4223_v4, %v949_v2  ;;  %v1324_v46 = vpop.f32.mrf.mxu1  ;;  %v1322_v2 = vadd.f32 %v4321_v53, %v1321_v43 }
 0x27b   :  { %v1325_v29 = vadd.f32 %v4321_v53, %v1324_v46 }
 0x27c   :  { %v4370_v45 = vmax.f32 %v950_v26, 0.0 }
 0x27e   :  { %1124 = vrot.lane.b32.xlu2 %v4370_v45, %s3044_s24  ;;  %2918 = vmatmul.msk.f32.gmra.mxu3 %vm1130_vm6, %v4370_v45  ;;  %v1434_v36 = vpop.f32.mrf.mxu2 }
 0x27f   :  { %1681 = vrot.lane.b32.xlu1 %v4372_v41, %s3044_s24  ;;  %v1435_v6 = vadd.f32 %v1434_v36, %v1322_v2 }
 0x280   :  { %v1075_v14 = vpop.permute.xlu0 %1074 }
 0x281   :  { %v1155_v62 = vsel %vm1130_vm6, %v4143_v7, %v1075_v14  ;;  %v1423_v7 = vadd.f32 %v4303_v63, %v1310_v25  ;;  %v1800_v63 = vld [vmem:[%s4926_s5 + $0x28] sm:$0xff]  ;;  %v1550_v33 = vpop.f32.mrf.mxu3  ;;  %v1799_v14 = vld [vmem:[%s4926_s5 + $0x20] sm:$0xff]  ;;  %v1548_v17 = vadd.f32 %v1547_v15, %v1435_v6 }
 0x282   :  { %v952_v0 = vpop.f32.mrf.mxu0  ;;  %1362 = vmatmul.f32.gmra.mxu1 %v1155_v62  ;;  %1469 = vmatmul.f32.gmra.mxu2 %v1155_v62  ;;  %v1327_v3 = vpop.f32.mrf.mxu1 }
 0x283   :  { %v953_v1 = vadd.f32 %v4223_v4, %v952_v0  ;;  %v1536_v34 = vadd.f32 %v4300_v20, %v1423_v7  ;;  %1906 = vmatpush.msrb.mxu3 %v1800_v63  ;;  %v1426_v20 = vadd.f32 %v4335_v37, %v1313_v31  ;;  %v1816_v37 = vld [vmem:[%s4926_s5 + $0xa8] sm:$0xff]  ;;  %v1328_v43 = vadd.f32 %v4321_v53, %v1327_v3  ;;  %v1815_v7 = vld [vmem:[%s4926_s5 + $0xa0] sm:$0xff] }
 0x284   :  { %2007 = vmatpush.msrb.mxu1 %v1816_v37  ;;  %v4452_v30 = vmax.f32 %v1548_v17, 0.0 }
 0x285   :  { %v992_v44 = vmax.f32 %v953_v1, 0.0  ;;  %v4416_v27 = vmax.f32 %v1536_v34, 0.0  ;;  %v1539_v40 = vadd.f32 %v4316_v28, %v1426_v20  ;;  %1907 = vmatpush.msrb.mxu3 %v1799_v14  ;;  %v1828_v20 = vld [vmem:[%s4926_s5 + $0x108] sm:$0xff] }
 0x286   :  { %2987 = vrot.lane.b32.xlu2 %v2986_v52, %s3044_s24  ;;  %2008 = vmatpush.msrb.mxu1 %v1815_v7 }
 0x287   :  { %1126 = vrot.lane.b32.xlu0 %v992_v44, %s3044_s24  ;;  %1687 = vrot.lane.b32.xlu1 %v4401_v23, %s3044_s24  ;;  %v4438_v13 = vmax.f32 %v1539_v40, 0.0  ;;  %v1814_v40 = vld [vmem:[%s4926_s5 + $0x98] sm:$0xff] }
 0x288   :  { %2919 = vmatmul.msk.f32.gmra.mxu3 %vm1130_vm6, %v992_v44  ;;  %2112 = vmatpush.msrb.mxu2 %v1828_v20 }
 0x289   :  { %v1553_v38 = vpop.f32.mrf.mxu3  ;;  %1908 = vmatpush.msrb.mxu3 %v1798_v24  ;;  %2009 = vmatpush.msrb.mxu1 %v1814_v40  ;;  %v1827_v24 = vld [vmem:[%s4926_s5 + $0x100] sm:$0xff] }
 0x28a   :  { %v1330_v1 = vpop.f32.mrf.mxu1  ;;  %2113 = vmatpush.msrb.mxu2 %v1827_v24 }
 0x28b   :  { %v1331_v44 = vadd.f32 %v4321_v53, %v1330_v1 }
 0x28e   :  { %1683 = vrot.lane.b32.xlu2 %v4416_v27, %s3044_s24 }
 0x28f   :  { %v1437_v19 = vpop.f32.mrf.mxu2  ;;  %1679 = vrot.lane.b32.xlu0 %v4418_v9, %s3044_s24  ;;  %v1079_v25 = vpop.permute.xlu2 %1078 }
 0x290   :  { %v1438_v32 = vadd.f32 %v1437_v19, %v1325_v29 }
 0x291   :  { %v1556_v21 = vpop.f32.mrf.mxu3 }
 0x292   :  { %v1551_v58 = vadd.f32 %v1550_v33, %v1438_v32 }
 0x294   :  { %v4436_v26 = vmax.f32 %v1551_v58, 0.0 }
 0x295   :  { %v1333_v63 = vpop.f32.mrf.mxu1 }
 0x296   :  { %1689 = vrot.lane.b32.xlu2 %v4434_v12, %s3044_s24  ;;  %1693 = vrot.lane.b32.xlu1 %v4436_v26, %s3044_s24  ;;  %v1077_v28 = vpop.permute.xlu1 %1076  ;;  %v1334_v31 = vadd.f32 %v4321_v53, %v1333_v63  ;;  %v1795_v63 = vld [vmem:[%s4926_s5] sm:$0xff] }
 0x297   :  { %1685 = vrot.lane.b32.xlu0 %v4438_v13, %s3044_s24  ;;  %v1156_v47 = vsel %vm1130_vm6, %v4158_v55, %v1077_v28  ;;  %v1157_v55 = vsel %vm1130_vm6, %v4189_v35, %v1079_v25  ;;  %v1813_v25 = vld [vmem:[%s4926_s5 + $0x90] sm:$0xff] }
 0x298   :  { %1365 = vmatmul.f32.gmra.mxu1 %v1156_v47  ;;  %1472 = vmatmul.f32.gmra.mxu2 %v1156_v47 }
 0x299   :  { %v1559_v46 = vpop.f32.mrf.mxu3  ;;  %2010 = vmatpush.msrb.mxu1 %v1813_v25 }
 0x29b   :  { %v1440_v62 = vpop.f32.mrf.mxu2 }
 0x29c   :  { %v1441_v0 = vadd.f32 %v1440_v62, %v1328_v43 }
 0x29d   :  { %v1336_v19 = vpop.f32.mrf.mxu1 }
 0x29e   :  { %v1554_v52 = vadd.f32 %v1553_v38, %v1441_v0  ;;  %v1337_v37 = vadd.f32 %v4321_v53, %v1336_v19 }
 0x29f   :  { %1691 = vrot.lane.b32.xlu0 %v4452_v30, %s3044_s24 }
 0x2a0   :  { %v4461_v15 = vmax.f32 %v1554_v52, 0.0  ;;  %1368 = vmatmul.f32.gmra.mxu1 %v1157_v55  ;;  %1475 = vmatmul.f32.gmra.mxu2 %v1157_v55 }
 0x2a1   :  { %v1562_v3 = vpop.f32.mrf.mxu3 }
 0x2a2   :  { %1695 = vrot.lane.b32.xlu2 %v4461_v15, %s3044_s24 }
 0x2a3   :  { %v1443_v36 = vpop.f32.mrf.mxu2 }
 0x2a4   :  { %v1444_v34 = vadd.f32 %v1443_v36, %v1331_v44 }
 0x2a5   :  { %v1339_v38 = vpop.f32.mrf.mxu1 }
 0x2a6   :  { %v1557_v57 = vadd.f32 %v1556_v21, %v1444_v34  ;;  %v955_v47 = vpop.f32.mrf.mxu0  ;;  %v1340_v1 = vadd.f32 %v4321_v53, %v1339_v38  ;;  %v1812_v21 = vld [vmem:[%s4926_s5 + $0x88] sm:$0xff] }
 0x2a7   :  { %v956_v14 = vadd.f32 %v4223_v4, %v955_v47  ;;  %2011 = vmatpush.msrb.mxu1 %v1812_v21 }
 0x2a8   :  { %v4466_v35 = vmax.f32 %v1557_v57, 0.0  ;;  %v1811_v57 = vld [vmem:[%s4926_s5 + $0x80] sm:$0xff] }
 0x2a9   :  { %v993_v43 = vmax.f32 %v956_v14, 0.0  ;;  %v1565_v0 = vpop.f32.mrf.mxu3  ;;  %2012 = vmatpush.msrb.mxu1 %v1811_v57 }
 0x2aa   :  { %1697 = vrot.lane.b32.xlu0 %v4466_v35, %s3044_s24 }
 0x2ab   :  { %v1446_v51 = vpop.f32.mrf.mxu2  ;;  %2920 = vmatmul.msk.f32.gmra.mxu3 %vm1130_vm6, %v993_v43 }
 0x2ac   :  { %v1447_v29 = vadd.f32 %v1446_v51, %v1334_v31 }
 0x2ad   :  { %v1342_v36 = vpop.f32.mrf.mxu1 }
 0x2ae   :  { %v1560_v33 = vadd.f32 %v1559_v46, %v1447_v29 }
 0x2b0   :  { %v4477_v60 = vmax.f32 %v1560_v33, 0.0  ;;  %v1081_v32 = vpop.permute.xlu0 %1080 }
 0x2b1   :  { %v1158_v8 = vsel %vm1130_vm6, %v4226_v22, %v1081_v32  ;;  %v1797_v22 = vld [vmem:[%s4926_s5 + $0x10] sm:$0xff]  ;;  %v1085_v4 = vpop.permute.xlu2 %1084  ;;  %v1568_v31 = vpop.f32.mrf.mxu3 }
 0x2b2   :  { %1371 = vmatmul.f32.gmra.mxu1 %v1158_v8  ;;  %1478 = vmatmul.f32.gmra.mxu2 %v1158_v8  ;;  %v1160_v44 = vsel %vm1130_vm6, %v4268_v42, %v1085_v4  ;;  %v1343_v42 = vadd.f32 %v4321_v53, %v1342_v36 }
 0x2b3   :  { %1699 = vrot.lane.b32.xlu1 %v4477_v60, %s3044_s24  ;;  %v1449_v58 = vpop.f32.mrf.mxu2  ;;  %1909 = vmatpush.msrb.mxu3 %v1797_v22  ;;  %v1292_v22 = vadd.f32 %v4321_v53, %v4178_v54 }
 0x2b4   :  { %v1450_v2 = vadd.f32 %v1449_v58, %v1337_v37 }
 0x2b5   :  { %v1405_v14 = vadd.f32 %v4196_v11, %v1292_v22 }
 0x2b6   :  { %v1563_v6 = vadd.f32 %v1562_v3, %v1450_v2 }
 0x2b8   :  { %v4487_v28 = vmax.f32 %v1563_v6, 0.0 }
 0x2b9   :  { %v1571_v37 = vpop.f32.mrf.mxu3 }
 0x2ba   :  { %1701 = vrot.lane.b32.xlu2 %v4487_v28, %s3044_s24 }
 0x2be   :  { %v1345_v29 = vpop.f32.mrf.mxu1 }
 0x2bf   :  { %v1083_v17 = vpop.permute.xlu1 %1082  ;;  %v1346_v19 = vadd.f32 %v4321_v53, %v1345_v29 }
 0x2c0   :  { %v1159_v62 = vsel %vm1130_vm6, %v4242_v49, %v1083_v17  ;;  %v1796_v49 = vld [vmem:[%s4926_s5 + $0x8] sm:$0xff] }
 0x2c1   :  { %1374 = vmatmul.f32.gmra.mxu1 %v1159_v62  ;;  %1481 = vmatmul.f32.gmra.mxu2 %v1159_v62  ;;  %v1574_v43 = vpop.f32.mrf.mxu3  ;;  %v1518_v62 = vadd.f32 %v4203_v59, %v1405_v14 }
 0x2c2   :  { %1910 = vmatpush.msrb.mxu3 %v1796_v49 }
 0x2c3   :  { %v1613_v54 = vmax.f32 %v1518_v62, 0.0 }
 0x2c4   :  { %v1452_v52 = vpop.f32.mrf.mxu2  ;;  %1911 = vmatpush.msrb.mxu3 %v1795_v63 }
 0x2c5   :  { %v1453_v55 = vadd.f32 %v1452_v52, %v1340_v1 }
 0x2c7   :  { %v1566_v7 = vadd.f32 %v1565_v0, %v1453_v55  ;;  %v1348_v47 = vpop.f32.mrf.mxu1 }
 0x2c9   :  { %v4510_v34 = vmax.f32 %v1566_v7, 0.0  ;;  %1377 = vmatmul.f32.gmra.mxu1 %v1160_v44  ;;  %1484 = vmatmul.f32.gmra.mxu2 %v1160_v44  ;;  %v1577_v44 = vpop.f32.mrf.mxu3 }
 0x2cb   :  { %1703 = vrot.lane.b32.xlu0 %v4510_v34, %s3044_s24 }
 0x2cd   :  { %v1455_v46 = vpop.f32.mrf.mxu2 }
 0x2ce   :  { %v1456_v51 = vadd.f32 %v1455_v46, %v1343_v42 }
 0x2cf   :  { %v1351_v55 = vpop.f32.mrf.mxu1 }
 0x2d0   :  { %v1569_v20 = vadd.f32 %v1568_v31, %v1456_v51  ;;  %v1352_v21 = vadd.f32 %v4321_v53, %v1351_v55 }
 0x2d1   :  { %v1580_v51 = vpop.f32.mrf.mxu3 }
 0x2d2   :  { %v4524_v33 = vmax.f32 %v1569_v20, 0.0 }
 0x2d4   :  { %1705 = vrot.lane.b32.xlu1 %v4524_v33, %s3044_s24 }
 0x2d5   :  { %v1458_v32 = vpop.f32.mrf.mxu2 }
 0x2d6   :  { %v1459_v8 = vadd.f32 %v1458_v32, %v1346_v19 }
 0x2d8   :  { %v1572_v40 = vadd.f32 %v1571_v37, %v1459_v8  ;;  %v1087_v58 = vpop.permute.xlu0 %1086  ;;  %v1125_v6 = vpop.permute.xlu2 %1124 }
 0x2d9   :  { %v1161_v2 = vsel %vm1130_vm6, %v4284_v48, %v1087_v58  ;;  %v1349_v48 = vadd.f32 %v4321_v53, %v1348_v47  ;;  %v1583_v58 = vpop.f32.mrf.mxu3 }
 0x2da   :  { %v4531_v3 = vmax.f32 %v1572_v40, 0.0  ;;  %1380 = vmatmul.f32.gmra.mxu1 %v1161_v2  ;;  %1487 = vmatmul.f32.gmra.mxu2 %v1161_v2 }
 0x2dc   :  { %1707 = vrot.lane.b32.xlu2 %v4531_v3, %s3044_s24 }
 0x2de   :  { %v1354_v24 = vpop.f32.mrf.mxu1 }
 0x2df   :  { %v1355_v61 = vadd.f32 %v4321_v53, %v1354_v24 }
 0x2e0   :  { %v2988_v25 = vpop.permute.xlu2 %2987 }
 0x2e1   :  { %v1089_v38 = vpop.permute.xlu1 %1088  ;;  %v2990_v52 = vunpack.i.h.bf16 %v2988_v25  ;;  %v2989_v63 = vunpack.i.l.bf16 %v2988_v25 }
 0x2e2   :  { %v1162_v17 = vsel %vm1130_vm6, %v4310_v39, %v1089_v38  ;;  %v1163_v39 = vsel %vm1130_vm6, %v4337_v16, %v1125_v6 }
 0x2e3   :  { %1383 = vmatmul.f32.gmra.mxu1 %v1162_v17  ;;  %1490 = vmatmul.f32.gmra.mxu2 %v1162_v17  ;;  %v1767_v59 = vsel %vm1130_vm6, %v1615_v56, %v2990_v52  ;;  %v1766_v16 = vsel %vm1130_vm6, %v1614_v10, %v2989_v63 }
 0x2e4   :  { %v1461_v0 = vpop.f32.mrf.mxu2 }
 0x2e5   :  { %v1462_v1 = vadd.f32 %v1461_v0, %v1349_v48 }
 0x2e7   :  { %v1575_v4 = vadd.f32 %v1574_v43, %v1462_v1  ;;  %v1357_v5 = vpop.f32.mrf.mxu1  ;;  %v1586_v43 = vpop.f32.mrf.mxu3 }
 0x2e8   :  { %v1358_v37 = vadd.f32 %v4321_v53, %v1357_v5  ;;  %v1684_v50 = vpop.permute.xlu2 %1683 }
 0x2e9   :  { %v4542_v7 = vmax.f32 %v1575_v4, 0.0  ;;  %v1674_v11 = vpop.permute.xlu1 %1673 }
 0x2ea   :  { %v1765_v49 = vsel %vm1130_vm6, %v1613_v54, %v1674_v11 }
 0x2eb   :  { %1493 = vmatmul.f32.gmra.mxu2 %v1163_v39  ;;  %1912 = vmatmul.f32.vlgmr.msrb.gmra.mxu3 %v1765_v49 }
 0x2ec   :  { %2013 = vmatmul.f32.vlgmr.msrb.gmra.mxu1 %v1767_v59  ;;  %1709 = vrot.lane.b32.xlu0 %v4542_v7, %s3044_s24 }
 0x2ed   :  { %v1464_v36 = vpop.f32.mrf.mxu2 }
 0x2ee   :  { %v1465_v57 = vadd.f32 %v1464_v36, %v1352_v21 }
 0x2ef   :  { %v1360_v14 = vpop.f32.mrf.mxu1  ;;  %v1589_v55 = vpop.f32.mrf.mxu3 }
 0x2f0   :  { %v1578_v42 = vadd.f32 %v1577_v44, %v1465_v57  ;;  %v1690_v49 = vpop.permute.xlu2 %1689 }
 0x2f1   :  { %v1682_v2 = vpop.permute.xlu1 %1681 }
 0x2f2   :  { %v4553_v31 = vmax.f32 %v1578_v42, 0.0  ;;  %v1769_v47 = vsel %vm1130_vm6, %v4418_v9, %v1682_v2 }
 0x2f3   :  { %1915 = vmatmul.f32.gmra.mxu3 %v1766_v16 }
 0x2f4   :  { %1711 = vrot.lane.b32.xlu1 %v4553_v31, %s3044_s24 }
 0x2f5   :  { %v1467_v56 = vpop.f32.mrf.mxu2 }
 0x2f6   :  { %v1468_v46 = vadd.f32 %v1467_v56, %v1355_v61  ;;  %v2312_v61 = vld [vmem:[#allocation2 + $0x78] sm:$0xff] }
 0x2f7   :  { %2525 = vmatpush.msrb.mxu0 %v2312_v61  ;;  %v2309_v61 = vld [vmem:[#allocation2 + $0x60] sm:$0xff] }
 0x2f8   :  { %v1581_v20 = vadd.f32 %v1580_v51, %v1468_v46 }
 0x2f9   :  { %v1127_v29 = vpop.permute.xlu0 %1126  ;;  %v1688_v25 = vpop.permute.xlu1 %1687 }
 0x2fa   :  { %v4561_v19 = vmax.f32 %v1581_v20, 0.0  ;;  %v1164_v32 = vsel %vm1130_vm6, %v4370_v45, %v1127_v29 }
 0x2fb   :  { %1496 = vmatmul.f32.gmra.mxu2 %v1164_v32  ;;  %1918 = vmatmul.f32.gmra.mxu3 %v1767_v59  ;;  %v1773_v59 = vsel %vm1130_vm6, %v4401_v23, %v1690_v49 }
 0x2fc   :  { %1713 = vrot.lane.b32.xlu2 %v4561_v19, %s3044_s24 }
 0x2ff   :  { %v1363_v0 = vpop.f32.mrf.mxu1 }
 0x300   :  { %v1364_v52 = vadd.f32 %v4321_v53, %v1363_v0 }
 0x301   :  { %v1680_v10 = vpop.permute.xlu0 %1679 }
 0x302   :  { %v1768_v8 = vsel %vm1130_vm6, %v1616_v18, %v1680_v10  ;;  %v1770_v18 = vsel %vm1130_vm6, %v4372_v41, %v1684_v50 }
 0x303   :  { %1921 = vmatmul.f32.gmra.mxu3 %v1768_v8  ;;  %2016 = vmatmul.f32.gmra.mxu1 %v1768_v8 }
 0x304   :  { %2921 = vmatmul.msk.f32.vlgmr.msrb.gmra.mxu2 %vm1130_vm6, %v4418_v9  ;;  %v1361_v9 = vadd.f32 %v4321_v53, %v1360_v14 }
 0x305   :  { %v1470_v40 = vpop.f32.mrf.mxu2 }
 0x306   :  { %v1471_v45 = vadd.f32 %v1470_v40, %v1358_v37 }
 0x308   :  { %v1584_v6 = vadd.f32 %v1583_v58, %v1471_v45  ;;  %v1694_v42 = vpop.permute.xlu1 %1693 }
 0x309   :  { %v1686_v38 = vpop.permute.xlu0 %1685  ;;  %v1775_v46 = vsel %vm1130_vm6, %v4452_v30, %v1694_v42 }
 0x30a   :  { %v4573_v22 = vmax.f32 %v1584_v6, 0.0  ;;  %v1771_v17 = vsel %vm1130_vm6, %v4416_v27, %v1686_v38  ;;  %v2311_v6 = vld [vmem:[#allocation2 + $0x70] sm:$0xff] }
 0x30b   :  { %1924 = vmatmul.f32.gmra.mxu3 %v1769_v47  ;;  %2019 = vmatmul.f32.gmra.mxu1 %v1769_v47 }
 0x30c   :  { %2922 = vmatmul.msk.f32.gmra.mxu2 %vm1130_vm6, %v4372_v41  ;;  %1715 = vrot.lane.b32.xlu0 %v4573_v22, %s3044_s24 }
 0x30d   :  { %2526 = vmatpush.msrb.mxu0 %v2311_v6  ;;  %v4699_v6 = vld [vmem:[%s4927_s6] ss:$0 sm:$0xff] }
 0x311   :  { %v1692_v21 = vpop.permute.xlu0 %1691 }
 0x312   :  { %v1774_v36 = vsel %vm1130_vm6, %v4434_v12, %v1692_v21 }
 0x313   :  { %1927 = vmatmul.f32.gmra.mxu3 %v1770_v18  ;;  %2022 = vmatmul.f32.gmra.mxu1 %v1770_v18 }
 0x314   :  { %2923 = vmatmul.msk.f32.gmra.mxu2 %vm1130_vm6, %v4416_v27  ;;  %v1772_v27 = vsel %vm1130_vm6, %v4438_v13, %v1688_v25 }
 0x315   :  { %v1366_v44 = vpop.f32.mrf.mxu1 }
 0x316   :  { %v1367_v63 = vadd.f32 %v4321_v53, %v1366_v44 }
 0x31b   :  { %1930 = vmatmul.f32.gmra.mxu3 %v1771_v17  ;;  %2025 = vmatmul.f32.gmra.mxu1 %v1771_v17  ;;  %v1473_v48 = vpop.f32.mrf.mxu2 }
 0x31c   :  { %2924 = vmatmul.msk.f32.gmra.mxu2 %vm1130_vm6, %v4438_v13  ;;  %v1474_v41 = vadd.f32 %v1473_v48, %v1361_v9  ;;  %v1592_v13 = vpop.f32.mrf.mxu3  ;;  %v1698_v10 = vpop.permute.xlu0 %1697 }
 0x31d   :  { %v1369_v20 = vpop.f32.mrf.mxu1  ;;  %v1777_v58 = vsel %vm1130_vm6, %v4461_v15, %v1698_v10 }
 0x31e   :  { %v1587_v62 = vadd.f32 %v1586_v43, %v1474_v41  ;;  %v1370_v32 = vadd.f32 %v4321_v53, %v1369_v20 }
 0x320   :  { %v4590_v1 = vmax.f32 %v1587_v62, 0.0 }
 0x322   :  { %1717 = vrot.lane.b32.xlu1 %v4590_v1, %s3044_s24 }
 0x323   :  { %1933 = vmatmul.f32.gmra.mxu3 %v1772_v27  ;;  %2028 = vmatmul.f32.gmra.mxu1 %v1772_v27  ;;  %v1476_v4 = vpop.f32.mrf.mxu2 }
 0x324   :  { %2925 = vmatmul.msk.f32.gmra.mxu2 %vm1130_vm6, %v4401_v23  ;;  %v1477_v54 = vadd.f32 %v1476_v4, %v1364_v52  ;;  %v1595_v24 = vpop.f32.mrf.mxu3 }
 0x325   :  { %v1700_v50 = vpop.permute.xlu1 %1699 }
 0x326   :  { %v1590_v11 = vadd.f32 %v1589_v55, %v1477_v54  ;;  %v1778_v9 = vsel %vm1130_vm6, %v4466_v35, %v1700_v50 }
 0x328   :  { %v4599_v39 = vmax.f32 %v1590_v11, 0.0 }
 0x32a   :  { %1719 = vrot.lane.b32.xlu2 %v4599_v39, %s3044_s24 }
 0x32b   :  { %1936 = vmatmul.f32.gmra.mxu3 %v1773_v59  ;;  %2031 = vmatmul.f32.gmra.mxu1 %v1773_v59 }
 0x32c   :  { %2926 = vmatmul.msk.f32.gmra.mxu2 %vm1130_vm6, %v4434_v12  ;;  %v1696_v12 = vpop.permute.xlu2 %1695  ;;  %v1598_v51 = vpop.f32.mrf.mxu3 }
 0x32d   :  { %v1776_v29 = vsel %vm1130_vm6, %v4436_v26, %v1696_v12 }
 0x32f   :  { %v1372_v37 = vpop.f32.mrf.mxu1 }
 0x333   :  { %1939 = vmatmul.f32.gmra.mxu3 %v1774_v36  ;;  %2034 = vmatmul.f32.gmra.mxu1 %v1774_v36 }
 0x334   :  { %2927 = vmatmul.msk.f32.gmra.mxu2 %vm1130_vm6, %v4452_v30  ;;  %v1601_v45 = vpop.f32.mrf.mxu3  ;;  %v1702_v17 = vpop.permute.xlu2 %1701 }
 0x335   :  { %v1479_v57 = vpop.f32.mrf.mxu2  ;;  %v1779_v43 = vsel %vm1130_vm6, %v4477_v60, %v1702_v17 }
 0x336   :  { %v1480_v23 = vadd.f32 %v1479_v57, %v1367_v63 }
 0x338   :  { %v1593_v16 = vadd.f32 %v1592_v13, %v1480_v23 }
 0x33a   :  { %v4612_v56 = vmax.f32 %v1593_v16, 0.0 }
 0x33b   :  { %1942 = vmatmul.f32.gmra.mxu3 %v1775_v46  ;;  %2037 = vmatmul.f32.gmra.mxu1 %v1775_v46 }
 0x33c   :  { %2928 = vmatmul.msk.f32.gmra.mxu2 %vm1130_vm6, %v4436_v26  ;;  %1721 = vrot.lane.b32.xlu0 %v4612_v56, %s3044_s24  ;;  %v1373_v26 = vadd.f32 %v4321_v53, %v1372_v37  ;;  %v1708_v42 = vpop.permute.xlu2 %1707 }
 0x33d   :  { %v1704_v0 = vpop.permute.xlu0 %1703 }
 0x33e   :  { %v1375_v14 = vpop.f32.mrf.mxu1  ;;  %v1780_v4 = vsel %vm1130_vm6, %v4487_v28, %v1704_v0 }
 0x33f   :  { %v1376_v62 = vadd.f32 %v4321_v53, %v1375_v14 }
 0x343   :  { %1945 = vmatmul.f32.gmra.mxu3 %v1776_v29  ;;  %2040 = vmatmul.f32.gmra.mxu1 %v1776_v29 }
 0x344   :  { %2929 = vmatmul.msk.f32.gmra.mxu2 %vm1130_vm6, %v4461_v15  ;;  %v1482_v30 = vpop.f32.mrf.mxu2  ;;  %v1604_v15 = vpop.f32.mrf.mxu3 }
 0x345   :  { %v1483_v5 = vadd.f32 %v1482_v30, %v1370_v32 }
 0x346   :  { %v1378_v48 = vpop.f32.mrf.mxu1  ;;  %v1706_v59 = vpop.permute.xlu1 %1705 }
 0x347   :  { %v1596_v8 = vadd.f32 %v1595_v24, %v1483_v5  ;;  %v1379_v11 = vadd.f32 %v4321_v53, %v1378_v48 }
 0x349   :  { %v4625_v40 = vmax.f32 %v1596_v8, 0.0 }
 0x34b   :  { %1948 = vmatmul.f32.gmra.mxu3 %v1777_v58  ;;  %2043 = vmatmul.f32.gmra.mxu1 %v1777_v58  ;;  %v2308_v58 = vld [vmem:[#allocation2 + $0x58] sm:$0xff] }
 0x34c   :  { %2930 = vmatmul.msk.f32.gmra.mxu2 %vm1130_vm6, %v4466_v35  ;;  %1723 = vrot.lane.b32.xlu1 %v4625_v40, %s3044_s24  ;;  %v1485_v2 = vpop.f32.mrf.mxu2  ;;  %v1607_v41 = vpop.f32.mrf.mxu3 }
 0x34d   :  { %v1486_v47 = vadd.f32 %v1485_v2, %v1373_v26 }
 0x34f   :  { %v1599_v18 = vadd.f32 %v1598_v51, %v1486_v47 }
 0x351   :  { %v4634_v38 = vmax.f32 %v1599_v18, 0.0 }
 0x353   :  { %1951 = vmatmul.f32.gmra.mxu3 %v1778_v9  ;;  %2046 = vmatmul.f32.gmra.mxu1 %v1778_v9 }
 0x354   :  { %2931 = vmatmul.msk.f32.gmra.mxu2 %vm1130_vm6, %v4477_v60  ;;  %1725 = vrot.lane.b32.xlu2 %v4634_v38, %s3044_s24  ;;  %v2310_v60 = vld [vmem:[#allocation2 + $0x68] sm:$0xff]  ;;  %v1610_v55 = vpop.f32.mrf.mxu3 }
 0x355   :  { %2527 = vmatpush.msrb.mxu0 %v2310_v60 }
 0x357   :  { %v1381_v54 = vpop.f32.mrf.mxu1  ;;  %2528 = vmatpush.msrb.mxu0 %v2309_v61 }
 0x358   :  { %v1382_v36 = vadd.f32 %v4321_v53, %v1381_v54 }
 0x359   :  { %2529 = vmatpush.msrb.mxu0 %v2308_v58 }
 0x35b   :  { %1954 = vmatmul.f32.gmra.mxu3 %v1779_v43  ;;  %2049 = vmatmul.f32.gmra.mxu1 %v1779_v43 }
 0x35c   :  { %2932 = vmatmul.msk.f32.gmra.mxu2 %vm1130_vm6, %v4487_v28  ;;  %v1781_v28 = vsel %vm1130_vm6, %v4510_v34, %v1706_v59 }
 0x35d   :  { %v1488_v35 = vpop.f32.mrf.mxu2 }
 0x35e   :  { %v1489_v25 = vadd.f32 %v1488_v35, %v1376_v62  ;;  %v1710_v51 = vpop.permute.xlu0 %1709 }
 0x360   :  { %v1602_v52 = vadd.f32 %v1601_v45, %v1489_v25  ;;  %v1384_v63 = vpop.f32.mrf.mxu1 }
 0x361   :  { %v1385_v29 = vadd.f32 %v4321_v53, %v1384_v63  ;;  %v1714_v53 = vpop.permute.xlu2 %1713  ;;  %v2306_v63 = vld [vmem:[#allocation2 + $0x48] sm:$0xff] }
 0x362   :  { %v4647_v27 = vmax.f32 %v1602_v52, 0.0 }
 0x363   :  { %1957 = vmatmul.f32.gmra.mxu3 %v1780_v4  ;;  %2052 = vmatmul.f32.gmra.mxu1 %v1780_v4 }
 0x364   :  { %2933 = vmatmul.msk.f32.gmra.mxu2 %vm1130_vm6, %v4510_v34  ;;  %1727 = vrot.lane.b32.xlu0 %v4647_v27, %s3044_s24  ;;  %v1782_v34 = vsel %vm1130_vm6, %v4524_v33, %v1708_v42 }
 0x366   :  { %v1491_v49 = vpop.f32.mrf.mxu2  ;;  %v1712_v5 = vpop.permute.xlu1 %1711 }
 0x367   :  { %v1492_v13 = vadd.f32 %v1491_v49, %v1379_v11  ;;  %v1784_v45 = vsel %vm1130_vm6, %v4542_v7, %v1712_v5 }
 0x369   :  { %v1605_v21 = vadd.f32 %v1604_v15, %v1492_v13  ;;  %v4677_v20 = vpop.f32.mrf.mxu1 }
 0x36b   :  { %v4658_v44 = vmax.f32 %v1605_v21, 0.0  ;;  %1960 = vmatmul.f32.gmra.mxu3 %v1781_v28  ;;  %2055 = vmatmul.f32.gmra.mxu1 %v1781_v28 }
 0x36c   :  { %2934 = vmatmul.msk.f32.gmra.mxu2 %vm1130_vm6, %v4524_v33  ;;  %v1783_v33 = vsel %vm1130_vm6, %v4531_v3, %v1710_v51 }
 0x36d   :  { %1759 = vrot.lane.b32.xlu1 %v4658_v44, %s3044_s24 }
 0x36e   :  { %v1494_v57 = vpop.f32.mrf.mxu2  ;;  %v4665_v23 = vpop.f32.mrf.mxu3 }
 0x36f   :  { %v1495_v24 = vadd.f32 %v1494_v57, %v1382_v36 }
 0x371   :  { %v4667_v16 = vadd.f32 %v1607_v41, %v1495_v24 }
 0x373   :  { %v1643_v46 = vmax.f32 %v4667_v16, 0.0  ;;  %1963 = vmatmul.f32.gmra.mxu3 %v1782_v34  ;;  %2058 = vmatmul.f32.gmra.mxu1 %v1782_v34 }
 0x374   :  { %2935 = vmatmul.msk.f32.gmra.mxu2 %vm1130_vm6, %v4531_v3 }
 0x375   :  { %1761 = vrot.lane.b32.xlu2 %v1643_v46, %s3044_s24 }
 0x376   :  { %v1916_v12 = vpop.f32.mrf.mxu3 }
 0x377   :  { %v1917_v47 = vadd.f32 %v4699_v6, %v1916_v12 }
 0x37b   :  { %1966 = vmatmul.f32.gmra.mxu3 %v1783_v33  ;;  %2061 = vmatmul.f32.gmra.mxu1 %v1783_v33 }
 0x37c   :  { %2936 = vmatmul.msk.f32.gmra.mxu2 %vm1130_vm6, %v4542_v7  ;;  %v1785_v7 = vsel %vm1130_vm6, %v4553_v31, %v1714_v53 }
 0x37e   :  { %v1497_v32 = vpop.f32.mrf.mxu2  ;;  %v4684_v30 = vpop.f32.mrf.mxu3 }
 0x37f   :  { %v1498_v10 = vadd.f32 %v1497_v32, %v1385_v29  ;;  %v1716_v14 = vpop.permute.xlu0 %1715 }
 0x380   :  { %v2017_v8 = vpop.f32.mrf.mxu1  ;;  %v1786_v48 = vsel %vm1130_vm6, %v4561_v19, %v1716_v14 }
 0x381   :  { %v4686_v37 = vadd.f32 %v1610_v55, %v1498_v10  ;;  %v2018_v50 = vadd.f32 %v2017_v8, %v1917_v47  ;;  %v2305_v10 = vld [vmem:[#allocation2 + $0x40] sm:$0xff] }
 0x383   :  { %1969 = vmatmul.f32.gmra.mxu3 %v1784_v45  ;;  %2064 = vmatmul.f32.gmra.mxu1 %v1784_v45 }
 0x384   :  { %2937 = vmatmul.msk.f32.gmra.mxu2 %vm1130_vm6, %v4553_v31  ;;  %v2307_v31 = vld [vmem:[#allocation2 + $0x50] sm:$0xff]  ;;  %v1720_v54 = vpop.permute.xlu2 %1719 }
 0x385   :  { %2530 = vmatpush.msrb.mxu0 %v2307_v31  ;;  %v1788_v59 = vsel %vm1130_vm6, %v4590_v1, %v1720_v54  ;;  %v2300_v31 = vld [vmem:[#allocation2 + $0x18] sm:$0xff] }
 0x386   :  { %v1922_v3 = vpop.f32.mrf.mxu3 }
 0x387   :  { %v4692_v26 = vpop.f32.mrf.mxu2  ;;  %2531 = vmatpush.msrb.mxu0 %v2306_v63  ;;  %v2325_v63 = vld [vmem:[#allocation2 + $0xe0] sm:$0xff] }
 0x388   :  { %v4694_v2 = vpop.f32.mrf.mxu1 }
 0x389   :  { %2532 = vmatpush.msrb.mxu0 %v2305_v10 }
 0x38b   :  { %1972 = vmatmul.f32.gmra.mxu3 %v1785_v7  ;;  %2067 = vmatmul.f32.gmra.mxu1 %v1785_v7  ;;  %v2302_v7 = vld [vmem:[#allocation2 + $0x28] sm:$0xff] }
 0x38c   :  { %2938 = vmatmul.msk.f32.gmra.mxu2 %vm1130_vm6, %v4561_v19  ;;  %v1923_v19 = vadd.f32 %v4699_v6, %v1922_v3  ;;  %v2304_v3 = vld [vmem:[#allocation2 + $0x38] sm:$0xff] }
 0x38d   :  { %2533 = vmatpush.msrb.mxu0 %v2304_v3 }
 0x38e   :  { %v4706_v18 = vpop.f32.mrf.mxu3 }
 0x38f   :  { %v2118_v15 = vpop.f32.mrf.mxu2 }
 0x390   :  { %v2119_v9 = vadd.f32 %v2118_v15, %v2018_v50  ;;  %v2023_v17 = vpop.f32.mrf.mxu1 }
 0x391   :  { %v2024_v52 = vadd.f32 %v2023_v17, %v1923_v19  ;;  %v2301_v17 = vld [vmem:[#allocation2 + $0x20] sm:$0xff]  ;;  %v2298_v19 = vld [vmem:[#allocation2 + $0x8] sm:$0xff] }
 0x392   :  { %v2200_v43 = vmax.f32 %v2119_v9, 0.0 }
 0x393   :  { %1975 = vmatmul.f32.gmra.mxu3 %v1786_v48  ;;  %2070 = vmatmul.f32.gmra.mxu1 %v1786_v48 }
 0x394   :  { %2939 = vmatmul.msk.f32.gmra.mxu2 %vm1130_vm6, %v4573_v22  ;;  %2228 = vrot.lane.b32.xlu0 %v2200_v43, %s3044_s24  ;;  %v1718_v62 = vpop.permute.xlu1 %1717 }
 0x395   :  { %v1787_v0 = vsel %vm1130_vm6, %v4573_v22, %v1718_v62  ;;  %v2299_v62 = vld [vmem:[#allocation2 + $0x10] sm:$0xff] }
 0x396   :  { %v1928_v41 = vpop.f32.mrf.mxu3 }
 0x397   :  { %v4713_v35 = vpop.f32.mrf.mxu2  ;;  %v1929_v57 = vadd.f32 %v4699_v6, %v1928_v41 }
 0x398   :  { %v4715_v25 = vpop.f32.mrf.mxu1 }
 0x39b   :  { %1978 = vmatmul.f32.gmra.mxu3 %v1787_v0  ;;  %2073 = vmatmul.f32.gmra.mxu1 %v1787_v0 }
 0x39c   :  { %2940 = vmatmul.msk.f32.gmra.mxu2 %vm1130_vm6, %v4590_v1 }
 0x39e   :  { %v1931_v4 = vpop.f32.mrf.mxu3 }
 0x39f   :  { %v2124_v60 = vpop.f32.mrf.mxu2  ;;  %v1932_v13 = vadd.f32 %v4699_v6, %v1931_v4 }
 0x3a0   :  { %v2125_v55 = vadd.f32 %v2124_v60, %v2024_v52  ;;  %v2029_v11 = vpop.f32.mrf.mxu1  ;;  %v2297_v60 = vld [vmem:[#allocation2] sm:$0xff] }
 0x3a1   :  { %v2030_v1 = vadd.f32 %v2029_v11, %v1929_v57 }
 0x3a2   :  { %v2202_v49 = vmax.f32 %v2125_v55, 0.0 }
 0x3a3   :  { %1981 = vmatmul.f32.gmra.mxu3 %v1788_v59  ;;  %2076 = vmatmul.f32.gmra.mxu1 %v1788_v59 }
 0x3a4   :  { %2941 = vmatmul.msk.f32.gmra.mxu2 %vm1130_vm6, %v4599_v39  ;;  %2232 = vrot.lane.b32.xlu1 %v2202_v49, %s3044_s24  ;;  %v2328_v49 = vld [vmem:[#allocation2 + $0xf8] sm:$0xff] }
 0x3a6   :  { %v1934_v22 = vpop.f32.mrf.mxu3 }
 0x3a7   :  { %v4728_v21 = vpop.f32.mrf.mxu2  ;;  %v1935_v53 = vadd.f32 %v4699_v6, %v1934_v22  ;;  %v2327_v22 = vld [vmem:[#allocation2 + $0xf0] sm:$0xff] }
 0x3a8   :  { %v2032_v28 = vpop.f32.mrf.mxu1 }
 0x3a9   :  { %v2033_v36 = vadd.f32 %v2032_v28, %v1932_v13  ;;  %v2326_v13 = vld [vmem:[#allocation2 + $0xe8] sm:$0xff] }
 0x3ac   :  { %2942 = vmatmul.msk.f32.gmra.mxu2 %vm1130_vm6, %v4612_v56 }
 0x3ae   :  { %v1937_v42 = vpop.f32.mrf.mxu3  ;;  %v1722_v34 = vpop.permute.xlu0 %1721 }
 0x3af   :  { %v2130_v24 = vpop.f32.mrf.mxu2  ;;  %v1789_v51 = vsel %vm1130_vm6, %v4599_v39, %v1722_v34  ;;  %v1938_v32 = vadd.f32 %v4699_v6, %v1937_v42  ;;  %v2303_v39 = vld [vmem:[#allocation2 + $0x30] sm:$0xff]  ;;  %v1726_v0 = vpop.permute.xlu2 %1725 }
 0x3b0   :  { %v2131_v61 = vadd.f32 %v2130_v24, %v2030_v1  ;;  %v2035_v12 = vpop.f32.mrf.mxu1  ;;  %1984 = vmatmul.f32.gmra.mxu3 %v1789_v51  ;;  %2079 = vmatmul.f32.gmra.mxu1 %v1789_v51  ;;  %v1791_v54 = vsel %vm1130_vm6, %v4625_v40, %v1726_v0  ;;  %v2324_v24 = vld [vmem:[#allocation2 + $0xd8] sm:$0xff]  ;;  %v2322_v51 = vld [vmem:[#allocation2 + $0xc8] sm:$0xff]  ;;  %v2315_v0 = vld [vmem:[#allocation2 + $0x90] sm:$0xff] }
 0x3b1   :  { %2534 = vmatpush.msrb.mxu0 %v2303_v39  ;;  %v2036_v47 = vadd.f32 %v2035_v12, %v1935_v53  ;;  %v2424_v12 = vld [vmem:[#allocation2 + $0x3f8] sm:$0xff]  ;;  %v1644_v39 = vmax.f32 %v4686_v37, 0.0 }
 0x3b2   :  { %v2204_v33 = vmax.f32 %v2131_v61, 0.0  ;;  %v2323_v61 = vld [vmem:[#allocation2 + $0xd0] sm:$0xff]  ;;  %2665 = vmatpush.msra.mxu3 %v2424_v12  ;;  %v2456_v53 = vld [vmem:[#allocation2 + $0x4f8] sm:$0xff] }
 0x3b3   :  { %2535 = vmatpush.msrb.mxu0 %v2302_v7  ;;  %v2319_v7 = vld [vmem:[#allocation2 + $0xb0] sm:$0xff]  ;;  %2705 = vmatpush.msra.mxu2 %v2456_v53 }
 0x3b4   :  { %2943 = vmatmul.msk.f32.gmra.mxu2 %vm1130_vm6, %v4625_v40  ;;  %2236 = vrot.lane.b32.xlu2 %v2204_v33, %s3044_s24 }
 0x3b5   :  { %2536 = vmatpush.msrb.mxu0 %v2301_v17 }
 0x3b6   :  { %v1940_v29 = vpop.f32.mrf.mxu3 }
 0x3b7   :  { %v2133_v5 = vpop.f32.mrf.mxu2  ;;  %2537 = vmatpush.msrb.mxu0 %v2300_v31  ;;  %v1941_v28 = vadd.f32 %v4699_v6, %v1940_v29 }
 0x3b8   :  { %v4739_v8 = vadd.f32 %v2133_v5, %v2033_v36  ;;  %v2038_v45 = vpop.f32.mrf.mxu1 }
 0x3b9   :  { %v2039_v58 = vadd.f32 %v2038_v45, %v1938_v32  ;;  %2538 = vmatpush.msrb.mxu0 %v2299_v62  ;;  %v2321_v32 = vld [vmem:[#allocation2 + $0xc0] sm:$0xff] }
 0x3bb   :  { %2539 = vmatpush.msrb.mxu0 %v2298_v19  ;;  %v2423_v19 = vld [vmem:[#allocation2 + $0x3f0] sm:$0xff] }
 0x3bc   :  { %2944 = vmatmul.msk.f32.gmra.mxu2 %vm1130_vm6, %v4634_v38  ;;  %2666 = vmatpush.msra.mxu3 %v2423_v19  ;;  %v2437_v19 = vld [vmem:[#allocation2 + $0x460] sm:$0xff] }
 0x3bd   :  { %2540 = vmatpush.msrb.mxu0 %v2297_v60 }
 0x3be   :  { %v1724_v50 = vpop.permute.xlu1 %1723  ;;  %v1943_v14 = vpop.f32.mrf.mxu3 }
 0x3bf   :  { %v2136_v15 = vpop.f32.mrf.mxu2  ;;  %v1790_v9 = vsel %vm1130_vm6, %v4612_v56, %v1724_v50  ;;  %v1944_v56 = vadd.f32 %v4699_v6, %v1943_v14  ;;  %2545 = vmatpush.msra.mxu0 %v2328_v49 }
 0x3c0   :  { %v2137_v43 = vadd.f32 %v2136_v15, %v2036_v47  ;;  %1987 = vmatmul.f32.gmra.mxu3 %v1790_v9  ;;  %v2041_v48 = vpop.f32.mrf.mxu1  ;;  %2082 = vmatmul.f32.gmra.mxu1 %v1790_v9  ;;  %v2440_v47 = vld [vmem:[#allocation2 + $0x478] sm:$0xff]  ;;  %v2317_v9 = vld [vmem:[#allocation2 + $0xa0] sm:$0xff] }
 0x3c1   :  { %2546 = vmatpush.msra.mxu0 %v2327_v22  ;;  %v2042_v40 = vadd.f32 %v2041_v48, %v1941_v28  ;;  %2685 = vmatpush.msra.mxu1 %v2440_v47  ;;  %v2439_v28 = vld [vmem:[#allocation2 + $0x470] sm:$0xff] }
 0x3c2   :  { %v2206_v41 = vmax.f32 %v2137_v43, 0.0 }
 0x3c3   :  { %2547 = vmatpush.msra.mxu0 %v2326_v13  ;;  %v2455_v13 = vld [vmem:[#allocation2 + $0x4f0] sm:$0xff]  ;;  %2686 = vmatpush.msra.mxu1 %v2439_v28  ;;  %v2452_v28 = vld [vmem:[#allocation2 + $0x4d8] sm:$0xff] }
 0x3c4   :  { %2945 = vmatmul.msk.f32.gmra.mxu2 %vm1130_vm6, %v4647_v27  ;;  %2240 = vrot.lane.b32.xlu0 %v2206_v41, %s3044_s24  ;;  %v2316_v41 = vld [vmem:[#allocation2 + $0x98] sm:$0xff] }
 0x3c5   :  { %2548 = vmatpush.msra.mxu0 %v2325_v63  ;;  %2706 = vmatpush.msra.mxu2 %v2455_v13  ;;  %v2338_v13 = vld [vmem:[#allocation2 + $0x148] sm:$0xff] }
 0x3c6   :  { %v1946_v52 = vpop.f32.mrf.mxu3 }
 0x3c7   :  { %v2139_v4 = vpop.f32.mrf.mxu2  ;;  %2549 = vmatpush.msra.mxu0 %v2324_v24  ;;  %v1947_v50 = vadd.f32 %v4699_v6, %v1946_v52  ;;  %v2314_v52 = vld [vmem:[#allocation2 + $0x88] sm:$0xff] }
 0x3c8   :  { %v4752_v55 = vadd.f32 %v2139_v4, %v2039_v58  ;;  %1990 = vmatmul.f32.gmra.mxu3 %v1791_v54  ;;  %v2044_v11 = vpop.f32.mrf.mxu1  ;;  %2085 = vmatmul.f32.gmra.mxu1 %v1791_v54  ;;  %v2313_v54 = vld [vmem:[#allocation2 + $0x80] sm:$0xff] }
 0x3c9   :  { %v2045_v59 = vadd.f32 %v2044_v11, %v1944_v56  ;;  %2550 = vmatpush.msra.mxu0 %v2323_v61 }
 0x3cb   :  { %2551 = vmatpush.msra.mxu0 %v2322_v51 }
 0x3cc   :  { %2946 = vmatmul.msk.f32.gmra.mxu2 %vm1130_vm6, %v4658_v44 }
 0x3cd   :  { %2552 = vmatpush.msra.mxu0 %v2321_v32  ;;  %v2438_v32 = vld [vmem:[#allocation2 + $0x468] sm:$0xff] }
 0x3ce   :  { %v1949_v36 = vpop.f32.mrf.mxu3  ;;  %2687 = vmatpush.msra.mxu1 %v2438_v32  ;;  %v2334_v32 = vld [vmem:[#allocation2 + $0x128] sm:$0xff] }
 0x3cf   :  { %v2142_v57 = vpop.f32.mrf.mxu2  ;;  %v1950_v5 = vadd.f32 %v4699_v6, %v1949_v36  ;;  %v1762_v56 = vpop.permute.xlu2 %1761 }
 0x3d0   :  { %v2143_v1 = vadd.f32 %v2142_v57, %v2042_v40  ;;  %v2047_v42 = vpop.f32.mrf.mxu1  ;;  %v2422_v57 = vld [vmem:[#allocation2 + $0x3e8] sm:$0xff]  ;;  %2688 = vmatpush.msra.mxu1 %v2437_v19 }
 0x3d1   :  { %v2048_v14 = vadd.f32 %v2047_v42, %v1947_v50  ;;  %2667 = vmatpush.msra.mxu3 %v2422_v57  ;;  %v2336_v57 = vld [vmem:[#allocation2 + $0x138] sm:$0xff]  ;;  %v2358_v19 = vld [vmem:[#allocation2 + $0x1e8] sm:$0xff] }
 0x3d2   :  { %v2208_v34 = vmax.f32 %v2143_v1, 0.0  ;;  %v2454_v1 = vld [vmem:[#allocation2 + $0x4e8] sm:$0xff] }
 0x3d3   :  { %2707 = vmatpush.msra.mxu2 %v2454_v1 }
 0x3d4   :  { %2947 = vmatmul.msk.f32.gmra.mxu2 %vm1130_vm6, %v1643_v46  ;;  %2244 = vrot.lane.b32.xlu1 %v2208_v34, %s3044_s24  ;;  %v2320_v46 = vld [vmem:[#allocation2 + $0xb8] sm:$0xff] }
 0x3d5   :  { %2553 = vmatpush.msra.mxu0 %v2320_v46 }
 0x3d6   :  { %v1728_v33 = vpop.permute.xlu0 %1727  ;;  %v4761_v29 = vpop.f32.mrf.mxu3 }
 0x3d7   :  { %v2145_v10 = vpop.f32.mrf.mxu2  ;;  %v1792_v45 = vsel %vm1130_vm6, %v4634_v38, %v1728_v33  ;;  %v2318_v38 = vld [vmem:[#allocation2 + $0xa8] sm:$0xff]  ;;  %2554 = vmatpush.msra.mxu0 %v2319_v7  ;;  %v1953_v51 = vadd.f32 %v4699_v6, %v4761_v29  ;;  %v1914_v33 = vadd.f32 %v4699_v6, %v4665_v23  ;;  %v2421_v23 = vld [vmem:[#allocation2 + $0x3e0] sm:$0xff] }
 0x3d8   :  { %v4766_v58 = vadd.f32 %v2145_v10, %v2045_v59  ;;  %1993 = vmatmul.f32.gmra.mxu3 %v1792_v45  ;;  %v2050_v16 = vpop.f32.mrf.mxu1  ;;  %2088 = vmatmul.f32.gmra.mxu1 %v1792_v45  ;;  %v1794_v59 = vsel %vm1130_vm6, %v4658_v44, %v1762_v56  ;;  %v1920_v56 = vadd.f32 %v4699_v6, %v4684_v30 }
 0x3d9   :  { %v2051_v3 = vadd.f32 %v2050_v16, %v1950_v5  ;;  %2555 = vmatpush.msra.mxu0 %v2318_v38  ;;  %v2015_v46 = vadd.f32 %v4677_v20, %v1914_v33  ;;  %2668 = vmatpush.msra.mxu3 %v2421_v23 }
 0x3db   :  { %2556 = vmatpush.msra.mxu0 %v2317_v9  ;;  %v2116_v47 = vadd.f32 %v4692_v26, %v2015_v46  ;;  %v2419_v46 = vld [vmem:[#allocation2 + $0x3d0] sm:$0xff] }
 0x3dc   :  { %2948 = vmatmul.msk.f32.gmra.mxu2 %vm1130_vm6, %v1644_v39 }
 0x3dd   :  { %2557 = vmatpush.msra.mxu0 %v2316_v41 }
 0x3de   :  { %v1955_v15 = vpop.f32.mrf.mxu3 }
 0x3df   :  { %v2148_v17 = vpop.f32.mrf.mxu2  ;;  %v1760_v43 = vpop.permute.xlu1 %1759  ;;  %2558 = vmatpush.msra.mxu0 %v2315_v0  ;;  %v1956_v60 = vadd.f32 %v4699_v6, %v1955_v15  ;;  %v2453_v15 = vld [vmem:[#allocation2 + $0x4e0] sm:$0xff]  ;;  %v2342_v0 = vld [vmem:[#allocation2 + $0x168] sm:$0xff] }
 0x3e0   :  { %v2149_v48 = vadd.f32 %v2148_v17, %v2048_v14  ;;  %v2053_v37 = vpop.f32.mrf.mxu1  ;;  %v1793_v31 = vsel %vm1130_vm6, %v4647_v27, %v1760_v43  ;;  %v2199_v14 = vmax.f32 %v2116_v47, 0.0  ;;  %v2344_v17 = vld [vmem:[#allocation2 + $0x178] sm:$0xff]  ;;  %2708 = vmatpush.msra.mxu2 %v2453_v15  ;;  %v2330_v15 = vld [vmem:[#allocation2 + $0x108] sm:$0xff] }
 0x3e1   :  { %2091 = vmatmul.f32.gmra.mxu1 %v1793_v31  ;;  %2559 = vmatpush.msra.mxu0 %v2314_v52  ;;  %v2054_v5 = vadd.f32 %v2053_v37, %v1953_v51  ;;  %v2343_v31 = vld [vmem:[#allocation2 + $0x170] sm:$0xff]  ;;  %v2341_v52 = vld [vmem:[#allocation2 + $0x160] sm:$0xff] }
 0x3e2   :  { %v2210_v62 = vmax.f32 %v2149_v48, 0.0  ;;  %2709 = vmatpush.msra.mxu2 %v2452_v28  ;;  %v2353_v28 = vld [vmem:[#allocation2 + $0x1c0] sm:$0xff] }
 0x3e3   :  { %2560 = vmatpush.msra.mxu0 %v2313_v54  ;;  %v2021_v54 = vadd.f32 %v4694_v2, %v1920_v56 }
 0x3e4   :  { %2248 = vrot.lane.b32.xlu2 %v2210_v62, %s3044_s24 }
 0x3e6   :  { %v1958_v4 = vpop.f32.mrf.mxu3 }
 0x3e7   :  { %v2151_v11 = vpop.f32.mrf.mxu2  ;;  %v1959_v10 = vadd.f32 %v4699_v6, %v1958_v4  ;;  %v2340_v4 = vld [vmem:[#allocation2 + $0x158] sm:$0xff] }
 0x3e8   :  { %v4775_v27 = vadd.f32 %v2151_v11, %v2051_v3  ;;  %v2056_v49 = vpop.f32.mrf.mxu1  ;;  %v2420_v11 = vld [vmem:[#allocation2 + $0x3d8] sm:$0xff] }
 0x3e9   :  { %v2057_v22 = vadd.f32 %v2056_v49, %v1956_v60  ;;  %2094 = vmatmul.f32.gmra.mxu1 %v1794_v59  ;;  %v2339_v59 = vld [vmem:[#allocation2 + $0x150] sm:$0xff]  ;;  %2669 = vmatpush.msra.mxu3 %v2420_v11 }
 0x3eb   :  { %2670 = vmatpush.msra.mxu3 %v2419_v46 }
 0x3ee   :  { %v1961_v40 = vpop.f32.mrf.mxu3 }
 0x3ef   :  { %v2154_v36 = vpop.f32.mrf.mxu2  ;;  %v1962_v24 = vadd.f32 %v4699_v6, %v1961_v40 }
 0x3f0   :  { %v2059_v63 = vpop.f32.mrf.mxu1  ;;  %v2155_v45 = vadd.f32 %v2154_v36, %v2054_v5  ;;  %v2337_v36 = vld [vmem:[#allocation2 + $0x140] sm:$0xff] }
 0x3f1   :  { %v2060_v16 = vadd.f32 %v2059_v63, %v1959_v10 }
 0x3f2   :  { %v2212_v29 = vmax.f32 %v2155_v45, 0.0  ;;  %v2333_v45 = vld [vmem:[#allocation2 + $0x120] sm:$0xff] }
 0x3f6   :  { %v4779_v42 = vpop.f32.mrf.mxu3 }
 0x3f7   :  { %v2157_v34 = vpop.f32.mrf.mxu2  ;;  %v1965_v33 = vadd.f32 %v4699_v6, %v4779_v42 }
 0x3f8   :  { %v4782_v44 = vadd.f32 %v2157_v34, %v2057_v22  ;;  %v2062_v61 = vpop.f32.mrf.mxu1  ;;  %v2122_v22 = vadd.f32 %v4713_v35, %v2021_v54  ;;  %v2436_v34 = vld [vmem:[#allocation2 + $0x458] sm:$0xff] }
 0x3f9   :  { %v2063_v12 = vadd.f32 %v2062_v61, %v1962_v24  ;;  %2689 = vmatpush.msra.mxu1 %v2436_v34  ;;  %v2417_v34 = vld [vmem:[#allocation2 + $0x3c0] sm:$0xff] }
 0x3fa   :  { %v2201_v30 = vmax.f32 %v2122_v22, 0.0  ;;  %v2450_v22 = vld [vmem:[#allocation2 + $0x4c8] sm:$0xff] }
 0x3fe   :  { %v1967_v39 = vpop.f32.mrf.mxu3 }
 0x3ff   :  { %v2160_v3 = vpop.f32.mrf.mxu2  ;;  %v1968_v20 = vadd.f32 %v4699_v6, %v1967_v39 }
 0x400   :  { %v2161_v53 = vadd.f32 %v2160_v3, %v2060_v16  ;;  %v4790_v7 = vpop.f32.mrf.mxu1  ;;  %v1926_v16 = vadd.f32 %v4699_v6, %v4706_v18 }
 0x401   :  { %v2066_v5 = vadd.f32 %v4790_v7, %v1965_v33 }
 0x402   :  { %v2214_v50 = vmax.f32 %v2161_v53, 0.0  ;;  %v2332_v53 = vld [vmem:[#allocation2 + $0x118] sm:$0xff]  ;;  %v2027_v47 = vadd.f32 %v4715_v25, %v1926_v16  ;;  %v2435_v25 = vld [vmem:[#allocation2 + $0x450] sm:$0xff]  ;;  %v2449_v16 = vld [vmem:[#allocation2 + $0x4c0] sm:$0xff] }
 0x403   :  { %2690 = vmatpush.msra.mxu1 %v2435_v25  ;;  %v2375_v25 = vld [vmem:[#allocation2 + $0x270] sm:$0xff] }
 0x404   :  { %v2991_v38 = vpack.i.bf16 %v2212_v29, %v2214_v50  ;;  %v2128_v7 = vadd.f32 %v4728_v21, %v2027_v47 }
 0x406   :  { %2992 = vrot.lane.b32.xlu0 %v2991_v38, %s3044_s24  ;;  %v2229_v9 = vpop.permute.xlu0 %2228  ;;  %v1970_v62 = vpop.f32.mrf.mxu3  ;;  %v2331_v38 = vld [vmem:[#allocation2 + $0x110] sm:$0xff] }
 0x407   :  { %v2259_v43 = vsel %vm1130_vm6, %v2199_v14, %v2229_v9  ;;  %v2163_v48 = vpop.f32.mrf.mxu2  ;;  %v1971_v10 = vadd.f32 %v4699_v6, %v1970_v62  ;;  %v2359_v62 = vld [vmem:[#allocation2 + $0x1f0] sm:$0xff] }
 0x408   :  { %v4796_v37 = vadd.f32 %v2163_v48, %v2063_v12  ;;  %2541 = vmatmul.f32.vlgmr.msrb.gmra.mxu0 %v2259_v43  ;;  %v2068_v26 = vpop.f32.mrf.mxu1  ;;  %v2335_v12 = vld [vmem:[#allocation2 + $0x130] sm:$0xff]  ;;  %v2203_v43 = vmax.f32 %v2128_v7, 0.0 }
 0x409   :  { %2565 = vmatpush.msrb.mxu0 %v2344_v17  ;;  %v2069_v41 = vadd.f32 %v2068_v26, %v1968_v20  ;;  %v2329_v17 = vld [vmem:[#allocation2 + $0x100] sm:$0xff]  ;;  %v2451_v20 = vld [vmem:[#allocation2 + $0x4d0] sm:$0xff]  ;;  %v2360_v26 = vld [vmem:[#allocation2 + $0x1f8] sm:$0xff] }
 0x40a   :  { %2710 = vmatpush.msra.mxu2 %v2451_v20 }
 0x40b   :  { %2566 = vmatpush.msrb.mxu0 %v2343_v31 }
 0x40c   :  { %2711 = vmatpush.msra.mxu2 %v2450_v22  ;;  %v2368_v22 = vld [vmem:[#allocation2 + $0x238] sm:$0xff] }
 0x40d   :  { %2567 = vmatpush.msrb.mxu0 %v2342_v0 }
 0x40e   :  { %v1973_v40 = vpop.f32.mrf.mxu3  ;;  %v2237_v18 = vpop.permute.xlu2 %2236  ;;  %2712 = vmatpush.msra.mxu2 %v2449_v16  ;;  %v2363_v16 = vld [vmem:[#allocation2 + $0x210] sm:$0xff] }
 0x40f   :  { %2568 = vmatpush.msrb.mxu0 %v2341_v52  ;;  %v2166_v60 = vpop.f32.mrf.mxu2  ;;  %v1974_v2 = vadd.f32 %v4699_v6, %v1973_v40  ;;  %v2261_v21 = vsel %vm1130_vm6, %v2203_v43, %v2237_v18  ;;  %v2357_v52 = vld [vmem:[#allocation2 + $0x1e0] sm:$0xff]  ;;  %v2434_v40 = vld [vmem:[#allocation2 + $0x448] sm:$0xff] }
 0x410   :  { %v2071_v49 = vpop.f32.mrf.mxu1  ;;  %v2167_v3 = vadd.f32 %v2166_v60, %v2066_v5  ;;  %v2356_v60 = vld [vmem:[#allocation2 + $0x1d8] sm:$0xff]  ;;  %2691 = vmatpush.msra.mxu1 %v2434_v40  ;;  %v2367_v40 = vld [vmem:[#allocation2 + $0x230] sm:$0xff] }
 0x411   :  { %2569 = vmatpush.msrb.mxu0 %v2340_v4  ;;  %v2072_v39 = vadd.f32 %v2071_v49, %v1971_v10  ;;  %v2418_v4 = vld [vmem:[#allocation2 + $0x3c8] sm:$0xff]  ;;  %v2348_v10 = vld [vmem:[#allocation2 + $0x198] sm:$0xff] }
 0x412   :  { %v2216_v23 = vmax.f32 %v2167_v3, 0.0  ;;  %2671 = vmatpush.msra.mxu3 %v2418_v4  ;;  %v2347_v3 = vld [vmem:[#allocation2 + $0x190] sm:$0xff] }
 0x413   :  { %2570 = vmatpush.msrb.mxu0 %v2339_v59  ;;  %v2355_v59 = vld [vmem:[#allocation2 + $0x1d0] sm:$0xff] }
 0x414   :  { %2672 = vmatpush.msra.mxu3 %v2417_v34  ;;  %v2365_v34 = vld [vmem:[#allocation2 + $0x220] sm:$0xff] }
 0x415   :  { %2571 = vmatpush.msrb.mxu0 %v2338_v13  ;;  %v2354_v13 = vld [vmem:[#allocation2 + $0x1c8] sm:$0xff] }
 0x416   :  { %v2233_v63 = vpop.permute.xlu1 %2232  ;;  %v1976_v29 = vpop.f32.mrf.mxu3 }
 0x417   :  { %v2260_v1 = vsel %vm1130_vm6, %v2201_v30, %v2233_v63  ;;  %2572 = vmatpush.msrb.mxu0 %v2337_v36  ;;  %v2169_v24 = vpop.f32.mrf.mxu2  ;;  %v2352_v36 = vld [vmem:[#allocation2 + $0x1b8] sm:$0xff] }
 0x418   :  { %v4804_v61 = vadd.f32 %v2169_v24, %v2069_v41  ;;  %2561 = vmatmul.f32.vlgmr.msra.gmra.mxu0 %v2260_v1  ;;  %v2074_v35 = vpop.f32.mrf.mxu1  ;;  %v1977_v1 = vadd.f32 %v4699_v6, %v1976_v29  ;;  %v2350_v24 = vld [vmem:[#allocation2 + $0x1a8] sm:$0xff]  ;;  %v2433_v29 = vld [vmem:[#allocation2 + $0x440] sm:$0xff] }
 0x419   :  { %2573 = vmatpush.msrb.mxu0 %v2336_v57  ;;  %v2075_v51 = vadd.f32 %v2074_v35, %v1974_v2  ;;  %v2351_v57 = vld [vmem:[#allocation2 + $0x1b0] sm:$0xff]  ;;  %2692 = vmatpush.msra.mxu1 %v2433_v29 }
 0x41b   :  { %2574 = vmatpush.msrb.mxu0 %v2335_v12 }
 0x41d   :  { %2575 = vmatpush.msrb.mxu0 %v2334_v32 }
 0x41e   :  { %v1979_v0 = vpop.f32.mrf.mxu3 }
 0x41f   :  { %2576 = vmatpush.msrb.mxu0 %v2333_v45  ;;  %v2172_v42 = vpop.f32.mrf.mxu2  ;;  %v1980_v56 = vadd.f32 %v4699_v6, %v1979_v0  ;;  %v2371_v0 = vld [vmem:[#allocation2 + $0x250] sm:$0xff] }
 0x420   :  { %v2173_v50 = vadd.f32 %v2172_v42, %v2072_v39  ;;  %v2077_v48 = vpop.f32.mrf.mxu1  ;;  %v2346_v42 = vld [vmem:[#allocation2 + $0x188] sm:$0xff] }
 0x421   :  { %2577 = vmatpush.msrb.mxu0 %v2332_v53  ;;  %v2078_v35 = vadd.f32 %v2077_v48, %v1977_v1  ;;  %v2416_v48 = vld [vmem:[#allocation2 + $0x3b8] sm:$0xff]  ;;  %v2411_v1 = vld [vmem:[#allocation2 + $0x390] sm:$0xff] }
 0x422   :  { %v2218_v14 = vmax.f32 %v2173_v50, 0.0  ;;  %2673 = vmatpush.msra.mxu3 %v2416_v48  ;;  %v2388_v48 = vld [vmem:[#allocation2 + $0x2d8] sm:$0xff] }
 0x423   :  { %2578 = vmatpush.msrb.mxu0 %v2331_v38 }
 0x424   :  { %v2996_v9 = vpack.i.bf16 %v2216_v23, %v2218_v14  ;;  %v2345_v23 = vld [vmem:[#allocation2 + $0x180] sm:$0xff]  ;;  %v2205_v14 = vmax.f32 %v4739_v8, 0.0 }
 0x425   :  { %2579 = vmatpush.msrb.mxu0 %v2330_v15  ;;  %v2373_v8 = vld [vmem:[#allocation2 + $0x260] sm:$0xff] }
 0x426   :  { %2997 = vrot.lane.b32.xlu1 %v2996_v9, %s3044_s24  ;;  %v1982_v2 = vpop.f32.mrf.mxu3  ;;  %v2376_v9 = vld [vmem:[#allocation2 + $0x278] sm:$0xff] }
 0x427   :  { %2580 = vmatpush.msrb.mxu0 %v2329_v17  ;;  %v2175_v31 = vpop.f32.mrf.mxu2  ;;  %v1983_v12 = vadd.f32 %v4699_v6, %v1982_v2  ;;  %v2366_v2 = vld [vmem:[#allocation2 + $0x228] sm:$0xff] }
 0x428   :  { %v4816_v41 = vadd.f32 %v2175_v31, %v2075_v51  ;;  %2581 = vmatmul.f32.vlgmr.msrb.gmra.mxu0 %v2261_v21  ;;  %v2349_v51 = vld [vmem:[#allocation2 + $0x1a0] sm:$0xff]  ;;  %v2448_v21 = vld [vmem:[#allocation2 + $0x4b8] sm:$0xff] }
 0x429   :  { %2585 = vmatpush.msra.mxu0 %v2360_v26  ;;  %v2374_v26 = vld [vmem:[#allocation2 + $0x268] sm:$0xff]  ;;  %v2372_v31 = vld [vmem:[#allocation2 + $0x258] sm:$0xff]  ;;  %2713 = vmatpush.msra.mxu2 %v2448_v21  ;;  %v2387_v21 = vld [vmem:[#allocation2 + $0x2d0] sm:$0xff] }
 0x42b   :  { %2586 = vmatpush.msra.mxu0 %v2359_v62 }
 0x42d   :  { %2587 = vmatpush.msra.mxu0 %v2358_v19  ;;  %v2080_v54 = vpop.f32.mrf.mxu1  ;;  %v2432_v19 = vld [vmem:[#allocation2 + $0x438] sm:$0xff] }
 0x42e   :  { %v2081_v11 = vadd.f32 %v2080_v54, %v1980_v56  ;;  %2693 = vmatpush.msra.mxu1 %v2432_v19  ;;  %v2415_v56 = vld [vmem:[#allocation2 + $0x3b0] sm:$0xff]  ;;  %v2385_v19 = vld [vmem:[#allocation2 + $0x2c0] sm:$0xff] }
 0x42f   :  { %2588 = vmatpush.msra.mxu0 %v2357_v52  ;;  %v2178_v49 = vpop.f32.mrf.mxu2  ;;  %v2370_v52 = vld [vmem:[#allocation2 + $0x248] sm:$0xff]  ;;  %2674 = vmatpush.msra.mxu3 %v2415_v56  ;;  %v2384_v56 = vld [vmem:[#allocation2 + $0x2b8] sm:$0xff] }
 0x430   :  { %v2179_v32 = vadd.f32 %v2178_v49, %v2078_v35  ;;  %v2410_v35 = vld [vmem:[#allocation2 + $0x388] sm:$0xff] }
 0x431   :  { %2589 = vmatpush.msra.mxu0 %v2356_v60  ;;  %v2369_v60 = vld [vmem:[#allocation2 + $0x240] sm:$0xff] }
 0x432   :  { %v2220_v53 = vmax.f32 %v2179_v32, 0.0 }
 0x433   :  { %2590 = vmatpush.msra.mxu0 %v2355_v59  ;;  %v1985_v39 = vpop.f32.mrf.mxu3 }
 0x434   :  { %v1986_v50 = vadd.f32 %v4699_v6, %v1985_v39  ;;  %v2362_v39 = vld [vmem:[#allocation2 + $0x208] sm:$0xff] }
 0x435   :  { %2591 = vmatpush.msra.mxu0 %v2354_v13  ;;  %v2413_v13 = vld [vmem:[#allocation2 + $0x3a0] sm:$0xff] }
 0x436   :  { %v2241_v38 = vpop.permute.xlu0 %2240 }
 0x437   :  { %2592 = vmatpush.msra.mxu0 %v2353_v28  ;;  %v2181_v30 = vpop.f32.mrf.mxu2  ;;  %v2262_v17 = vsel %vm1130_vm6, %v2205_v14, %v2241_v38 }
 0x438   :  { %v4819_v63 = vadd.f32 %v2181_v30, %v2081_v11  ;;  %v2414_v11 = vld [vmem:[#allocation2 + $0x3a8] sm:$0xff] }
 0x439   :  { %2593 = vmatpush.msra.mxu0 %v2352_v36  ;;  %2675 = vmatpush.msra.mxu3 %v2414_v11  ;;  %v2412_v36 = vld [vmem:[#allocation2 + $0x398] sm:$0xff]  ;;  %v2383_v11 = vld [vmem:[#allocation2 + $0x2b0] sm:$0xff] }
 0x43b   :  { %2594 = vmatpush.msra.mxu0 %v2351_v57  ;;  %2676 = vmatpush.msra.mxu3 %v2413_v13 }
 0x43d   :  { %2595 = vmatpush.msra.mxu0 %v2350_v24  ;;  %v2083_v33 = vpop.f32.mrf.mxu1  ;;  %2677 = vmatpush.msra.mxu3 %v2412_v36  ;;  %v2447_v24 = vld [vmem:[#allocation2 + $0x4b0] sm:$0xff]  ;;  %v2382_v36 = vld [vmem:[#allocation2 + $0x2a8] sm:$0xff] }
 0x43e   :  { %v2084_v5 = vadd.f32 %v2083_v33, %v1983_v12  ;;  %2714 = vmatpush.msra.mxu2 %v2447_v24  ;;  %v2364_v33 = vld [vmem:[#allocation2 + $0x218] sm:$0xff]  ;;  %v2381_v24 = vld [vmem:[#allocation2 + $0x2a0] sm:$0xff] }
 0x43f   :  { %2596 = vmatpush.msra.mxu0 %v2349_v51  ;;  %v2184_v45 = vpop.f32.mrf.mxu2  ;;  %2678 = vmatpush.msra.mxu3 %v2411_v1  ;;  %v2443_v1 = vld [vmem:[#allocation2 + $0x490] sm:$0xff] }
 0x440   :  { %v2185_v46 = vadd.f32 %v2184_v45, %v2084_v5  ;;  %v2409_v5 = vld [vmem:[#allocation2 + $0x380] sm:$0xff]  ;;  %v2431_v45 = vld [vmem:[#allocation2 + $0x430] sm:$0xff] }
 0x441   :  { %2597 = vmatpush.msra.mxu0 %v2348_v10  ;;  %2679 = vmatpush.msra.mxu3 %v2410_v35  ;;  %v2442_v35 = vld [vmem:[#allocation2 + $0x488] sm:$0xff] }
 0x442   :  { %v2222_v47 = vmax.f32 %v2185_v46, 0.0  ;;  %2694 = vmatpush.msra.mxu1 %v2431_v45  ;;  %v2378_v45 = vld [vmem:[#allocation2 + $0x288] sm:$0xff] }
 0x443   :  { %2598 = vmatpush.msra.mxu0 %v2347_v3  ;;  %v1988_v62 = vpop.f32.mrf.mxu3  ;;  %2680 = vmatpush.msra.mxu3 %v2409_v5  ;;  %v2379_v5 = vld [vmem:[#allocation2 + $0x290] sm:$0xff] }
 0x444   :  { %v3001_v7 = vpack.i.bf16 %v2220_v53, %v2222_v47  ;;  %v1989_v4 = vadd.f32 %v4699_v6, %v1988_v62  ;;  %v2361_v47 = vld [vmem:[#allocation2 + $0x200] sm:$0xff]  ;;  %v2386_v62 = vld [vmem:[#allocation2 + $0x2c8] sm:$0xff] }
 0x445   :  { %2599 = vmatpush.msra.mxu0 %v2346_v42  ;;  %v2086_v15 = vpop.f32.mrf.mxu1  ;;  %v2207_v42 = vmax.f32 %v4752_v55, 0.0  ;;  %v2389_v55 = vld [vmem:[#allocation2 + $0x2e0] sm:$0xff] }
 0x446   :  { %v2087_v18 = vadd.f32 %v2086_v15, %v1986_v50  ;;  %3002 = vrot.lane.b32.xlu2 %v3001_v7, %s3044_s24  ;;  %v2245_v53 = vpop.permute.xlu1 %2244  ;;  %v2392_v50 = vld [vmem:[#allocation2 + $0x2f8] sm:$0xff]  ;;  %v2391_v15 = vld [vmem:[#allocation2 + $0x2f0] sm:$0xff] }
 0x447   :  { %2600 = vmatpush.msra.mxu0 %v2345_v23  ;;  %v2187_v20 = vpop.f32.mrf.mxu2  ;;  %v2263_v7 = vsel %vm1130_vm6, %v2207_v42, %v2245_v53  ;;  %v2475_v53 = vld [vmem:[#allocation2 + $0x590] sm:$0xff]  ;;  %v2408_v42 = vld [vmem:[#allocation2 + $0x378] sm:$0xff] }
 0x448   :  { %2601 = vmatmul.f32.vlgmr.msra.gmra.mxu0 %v2262_v17  ;;  %v4827_v43 = vadd.f32 %v2187_v20, %v2087_v18  ;;  %v2488_v17 = vld [vmem:[#allocation2 + $0x5f8] sm:$0xff] }
 0x449   :  { %2605 = vmatpush.msrb.mxu0 %v2376_v9  ;;  %v2390_v9 = vld [vmem:[#allocation2 + $0x2e8] sm:$0xff]  ;;  %2745 = vmatpush.msrb.mxu3 %v2488_v17  ;;  %v2400_v17 = vld [vmem:[#allocation2 + $0x338] sm:$0xff] }
 0x44b   :  { %2606 = vmatpush.msrb.mxu0 %v2375_v25  ;;  %v1991_v30 = vpop.f32.mrf.mxu3  ;;  %v2446_v25 = vld [vmem:[#allocation2 + $0x4a8] sm:$0xff] }
 0x44c   :  { %v1992_v12 = vadd.f32 %v4699_v6, %v1991_v30  ;;  %2715 = vmatpush.msra.mxu2 %v2446_v25  ;;  %v2480_v30 = vld [vmem:[#allocation2 + $0x5b8] sm:$0xff]  ;;  %v2399_v25 = vld [vmem:[#allocation2 + $0x330] sm:$0xff] }
 0x44d   :  { %2607 = vmatpush.msrb.mxu0 %v2374_v26  ;;  %v2486_v26 = vld [vmem:[#allocation2 + $0x5e8] sm:$0xff] }
 0x44f   :  { %2608 = vmatpush.msrb.mxu0 %v2373_v8  ;;  %v2190_v54 = vpop.f32.mrf.mxu2  ;;  %v2430_v8 = vld [vmem:[#allocation2 + $0x428] sm:$0xff] }
 0x450   :  { %2695 = vmatpush.msra.mxu1 %v2430_v8 }
 0x451   :  { %2609 = vmatpush.msrb.mxu0 %v2372_v31  ;;  %v2485_v31 = vld [vmem:[#allocation2 + $0x5e0] sm:$0xff] }
 0x453   :  { %2610 = vmatpush.msrb.mxu0 %v2371_v0  ;;  %v2484_v0 = vld [vmem:[#allocation2 + $0x5d8] sm:$0xff] }
 0x455   :  { %2611 = vmatpush.msrb.mxu0 %v2370_v52  ;;  %v2089_v49 = vpop.f32.mrf.mxu1  ;;  %v2483_v52 = vld [vmem:[#allocation2 + $0x5d0] sm:$0xff] }
 0x456   :  { %v2090_v59 = vadd.f32 %v2089_v49, %v1989_v4  ;;  %v2482_v4 = vld [vmem:[#allocation2 + $0x5c8] sm:$0xff] }
 0x457   :  { %2612 = vmatpush.msrb.mxu0 %v2369_v60  ;;  %v2193_v51 = vpop.f32.mrf.mxu2  ;;  %v2445_v60 = vld [vmem:[#allocation2 + $0x4a0] sm:$0xff] }
 0x458   :  { %v2191_v28 = vadd.f32 %v2190_v54, %v2090_v59  ;;  %v2429_v54 = vld [vmem:[#allocation2 + $0x420] sm:$0xff]  ;;  %2716 = vmatpush.msra.mxu2 %v2445_v60  ;;  %v2221_v60 = vmax.f32 %v4819_v63, 0.0 }
 0x459   :  { %2613 = vmatpush.msrb.mxu0 %v2368_v22  ;;  %2696 = vmatpush.msra.mxu1 %v2429_v54  ;;  %v2481_v59 = vld [vmem:[#allocation2 + $0x5c0] sm:$0xff]  ;;  %v2213_v22 = vmax.f32 %v4782_v44, 0.0  ;;  %v2479_v44 = vld [vmem:[#allocation2 + $0x5b0] sm:$0xff] }
 0x45a   :  { %v2224_v57 = vmax.f32 %v2191_v28, 0.0  ;;  %v2428_v28 = vld [vmem:[#allocation2 + $0x418] sm:$0xff]  ;;  %v2497_v63 = vld [vmem:[#allocation2 + $0x640] sm:$0xff] }
 0x45b   :  { %2614 = vmatpush.msrb.mxu0 %v2367_v40  ;;  %v1994_v3 = vpop.f32.mrf.mxu3  ;;  %v2444_v40 = vld [vmem:[#allocation2 + $0x498] sm:$0xff]  ;;  %2697 = vmatpush.msra.mxu1 %v2428_v28 }
 0x45c   :  { %2284 = vrot.lane.b32.xlu1 %v2224_v57, %s3044_s24  ;;  %v1995_v29 = vadd.f32 %v4699_v6, %v1994_v3  ;;  %v2487_v6 = vld [vmem:[#allocation2 + $0x5f0] sm:$0xff]  ;;  %2717 = vmatpush.msra.mxu2 %v2444_v40  ;;  %v2249_v3 = vpop.permute.xlu2 %2248  ;;  %v2498_v40 = vld [vmem:[#allocation2 + $0x648] sm:$0xff] }
 0x45d   :  { %2615 = vmatpush.msrb.mxu0 %v2366_v2  ;;  %2746 = vmatpush.msrb.mxu3 %v2487_v6  ;;  %v2427_v2 = vld [vmem:[#allocation2 + $0x410] sm:$0xff]  ;;  %v2215_v6 = vmax.f32 %v4796_v37, 0.0  ;;  %v2501_v37 = vld [vmem:[#allocation2 + $0x660] sm:$0xff] }
 0x45e   :  { %v2092_v32 = vpop.f32.mrf.mxu1  ;;  %2698 = vmatpush.msra.mxu1 %v2427_v2  ;;  %2718 = vmatpush.msra.mxu2 %v2443_v1  ;;  %v2496_v1 = vld [vmem:[#allocation2 + $0x638] sm:$0xff] }
 0x45f   :  { %2616 = vmatpush.msrb.mxu0 %v2365_v34  ;;  %v2093_v10 = vadd.f32 %v2092_v32, %v1992_v12  ;;  %v2196_v14 = vpop.f32.mrf.mxu2  ;;  %2747 = vmatpush.msrb.mxu3 %v2486_v26  ;;  %v2426_v34 = vld [vmem:[#allocation2 + $0x408] sm:$0xff]  ;;  %v2380_v12 = vld [vmem:[#allocation2 + $0x298] sm:$0xff]  ;;  %v2441_v32 = vld [vmem:[#allocation2 + $0x480] sm:$0xff] }
 0x460   :  { %2699 = vmatpush.msra.mxu1 %v2426_v34  ;;  %2719 = vmatpush.msra.mxu2 %v2442_v35  ;;  %v2519_v34 = vld [vmem:[#allocation2 + $0x6f0] sm:$0xff]  ;;  %v2470_v35 = vld [vmem:[#allocation2 + $0x568] sm:$0xff] }
 0x461   :  { %2617 = vmatpush.msrb.mxu0 %v2364_v33  ;;  %v4832_v46 = vadd.f32 %v2193_v51, %v2093_v10  ;;  %2748 = vmatpush.msrb.mxu3 %v2485_v31  ;;  %v2478_v51 = vld [vmem:[#allocation2 + $0x5a8] sm:$0xff]  ;;  %v2425_v33 = vld [vmem:[#allocation2 + $0x400] sm:$0xff] }
 0x462   :  { %2700 = vmatpush.msra.mxu1 %v2425_v33  ;;  %v2477_v10 = vld [vmem:[#allocation2 + $0x5a0] sm:$0xff]  ;;  %2720 = vmatpush.msra.mxu2 %v2441_v32  ;;  %v2398_v31 = vld [vmem:[#allocation2 + $0x328] sm:$0xff] }
 0x463   :  { %2618 = vmatpush.msrb.mxu0 %v2363_v16  ;;  %2749 = vmatpush.msrb.mxu3 %v2484_v0  ;;  %v2476_v16 = vld [vmem:[#allocation2 + $0x598] sm:$0xff]  ;;  %v2493_v33 = vld [vmem:[#allocation2 + $0x620] sm:$0xff] }
 0x464   :  { %v2517_v32 = vld [vmem:[#allocation2 + $0x6e0] sm:$0xff] }
 0x465   :  { %2619 = vmatpush.msrb.mxu0 %v2362_v39  ;;  %2750 = vmatpush.msrb.mxu3 %v2483_v52  ;;  %v2377_v39 = vld [vmem:[#allocation2 + $0x280] sm:$0xff] }
 0x466   :  { %v2095_v38 = vpop.f32.mrf.mxu1  ;;  %v2397_v52 = vld [vmem:[#allocation2 + $0x320] sm:$0xff] }
 0x467   :  { %2620 = vmatpush.msrb.mxu0 %v2361_v47  ;;  %v2096_v23 = vadd.f32 %v2095_v38, %v1995_v29  ;;  %2751 = vmatpush.msrb.mxu3 %v2482_v4  ;;  %v2209_v47 = vmax.f32 %v4766_v58, 0.0  ;;  %v2474_v29 = vld [vmem:[#allocation2 + $0x588] sm:$0xff]  ;;  %v2407_v38 = vld [vmem:[#allocation2 + $0x370] sm:$0xff] }
 0x468   :  { %2621 = vmatmul.f32.vlgmr.msrb.gmra.mxu0 %v2263_v7  ;;  %v2473_v7 = vld [vmem:[#allocation2 + $0x580] sm:$0xff]  ;;  %v2403_v58 = vld [vmem:[#allocation2 + $0x350] sm:$0xff] }
 0x469   :  { %2625 = vmatpush.msra.mxu0 %v2392_v50  ;;  %v2197_v18 = vadd.f32 %v2196_v14, %v2096_v23  ;;  %2752 = vmatpush.msrb.mxu3 %v2481_v59  ;;  %v2264_v50 = vsel %vm1130_vm6, %v2209_v47, %v2249_v3  ;;  %v2406_v23 = vld [vmem:[#allocation2 + $0x368] sm:$0xff]  ;;  %v2405_v14 = vld [vmem:[#allocation2 + $0x360] sm:$0xff]  ;;  %v2395_v4 = vld [vmem:[#allocation2 + $0x310] sm:$0xff] }
 0x46a   :  { %v2499_v59 = vld [vmem:[#allocation2 + $0x650] sm:$0xff]  ;;  %v2490_v47 = vld [vmem:[#allocation2 + $0x608] sm:$0xff] }
 0x46b   :  { %v2226_v20 = vmax.f32 %v2197_v18, 0.0  ;;  %2626 = vmatpush.msra.mxu0 %v2391_v15  ;;  %2753 = vmatpush.msrb.mxu3 %v2480_v30  ;;  %v2404_v15 = vld [vmem:[#allocation2 + $0x358] sm:$0xff]  ;;  %v2402_v18 = vld [vmem:[#allocation2 + $0x348] sm:$0xff]  ;;  %v2211_v30 = vmax.f32 %v4775_v27, 0.0  ;;  %v2491_v3 = vld [vmem:[#allocation2 + $0x610] sm:$0xff] }
 0x46c   :  { %v2518_v27 = vld [vmem:[#allocation2 + $0x6e8] sm:$0xff] }
 0x46d   :  { %2627 = vmatpush.msra.mxu0 %v2390_v9  ;;  %2288 = vrot.lane.b32.xlu0 %v2226_v20, %s3044_s24  ;;  %v2401_v9 = vld [vmem:[#allocation2 + $0x340] sm:$0xff]  ;;  %v2504_v20 = vld [vmem:[#allocation2 + $0x678] sm:$0xff] }
 0x46e   :  { %2754 = vmatpush.msrb.mxu3 %v2479_v44  ;;  %2765 = vmatpush.msrb.mxu1 %v2504_v20  ;;  %v2495_v44 = vld [vmem:[#allocation2 + $0x630] sm:$0xff]  ;;  %v2460_v20 = vld [vmem:[#allocation2 + $0x518] sm:$0xff] }
 0x46f   :  { %2628 = vmatpush.msra.mxu0 %v2389_v55 }
 0x470   :  { %2755 = vmatpush.msrb.mxu3 %v2478_v51  ;;  %v2469_v51 = vld [vmem:[#allocation2 + $0x560] sm:$0xff] }
 0x471   :  { %2629 = vmatpush.msra.mxu0 %v2388_v48  ;;  %v2217_v48 = vmax.f32 %v4804_v61, 0.0  ;;  %v2500_v61 = vld [vmem:[#allocation2 + $0x658] sm:$0xff] }
 0x472   :  { %2756 = vmatpush.msrb.mxu3 %v2477_v10  ;;  %v2492_v10 = vld [vmem:[#allocation2 + $0x618] sm:$0xff] }
 0x473   :  { %2630 = vmatpush.msra.mxu0 %v2387_v21  ;;  %v2503_v21 = vld [vmem:[#allocation2 + $0x670] sm:$0xff] }
 0x474   :  { %2757 = vmatpush.msrb.mxu3 %v2476_v16  ;;  %2766 = vmatpush.msrb.mxu1 %v2503_v21  ;;  %v2467_v16 = vld [vmem:[#allocation2 + $0x550] sm:$0xff]  ;;  %v2457_v21 = vld [vmem:[#allocation2 + $0x500] sm:$0xff] }
 0x475   :  { %2631 = vmatpush.msra.mxu0 %v2386_v62 }
 0x476   :  { %2758 = vmatpush.msrb.mxu3 %v2475_v53  ;;  %v2466_v53 = vld [vmem:[#allocation2 + $0x548] sm:$0xff] }
 0x477   :  { %2632 = vmatpush.msra.mxu0 %v2385_v19  ;;  %v2502_v19 = vld [vmem:[#allocation2 + $0x668] sm:$0xff] }
 0x478   :  { %v4838_v49 = vpop.permute.xlu0 %2992  ;;  %2759 = vmatpush.msrb.mxu3 %v2474_v29  ;;  %2767 = vmatpush.msrb.mxu1 %v2502_v19  ;;  %v2465_v29 = vld [vmem:[#allocation2 + $0x540] sm:$0xff]  ;;  %v2223_v19 = vmax.f32 %v4827_v43, 0.0  ;;  %v2820_v43 = vld [vmem:[%s4930_s9 + $0x70] sm:$0xff] }
 0x479   :  { %2633 = vmatpush.msra.mxu0 %v2384_v56  ;;  %v2994_v13 = vunpack.i.l.bf16 %v4838_v49  ;;  %v2396_v56 = vld [vmem:[#allocation2 + $0x318] sm:$0xff] }
 0x47a   :  { %2760 = vmatpush.msrb.mxu3 %v2473_v7  ;;  %2768 = vmatpush.msrb.mxu1 %v2501_v37  ;;  %v2464_v7 = vld [vmem:[#allocation2 + $0x538] sm:$0xff] }
 0x47b   :  { %2634 = vmatpush.msra.mxu0 %v2383_v11  ;;  %v2266_v57 = vsel %vm1130_vm6, %v2213_v22, %v2994_v13  ;;  %v2394_v22 = vld [vmem:[#allocation2 + $0x308] sm:$0xff]  ;;  %v2995_v13 = vunpack.i.h.bf16 %v4838_v49  ;;  %v2471_v49 = vld [vmem:[#allocation2 + $0x570] sm:$0xff] }
 0x47c   :  { %2681 = vmatmul.f32.vlgmr.msra.gmra.mxu3 %v2266_v57  ;;  %2769 = vmatpush.msrb.mxu1 %v2500_v61  ;;  %v2472_v57 = vld [vmem:[#allocation2 + $0x578] sm:$0xff] }
 0x47d   :  { %2635 = vmatpush.msra.mxu0 %v2382_v36  ;;  %v2393_v36 = vld [vmem:[#allocation2 + $0x300] sm:$0xff]  ;;  %v2265_v2 = vsel %vm1130_vm6, %v2211_v30, %v2995_v13  ;;  %v2816_v13 = vld [vmem:[%s4930_s9 + $0x50] sm:$0xff]  ;;  %v2813_v30 = vld [vmem:[%s4930_s9 + $0x38] sm:$0xff] }
 0x47e   :  { %2770 = vmatpush.msrb.mxu1 %v2499_v59  ;;  %v2818_v59 = vld [vmem:[%s4930_s9 + $0x60] sm:$0xff] }
 0x47f   :  { %2636 = vmatpush.msra.mxu0 %v2381_v24  ;;  %v2520_v24 = vld [vmem:[#allocation2 + $0x6f8] sm:$0xff] }
 0x480   :  { %2771 = vmatpush.msrb.mxu1 %v2498_v40  ;;  %2785 = vmatpush.msrb.mxu2 %v2520_v24  ;;  %v2815_v40 = vld [vmem:[%s4930_s9 + $0x48] sm:$0xff]  ;;  %v2809_v24 = vld [vmem:[%s4930_s9 + $0x18] sm:$0xff] }
 0x481   :  { %2637 = vmatpush.msra.mxu0 %v2380_v12  ;;  %v2494_v12 = vld [vmem:[#allocation2 + $0x628] sm:$0xff] }
 0x482   :  { %2772 = vmatpush.msrb.mxu1 %v2497_v63  ;;  %2786 = vmatpush.msrb.mxu2 %v2519_v34  ;;  %v2812_v63 = vld [vmem:[%s4930_s9 + $0x30] sm:$0xff] }
 0x483   :  { %2638 = vmatpush.msra.mxu0 %v2379_v5  ;;  %v2468_v5 = vld [vmem:[#allocation2 + $0x558] sm:$0xff] }
 0x484   :  { %2773 = vmatpush.msrb.mxu1 %v2496_v1  ;;  %2787 = vmatpush.msrb.mxu2 %v2518_v27  ;;  %v2810_v1 = vld [vmem:[%s4930_s9 + $0x20] sm:$0xff]  ;;  %v2808_v27 = vld [vmem:[%s4930_s9 + $0x10] sm:$0xff] }
 0x485   :  { %2639 = vmatpush.msra.mxu0 %v2378_v45  ;;  %v2516_v45 = vld [vmem:[#allocation2 + $0x6d8] sm:$0xff] }
 0x486   :  { %2774 = vmatpush.msrb.mxu1 %v2495_v44  ;;  %2788 = vmatpush.msrb.mxu2 %v2517_v32  ;;  %v2806_v32 = vld [vmem:[%s4930_s9] sm:$0xff] }
 0x487   :  { %2640 = vmatpush.msra.mxu0 %v2377_v39  ;;  %v2515_v39 = vld [vmem:[#allocation2 + $0x6d0] sm:$0xff] }
 0x488   :  { %2641 = vmatmul.f32.vlgmr.msra.gmra.mxu0 %v2264_v50  ;;  %2775 = vmatpush.msrb.mxu1 %v2494_v12  ;;  %v2489_v50 = vld [vmem:[#allocation2 + $0x600] sm:$0xff] }
 0x489   :  { %2645 = vmatpush.msrb.mxu0 %v2408_v42  ;;  %2789 = vmatpush.msrb.mxu2 %v2516_v45  ;;  %v2514_v42 = vld [vmem:[#allocation2 + $0x6c8] sm:$0xff] }
 0x48a   :  { %2776 = vmatpush.msrb.mxu1 %v2493_v33 }
 0x48b   :  { %2646 = vmatpush.msrb.mxu0 %v2407_v38  ;;  %2790 = vmatpush.msrb.mxu2 %v2515_v39  ;;  %v2513_v38 = vld [vmem:[#allocation2 + $0x6c0] sm:$0xff] }
 0x48c   :  { %2777 = vmatpush.msrb.mxu1 %v2492_v10 }
 0x48d   :  { %2647 = vmatpush.msrb.mxu0 %v2406_v23  ;;  %2791 = vmatpush.msrb.mxu2 %v2514_v42  ;;  %v2512_v23 = vld [vmem:[#allocation2 + $0x6b8] sm:$0xff] }
 0x48e   :  { %2778 = vmatpush.msrb.mxu1 %v2491_v3 }
 0x48f   :  { %2648 = vmatpush.msrb.mxu0 %v2405_v14  ;;  %v2463_v14 = vld [vmem:[#allocation2 + $0x530] sm:$0xff]  ;;  %2792 = vmatpush.msrb.mxu2 %v2513_v38 }
 0x490   :  { %2779 = vmatpush.msrb.mxu1 %v2490_v47 }
 0x491   :  { %2649 = vmatpush.msrb.mxu0 %v2404_v15  ;;  %v2511_v15 = vld [vmem:[#allocation2 + $0x6b0] sm:$0xff]  ;;  %2793 = vmatpush.msrb.mxu2 %v2512_v23 }
 0x492   :  { %2780 = vmatpush.msrb.mxu1 %v2489_v50 }
 0x493   :  { %2650 = vmatpush.msrb.mxu0 %v2403_v58  ;;  %v2462_v58 = vld [vmem:[#allocation2 + $0x528] sm:$0xff]  ;;  %2794 = vmatpush.msrb.mxu2 %v2511_v15 }
 0x495   :  { %2651 = vmatpush.msrb.mxu0 %v2402_v18  ;;  %v2510_v18 = vld [vmem:[#allocation2 + $0x6a8] sm:$0xff] }
 0x496   :  { %2795 = vmatpush.msrb.mxu2 %v2510_v18 }
 0x497   :  { %2652 = vmatpush.msrb.mxu0 %v2401_v9  ;;  %v2461_v9 = vld [vmem:[#allocation2 + $0x520] sm:$0xff] }
 0x498   :  { %v2998_v55 = vpop.permute.xlu1 %2997 }
 0x499   :  { %2653 = vmatpush.msrb.mxu0 %v2400_v17  ;;  %v3000_v26 = vunpack.i.h.bf16 %v2998_v55  ;;  %v2999_v8 = vunpack.i.l.bf16 %v2998_v55  ;;  %v2509_v17 = vld [vmem:[#allocation2 + $0x6a0] sm:$0xff]  ;;  %v2459_v55 = vld [vmem:[#allocation2 + $0x510] sm:$0xff] }
 0x49a   :  { %2796 = vmatpush.msrb.mxu2 %v2509_v17  ;;  %v3010_v17 = vld [vmem:[%s4931_s10] ss:$0 sm:$0xff] }
 0x49b   :  { %2654 = vmatpush.msrb.mxu0 %v2399_v25  ;;  %v2291_v62 = vsel %vm1130_vm6, %v2215_v6, %v3000_v26  ;;  %v2292_v0 = vsel %vm1130_vm6, %v2217_v48, %v2999_v8  ;;  %v2508_v25 = vld [vmem:[#allocation2 + $0x698] sm:$0xff]  ;;  %v2507_v6 = vld [vmem:[#allocation2 + $0x690] sm:$0xff]  ;;  %v2458_v48 = vld [vmem:[#allocation2 + $0x508] sm:$0xff] }
 0x49c   :  { %2701 = vmatmul.f32.vlgmr.msra.gmra.mxu1 %v2291_v62  ;;  %2721 = vmatmul.f32.vlgmr.msra.gmra.mxu2 %v2292_v0  ;;  %v2506_v8 = vld [vmem:[#allocation2 + $0x688] sm:$0xff]  ;;  %v2505_v62 = vld [vmem:[#allocation2 + $0x680] sm:$0xff] }
 0x49d   :  { %2655 = vmatpush.msrb.mxu0 %v2398_v31  ;;  %2797 = vmatpush.msrb.mxu2 %v2508_v25  ;;  %v2219_v31 = vmax.f32 %v4816_v41, 0.0  ;;  %v2542_v41 = vpop.f32.mrf.mxu0 }
 0x49f   :  { %2656 = vmatpush.msrb.mxu0 %v2397_v52  ;;  %2798 = vmatpush.msrb.mxu2 %v2507_v6 }
 0x4a0   :  { %v4849_v54 = vpop.permute.xlu2 %3002 }
 0x4a1   :  { %2657 = vmatpush.msrb.mxu0 %v2396_v56  ;;  %v3004_v11 = vunpack.i.l.bf16 %v4849_v54  ;;  %v3005_v26 = vunpack.i.h.bf16 %v4849_v54  ;;  %2799 = vmatpush.msrb.mxu2 %v2506_v8  ;;  %v2225_v56 = vmax.f32 %v4832_v46, 0.0  ;;  %v2819_v46 = vld [vmem:[%s4930_s9 + $0x68] sm:$0xff] }
 0x4a3   :  { %2658 = vmatpush.msrb.mxu0 %v2395_v4  ;;  %v2294_v28 = vsel %vm1130_vm6, %v2221_v60, %v3004_v11  ;;  %v2293_v0 = vsel %vm1130_vm6, %v2219_v31, %v3005_v26  ;;  %2800 = vmatpush.msrb.mxu2 %v2505_v62  ;;  %v2821_v60 = vld [vmem:[%s4930_s9 + $0x78] sm:$0xff] }
 0x4a4   :  { %2761 = vmatmul.f32.vlgmr.msrb.gmra.mxu3 %v2294_v28 }
 0x4a5   :  { %2659 = vmatpush.msrb.mxu0 %v2394_v22  ;;  %v2562_v54 = vpop.f32.mrf.mxu0  ;;  %v2817_v22 = vld [vmem:[%s4930_s9 + $0x58] sm:$0xff] }
 0x4a7   :  { %2660 = vmatpush.msrb.mxu0 %v2393_v36  ;;  %v2814_v36 = vld [vmem:[%s4930_s9 + $0x40] sm:$0xff] }
 0x4a8   :  { %2661 = vmatmul.f32.vlgmr.msrb.gmra.mxu0 %v2265_v2  ;;  %v2811_v2 = vld [vmem:[%s4930_s9 + $0x28] sm:$0xff] }
 0x4a9   :  { %2725 = vmatpush.msra.mxu0 %v2472_v57 }
 0x4ab   :  { %2726 = vmatpush.msra.mxu0 %v2471_v49  ;;  %v3009_v49 = vld [vmem:[%s4929_s8] ss:$0 sm:$0xff] }
 0x4ac   :  { %v2543_v44 = vadd.f32 %v3009_v49, %v2542_v41 }
 0x4ad   :  { %2727 = vmatpush.msra.mxu0 %v2470_v35  ;;  %v2582_v11 = vpop.f32.mrf.mxu0 }
 0x4ae   :  { %v2563_v35 = vadd.f32 %v2562_v54, %v2543_v44 }
 0x4af   :  { %2728 = vmatpush.msra.mxu0 %v2469_v51  ;;  %v2807_v51 = vld [vmem:[%s4930_s9 + $0x8] sm:$0xff] }
 0x4b0   :  { %v2583_v12 = vadd.f32 %v2582_v11, %v2563_v35 }
 0x4b1   :  { %2729 = vmatpush.msra.mxu0 %v2468_v5 }
 0x4b3   :  { %2730 = vmatpush.msra.mxu0 %v2467_v16 }
 0x4b5   :  { %2731 = vmatpush.msra.mxu0 %v2466_v53 }
 0x4b7   :  { %2732 = vmatpush.msra.mxu0 %v2465_v29 }
 0x4b9   :  { %2733 = vmatpush.msra.mxu0 %v2464_v7 }
 0x4bb   :  { %2734 = vmatpush.msra.mxu0 %v2463_v14 }
 0x4bd   :  { %2735 = vmatpush.msra.mxu0 %v2462_v58 }
 0x4bf   :  { %2736 = vmatpush.msra.mxu0 %v2461_v9 }
 0x4c1   :  { %2737 = vmatpush.msra.mxu0 %v2460_v20 }
 0x4c3   :  { %2738 = vmatpush.msra.mxu0 %v2459_v55 }
 0x4c5   :  { %2739 = vmatpush.msra.mxu0 %v2458_v48  ;;  %v2602_v28 = vpop.f32.mrf.mxu0 }
 0x4c6   :  { %v2603_v33 = vadd.f32 %v2602_v28, %v2583_v12 }
 0x4c7   :  { %2740 = vmatpush.msra.mxu0 %v2457_v21 }
 0x4c8   :  { %2741 = vmatmul.f32.vlgmr.msra.gmra.mxu0 %v2293_v0 }
 0x4c9   :  { %2826 = vmatpush.msrb.mxu0 %v2821_v60 }
 0x4cb   :  { %2827 = vmatpush.msrb.mxu0 %v2820_v43 }
 0x4cd   :  { %2828 = vmatpush.msrb.mxu0 %v2819_v46 }
 0x4ce   :  { %v2285_v52 = vpop.permute.xlu1 %2284 }
 0x4cf   :  { %v2295_v37 = vsel %vm1130_vm6, %v2223_v19, %v2285_v52  ;;  %2829 = vmatpush.msrb.mxu0 %v2818_v59 }
 0x4d0   :  { %2781 = vmatmul.f32.vlgmr.msrb.gmra.mxu1 %v2295_v37 }
 0x4d1   :  { %2830 = vmatpush.msrb.mxu0 %v2817_v22 }
 0x4d3   :  { %2831 = vmatpush.msrb.mxu0 %v2816_v13 }
 0x4d5   :  { %2832 = vmatpush.msrb.mxu0 %v2815_v40 }
 0x4d7   :  { %2833 = vmatpush.msrb.mxu0 %v2814_v36 }
 0x4d9   :  { %2834 = vmatpush.msrb.mxu0 %v2813_v30 }
 0x4db   :  { %2835 = vmatpush.msrb.mxu0 %v2812_v63 }
 0x4dd   :  { %2836 = vmatpush.msrb.mxu0 %v2811_v2 }
 0x4df   :  { %v2289_v61 = vpop.permute.xlu0 %2288  ;;  %2837 = vmatpush.msrb.mxu0 %v2810_v1 }
 0x4e0   :  { %v2296_v4 = vsel %vm1130_vm6, %v2225_v56, %v2289_v61 }
 0x4e1   :  { %2801 = vmatmul.f32.vlgmr.msrb.gmra.mxu2 %v2296_v4  ;;  %2838 = vmatpush.msrb.mxu0 %v2809_v24 }
 0x4e3   :  { %2839 = vmatpush.msrb.mxu0 %v2808_v27 }
 0x4e5   :  { %v2622_v57 = vpop.f32.mrf.mxu0  ;;  %2840 = vmatpush.msrb.mxu0 %v2807_v51 }
 0x4e6   :  { %v2623_v5 = vadd.f32 %v2622_v57, %v2603_v33 }
 0x4e7   :  { %2841 = vmatpush.msrb.mxu0 %v2806_v32 }
 0x4ff   :  { %v2682_v3 = vpop.f32.mrf.mxu3 }
 0x505   :  { %v2642_v34 = vpop.f32.mrf.mxu0 }
 0x506   :  { %v2643_v45 = vadd.f32 %v2642_v34, %v2623_v5 }
 0x519   :  { %v2702_v53 = vpop.f32.mrf.mxu1 }
 0x51f   :  { %v2722_v42 = vpop.f32.mrf.mxu2 }
 0x525   :  { %v2662_v10 = vpop.f32.mrf.mxu0 }
 0x526   :  { %v2663_v16 = vadd.f32 %v2662_v10, %v2643_v45 }
 0x527   :  { %v2762_v7 = vpop.f32.mrf.mxu3 }
 0x528   :  { %v2683_v39 = vadd.f32 %v2682_v3, %v2663_v16 }
 0x52a   :  { %v2703_v47 = vadd.f32 %v2702_v53, %v2683_v39 }
 0x52c   :  { %v2723_v50 = vadd.f32 %v2722_v42, %v2703_v47 }
 0x545   :  { %v2742_v29 = vpop.f32.mrf.mxu0 }
 0x546   :  { %v2743_v38 = vadd.f32 %v2742_v29, %v2723_v50 }
 0x548   :  { %v2763_v14 = vadd.f32 %v2762_v7, %v2743_v38 }
 0x54d   :  { %v2782_v23 = vpop.f32.mrf.mxu1 }
 0x54e   :  { %v2783_v15 = vadd.f32 %v2782_v23, %v2763_v14 }
 0x564   :  { %v2802_v58 = vpop.f32.mrf.mxu2 }
 0x565   :  { %v2803_v18 = vadd.f32 %v2802_v58, %v2783_v15 }
 0x567   :  { %v2805_v9 = vmax.f32 %v2803_v18, 0.0 }
 0x569   :  { %2842 = vmatmul.f32.vlgmr.msrb.gmra.mxu0 %v2805_v9 }
 0x5e6   :  { %v2843_v20 = vpop.f32.mrf.mxu0 }
 0x5e7   :  { %v2844_v25 = vadd.f32 %v3010_v17, %v2843_v20 }
 0x5e9   :  { %2846 = vst [vmem:[%s4932_s11] sm:$0xff] %v2844_v25 }
 0x5ea   :  { %2851 = vsyncpa [#allocation3], 1 }

</bundles_post_ra>
